<compile_context>
chip_gen: v7x
topology: tpu7x:2x2x1
jax: 0.10.0
libtpu: 0.0.40
codegen_flags: <defaults>
</compile_context>

<pallas_src>
import functools

import jax
import jax.numpy as jnp
from jax import lax
from jax.experimental import pallas as pl
from jax.experimental.pallas import tpu as pltpu

_LANE = 128   # lane-padded width for channels / hidden / classifier output


# ----------------------------- kernel helpers ---------------------------------

def _elu(v):
    # torch.nn.ELU(alpha=1.0).  exp(v)-1 is used in BOTH the kernel and the
    # reference so they match exactly.
    return jnp.where(v > 0, v, jnp.exp(v) - 1.0)


def _dilated_conv3(x_bf, w_ref, b_ref, d):
    """k=3 'conv' with dilation d on a flat row stream.

    x_bf:  (N, Cp) bf16 activations (N = TB * L1p rows, item-major).
    w_ref: (3, Cp, Cp) bf16 per-tap weights; b_ref: (1, Cp) f32.
    Returns (N, Cp) f32 = ELU(sum_k x[i + k*d] @ W_k + b).
    Rows whose taps run past an item's valid region are garbage but are never
    selected downstream (see the pooling mask in the kernel).
    """
    n, cp = x_bf.shape
    xp = jnp.concatenate([x_bf, jnp.zeros((8, cp), x_bf.dtype)], axis=0)  # 2*d <= 8
    acc = jnp.dot(x_bf, w_ref[0], preferred_element_type=jnp.float32)
    acc = acc + jnp.dot(xp[d:d + n], w_ref[1], preferred_element_type=jnp.float32)
    acc = acc + jnp.dot(xp[2 * d:2 * d + n], w_ref[2], preferred_element_type=jnp.float32)
    return _elu(acc + b_ref[...])


# ----------------------------- Pallas kernel ----------------------------------

def _news_cnn_kernel(xc_ref,               # (TB*L1p, 3E) bf16  layer-1 im2col rows
                     w1_ref, b1_ref,       # (3E, Cp)  bf16, (1, Cp) f32
                     w2_ref, b2_ref,       # (3, Cp, Cp) bf16, (1, Cp) f32
                     w3_ref, b3_ref,       # (3, Cp, Cp) bf16, (1, Cp) f32
                     w4_ref, b4_ref,       # (3, Cp, Cp) bf16, (1, Cp) f32
                     wfc1_ref, bfc1_ref,   # (Cp, Hp) bf16, (1, Hp) f32
                     wfc2_ref, bfc2_ref,   # (Hp, 128) bf16, (1, 128) f32
                     o_ref,                # (TB, 128) f32
                     *, l1p, l4):
    bf = jnp.bfloat16
    tb = o_ref.shape[0]
    cp = w1_ref.shape[1]

    # conv1 (k=3, stride 1): ONE im2col matmul for the whole batch tile.
    a1 = _elu(jnp.dot(xc_ref[...], w1_ref[...],
                      preferred_element_type=jnp.float32) + b1_ref[...])   # (N, Cp)

    # conv2/3/4: the stride-2 layers become dilated convs (d = 1, 2, 4) on the
    # undecimated row stream; decimation is deferred to the pooling row-select.
    z2 = _dilated_conv3(a1.astype(bf), w2_ref, b2_ref, d=1)
    z3 = _dilated_conv3(z2.astype(bf), w3_ref, b3_ref, d=2)
    z4 = _dilated_conv3(z3.astype(bf), w4_ref, b4_ref, d=4)                # (N, Cp) f32

    # avg_pool1d over the surviving positions of each item: the surviving
    # conv-4 outputs live at per-item rows {0, 4, ..., 4*(l4-1)}.  The 1/l4
    # scale is folded into wfc1 by the wrapper, so a masked sum suffices.
    z4b = z4.reshape(tb, l1p, cp)                                          # l1p % 8 == 0
    r = lax.broadcasted_iota(jnp.int32, (tb, l1p, cp), 1)
    sel = (r % 4 == 0) & (r < 4 * l4)
    feat = jnp.sum(jnp.where(sel, z4b, 0.0), axis=1)                       # (TB, Cp) f32

    # classifier: Linear -> (Dropout = id) -> ReLU -> Linear, whole tile at once.
    hid = jnp.maximum(
        jnp.dot(feat.astype(bf), wfc1_ref[...],
                preferred_element_type=jnp.float32) + bfc1_ref[...], 0.0)  # (TB, Hp)
    o_ref[...] = jnp.dot(hid.astype(bf), wfc2_ref[...],
                         preferred_element_type=jnp.float32) + bfc2_ref[...]


# ------------------------------- wrapper ---------------------------------------

def _pad2(a, rows, cols):
    return jnp.zeros((rows, cols), jnp.float32).at[:a.shape[0], :a.shape[1]].set(a)


@jax.jit
def news_classifier_forward(tokens, params):
    """tokens: (B, L) int32 -> logits (B, num_classes) float32."""
    # nn.Embedding gather: plain JAX indexing outside the kernel.
    x_emb = params["emb"][tokens]                          # (B, L, E) f32
    B, L, E = x_emb.shape
    C = params["w1"].shape[2]
    H = params["wfc1"].shape[1]
    NC = params["wfc2"].shape[1]

    L1 = L - 2                        # conv1 (k=3, s=1)
    L2 = (L1 - 3) // 2 + 1            # conv2 (k=3, s=2)
    L3 = (L2 - 3) // 2 + 1            # conv3 (k=3, s=2)
    L4 = L3 - 2                       # conv4 (k=3, s=1)
    assert L4 >= 1, "sequence too short for the conv stack"

    CP = HP = _LANE
    L1p = -(-L1 // 8) * 8             # per-item row count, sublane aligned

    # --- batch tiling: TB items per grid step; >= 2 grid steps when possible ---
    Bp = -(-B // 8) * 8
    if Bp <= 8:
        TB = Bp
    else:
        TB = min(64, max(8, (Bp // 2) // 8 * 8))           # cap, keep >= 2 steps
        TB = min(TB, max(8, (2048 // L1p) // 8 * 8))       # keep intermediates small
        Bp = -(-Bp // TB) * TB

    # --- layer-1 im2col + row padding in the wrapper, flattened to a 2-D stream ---
    x_emb = jnp.pad(x_emb, ((0, Bp - B), (0, 0), (0, 0)))
    cols = jnp.concatenate([x_emb[:, k:k + L1, :] for k in range(3)], axis=-1)
    cols = jnp.pad(cols, ((0, 0), (0, L1p - L1), (0, 0)))
    xc = cols.reshape(Bp * L1p, 3 * E).astype(jnp.bfloat16)

    # --- lane-padded (128-wide) weights: bf16 operands, f32 biases ---
    def pad_conv(w):                                        # (3, C, C) -> (3, CP, CP)
        return (jnp.zeros((3, CP, CP), jnp.float32)
                .at[:, :C, :C].set(w).astype(jnp.bfloat16))

    w1p = _pad2(params["w1"].reshape(3 * E, C), 3 * E, CP).astype(jnp.bfloat16)
    b1p = _pad2(params["b1"], 1, CP)
    w2p, b2p = pad_conv(params["w2"]), _pad2(params["b2"], 1, CP)
    w3p, b3p = pad_conv(params["w3"]), _pad2(params["b3"], 1, CP)
    w4p, b4p = pad_conv(params["w4"]), _pad2(params["b4"], 1, CP)
    wfc1p = _pad2(params["wfc1"] * (1.0 / L4), CP, HP).astype(jnp.bfloat16)  # pool scale folded
    bfc1p = _pad2(params["bfc1"], 1, HP)
    wfc2p = _pad2(params["wfc2"], HP, _LANE).astype(jnp.bfloat16)
    bfc2p = _pad2(params["bfc2"], 1, _LANE)

    def full(shape):
        rank = len(shape)
        return pl.BlockSpec(shape, lambda g, rank=rank: (0,) * rank)

    grid_spec = pltpu.PrefetchScalarGridSpec(
        num_scalar_prefetch=0,
        grid=(Bp // TB,),
        in_specs=[
            pl.BlockSpec((TB * L1p, 3 * E), lambda g: (g, 0)),   # im2col rows
            full((3 * E, CP)), full((1, CP)),                    # conv1
            full((3, CP, CP)), full((1, CP)),                    # conv2
            full((3, CP, CP)), full((1, CP)),                    # conv3
            full((3, CP, CP)), full((1, CP)),                    # conv4
            full((CP, HP)), full((1, HP)),                       # fc1
            full((HP, _LANE)), full((1, _LANE)),                 # fc2 (lane-padded)
        ],
        out_specs=pl.BlockSpec((TB, _LANE), lambda g: (g, 0)),
    )

    logits_pad = pl.pallas_call(
        functools.partial(_news_cnn_kernel, l1p=L1p, l4=L4),
        out_shape=jax.ShapeDtypeStruct((Bp, _LANE), jnp.float32),
        grid_spec=grid_spec,
        compiler_params=pltpu.CompilerParams(
            dimension_semantics=("parallel",)),   # batch tiles independent -> v7x 2 TCs
    )(xc, w1p, b1p, w2p, b2p, w3p, b3p, w4p, b4p,
      wfc1p, bfc1p, wfc2p, bfc2p)

    return logits_pad[:B, :NC]


# ---------------------------- pure-JAX reference --------------------------------

def _ref_forward(tokens, params):
    """Pure-JAX reference of the PyTorch module (eval mode), with the same bf16
    operand quantization / f32 accumulation the kernel uses."""
    bf = jnp.bfloat16
    emb = params["emb"][tokens].astype(bf)                # (B, L, E)
    h = jnp.transpose(emb, (0, 2, 1))                     # (B, E, L)  torch NCW

    def conv(h_bf, w_kic, b, stride):
        # kernel stored as (K, Cin, Cout) -> torch OIW layout (Cout, Cin, K)
        w_oiw = jnp.transpose(w_kic.astype(bf), (2, 1, 0))
        out = lax.conv_general_dilated(
            h_bf, w_oiw, window_strides=(stride,), padding="VALID",
            dimension_numbers=("NCH", "OIH", "NCH"),
            preferred_element_type=jnp.float32)
        return out + b.reshape(1, -1, 1)

    h = _elu(conv(h, params["w1"], params["b1"], 1)).astype(bf)
    h = _elu(conv(h, params["w2"], params["b2"], 2)).astype(bf)
    h = _elu(conv(h, params["w3"], params["b3"], 2)).astype(bf)
    h = _elu(conv(h, params["w4"], params["b4"], 1))
    feat = jnp.mean(h, axis=2)                            # avg_pool1d over full length
    hid = jnp.maximum(
        jnp.dot(feat.astype(bf), params["wfc1"].astype(bf),
                preferred_element_type=jnp.float32) + params["bfc1"], 0.0)
    return (jnp.dot(hid.astype(bf), params["wfc2"].astype(bf),
                    preferred_element_type=jnp.float32) + params["bfc2"])


# ----------------------------------- main ---------------------------------------

def _init_params(key, vocab, E, C, H, NC, padding_idx=0):
    ks = jax.random.split(key, 12)
    scale = 0.1
    emb = jax.random.normal(ks[0], (vocab, E), jnp.float32) * 0.5
    emb = emb.at[padding_idx].set(0.0)                    # nn.Embedding padding_idx row = 0
    return {
        "emb": emb,
        # conv weights kept as (K=3, Cin, Cout); wrapper pads / per-tap splits them
        "w1": jax.random.normal(ks[1], (3, E, C), jnp.float32) * scale,
        "b1": (jax.random.normal(ks[2], (C,), jnp.float32) * scale).reshape(1, C),
        "w2": jax.random.normal(ks[3], (3, C, C), jnp.float32) * scale,
        "b2": (jax.random.normal(ks[4], (C,), jnp.float32) * scale).reshape(1, C),
        "w3": jax.random.normal(ks[5], (3, C, C), jnp.float32) * scale,
        "b3": (jax.random.normal(ks[6], (C,), jnp.float32) * scale).reshape(1, C),
        "w4": jax.random.normal(ks[7], (3, C, C), jnp.float32) * scale,
        "b4": (jax.random.normal(ks[8], (C,), jnp.float32) * scale).reshape(1, C),
        "wfc1": jax.random.normal(ks[9], (C, H), jnp.float32) * scale,
        "bfc1": (jax.random.normal(ks[10], (H,), jnp.float32) * scale).reshape(1, H),
        "wfc2": jax.random.normal(ks[11], (H, NC), jnp.float32) * scale,
        "bfc2": jnp.zeros((1, NC), jnp.float32),
    }


if __name__ == "__main__":
    # TODO(synk): dropout layers are identity (eval-mode); training-mode stochastic
    # dropout would need pltpu.prng_* inside the kernel.
    B, L = 2, 32          # batch, sequence length (L=32 -> conv lengths 30/14/6/4)
    VOCAB, E, C, H, NC = 50, 16, 16, 32, 4

    key = jax.random.PRNGKey(0)
    k_tok, k_par = jax.random.split(key)
    tokens = jax.random.randint(k_tok, (B, L), 0, VOCAB, dtype=jnp.int32)
    params = _init_params(k_par, VOCAB, E, C, H, NC)

    out = news_classifier_forward(tokens, params)
    out = jax.block_until_ready(out)

    ref = _ref_forward(tokens, params)
    assert out.shape == (B, NC), out.shape
    assert jnp.allclose(out, ref, rtol=1e-2, atol=2e-3), (out, ref)

    print("KERNEL_OK")
</pallas_src>

<mosaic_0001>
module attributes {stable_mosaic.version = 11 : i64} {
  func.func @_news_cnn_kernel(%arg0: i32, %arg1: memref<256x48xbf16, #tpu.memory_space<vmem>>, %arg2: memref<48x128xbf16, #tpu.memory_space<vmem>>, %arg3: memref<1x128xf32, #tpu.memory_space<vmem>>, %arg4: memref<3x128x128xbf16, #tpu.memory_space<vmem>>, %arg5: memref<1x128xf32, #tpu.memory_space<vmem>>, %arg6: memref<3x128x128xbf16, #tpu.memory_space<vmem>>, %arg7: memref<1x128xf32, #tpu.memory_space<vmem>>, %arg8: memref<3x128x128xbf16, #tpu.memory_space<vmem>>, %arg9: memref<1x128xf32, #tpu.memory_space<vmem>>, %arg10: memref<128x128xbf16, #tpu.memory_space<vmem>>, %arg11: memref<1x128xf32, #tpu.memory_space<vmem>>, %arg12: memref<128x128xbf16, #tpu.memory_space<vmem>>, %arg13: memref<1x128xf32, #tpu.memory_space<vmem>>, %arg14: memref<8x128xf32, #tpu.memory_space<vmem>>) attributes {dimension_semantics = [#tpu.dimension_semantics<parallel>], iteration_bounds = array<i64: 1>, scalar_prefetch = 0 : i64, scratch_operands = 0 : i64, tpu.core_type = #tpu.core_type<tc>, window_params = [{transform_indices = @transform_0, window_bounds = array<i64: 256, 48>}, {pipeline_mode = #tpu.pipeline_mode<synchronous>, transform_indices = @transform_1, window_bounds = array<i64: 48, 128>}, {pipeline_mode = #tpu.pipeline_mode<synchronous>, transform_indices = @transform_2, window_bounds = array<i64: 1, 128>}, {pipeline_mode = #tpu.pipeline_mode<synchronous>, transform_indices = @transform_3, window_bounds = array<i64: 3, 128, 128>}, {pipeline_mode = #tpu.pipeline_mode<synchronous>, transform_indices = @transform_4, window_bounds = array<i64: 1, 128>}, {pipeline_mode = #tpu.pipeline_mode<synchronous>, transform_indices = @transform_5, window_bounds = array<i64: 3, 128, 128>}, {pipeline_mode = #tpu.pipeline_mode<synchronous>, transform_indices = @transform_6, window_bounds = array<i64: 1, 128>}, {pipeline_mode = #tpu.pipeline_mode<synchronous>, transform_indices = @transform_7, window_bounds = array<i64: 3, 128, 128>}, {pipeline_mode = #tpu.pipeline_mode<synchronous>, transform_indices = @transform_8, window_bounds = array<i64: 1, 128>}, {pipeline_mode = #tpu.pipeline_mode<synchronous>, transform_indices = @transform_9, window_bounds = array<i64: 128, 128>}, {pipeline_mode = #tpu.pipeline_mode<synchronous>, transform_indices = @transform_10, window_bounds = array<i64: 1, 128>}, {pipeline_mode = #tpu.pipeline_mode<synchronous>, transform_indices = @transform_11, window_bounds = array<i64: 128, 128>}, {pipeline_mode = #tpu.pipeline_mode<synchronous>, transform_indices = @transform_12, window_bounds = array<i64: 1, 128>}, {transform_indices = @transform_13, window_bounds = array<i64: 8, 128>}]} {
    %c0 = arith.constant 0 : index
    %c0_0 = arith.constant 0 : index
    %0 = vector.load %arg1[%c0, %c0_0] : memref<256x48xbf16, #tpu.memory_space<vmem>>, vector<256x48xbf16>
    %c0_1 = arith.constant 0 : index
    %c0_2 = arith.constant 0 : index
    %1 = vector.load %arg2[%c0_1, %c0_2] : memref<48x128xbf16, #tpu.memory_space<vmem>>, vector<48x128xbf16>
    %cst = arith.constant dense<0.000000e+00> : vector<256x128xf32>
    %2 = tpu.matmul %0, %1, %cst {dimension_numbers = #tpu.dot_dimension_numbers<[1], [0], [0], [1], [0, 0, 1, 1], [], []>} : vector<256x48xbf16>, vector<48x128xbf16>, vector<256x128xf32> -> vector<256x128xf32>
    %c0_3 = arith.constant 0 : index
    %c0_4 = arith.constant 0 : index
    %3 = vector.load %arg3[%c0_3, %c0_4] : memref<1x128xf32, #tpu.memory_space<vmem>>, vector<1x128xf32>
    %4 = vector.broadcast %3 : vector<1x128xf32> to vector<256x128xf32>
    %5 = arith.addf %2, %4 : vector<256x128xf32>
    %cst_5 = arith.constant 0.000000e+00 : f32
    %6 = vector.broadcast %cst_5 : f32 to vector<256x128xf32>
    %7 = arith.cmpf ogt, %5, %6 : vector<256x128xf32>
    %8 = math.exp %5 : vector<256x128xf32>
    %cst_6 = arith.constant 1.000000e+00 : f32
    %9 = vector.broadcast %cst_6 : f32 to vector<256x128xf32>
    %10 = arith.subf %8, %9 : vector<256x128xf32>
    %11 = arith.select %7, %5, %10 : vector<256x128xi1>, vector<256x128xf32>
    %12 = arith.truncf %11 : vector<256x128xf32> to vector<256x128xbf16>
    %cst_7 = arith.constant 0.000000e+00 : bf16
    %13 = vector.broadcast %cst_7 : bf16 to vector<8x128xbf16>
    %14 = tpu.concatenate %12, %13 in 0 : vector<256x128xbf16>, vector<8x128xbf16> -> vector<264x128xbf16>
    %c0_8 = arith.constant 0 : index
    %c0_9 = arith.constant 0 : index
    %c0_10 = arith.constant 0 : index
    %15 = vector.load %arg4[%c0_8, %c0_9, %c0_10] : memref<3x128x128xbf16, #tpu.memory_space<vmem>>, vector<1x128x128xbf16>
    %16 = vector.shape_cast %15 : vector<1x128x128xbf16> to vector<128x128xbf16>
    %cst_11 = arith.constant dense<0.000000e+00> : vector<256x128xf32>
    %17 = tpu.matmul %12, %16, %cst_11 {dimension_numbers = #tpu.dot_dimension_numbers<[1], [0], [0], [1], [0, 0, 1, 1], [], []>} : vector<256x128xbf16>, vector<128x128xbf16>, vector<256x128xf32> -> vector<256x128xf32>
    %18 = vector.extract_strided_slice %14 {offsets = [1, 0], sizes = [256, 128], strides = [1, 1]} : vector<264x128xbf16> to vector<256x128xbf16>
    %c1 = arith.constant 1 : index
    %c0_12 = arith.constant 0 : index
    %c0_13 = arith.constant 0 : index
    %19 = vector.load %arg4[%c1, %c0_12, %c0_13] : memref<3x128x128xbf16, #tpu.memory_space<vmem>>, vector<1x128x128xbf16>
    %20 = vector.shape_cast %19 : vector<1x128x128xbf16> to vector<128x128xbf16>
    %cst_14 = arith.constant dense<0.000000e+00> : vector<256x128xf32>
    %21 = tpu.matmul %18, %20, %cst_14 {dimension_numbers = #tpu.dot_dimension_numbers<[1], [0], [0], [1], [0, 0, 1, 1], [], []>} : vector<256x128xbf16>, vector<128x128xbf16>, vector<256x128xf32> -> vector<256x128xf32>
    %22 = arith.addf %17, %21 : vector<256x128xf32>
    %23 = vector.extract_strided_slice %14 {offsets = [2, 0], sizes = [256, 128], strides = [1, 1]} : vector<264x128xbf16> to vector<256x128xbf16>
    %c2 = arith.constant 2 : index
    %c0_15 = arith.constant 0 : index
    %c0_16 = arith.constant 0 : index
    %24 = vector.load %arg4[%c2, %c0_15, %c0_16] : memref<3x128x128xbf16, #tpu.memory_space<vmem>>, vector<1x128x128xbf16>
    %25 = vector.shape_cast %24 : vector<1x128x128xbf16> to vector<128x128xbf16>
    %cst_17 = arith.constant dense<0.000000e+00> : vector<256x128xf32>
    %26 = tpu.matmul %23, %25, %cst_17 {dimension_numbers = #tpu.dot_dimension_numbers<[1], [0], [0], [1], [0, 0, 1, 1], [], []>} : vector<256x128xbf16>, vector<128x128xbf16>, vector<256x128xf32> -> vector<256x128xf32>
    %27 = arith.addf %22, %26 : vector<256x128xf32>
    %c0_18 = arith.constant 0 : index
    %c0_19 = arith.constant 0 : index
    %28 = vector.load %arg5[%c0_18, %c0_19] : memref<1x128xf32, #tpu.memory_space<vmem>>, vector<1x128xf32>
    %29 = vector.broadcast %28 : vector<1x128xf32> to vector<256x128xf32>
    %30 = arith.addf %27, %29 : vector<256x128xf32>
    %cst_20 = arith.constant 0.000000e+00 : f32
    %31 = vector.broadcast %cst_20 : f32 to vector<256x128xf32>
    %32 = arith.cmpf ogt, %30, %31 : vector<256x128xf32>
    %33 = math.exp %30 : vector<256x128xf32>
    %cst_21 = arith.constant 1.000000e+00 : f32
    %34 = vector.broadcast %cst_21 : f32 to vector<256x128xf32>
    %35 = arith.subf %33, %34 : vector<256x128xf32>
    %36 = arith.select %32, %30, %35 : vector<256x128xi1>, vector<256x128xf32>
    %37 = arith.truncf %36 : vector<256x128xf32> to vector<256x128xbf16>
    %cst_22 = arith.constant 0.000000e+00 : bf16
    %38 = vector.broadcast %cst_22 : bf16 to vector<8x128xbf16>
    %39 = tpu.concatenate %37, %38 in 0 : vector<256x128xbf16>, vector<8x128xbf16> -> vector<264x128xbf16>
    %c0_23 = arith.constant 0 : index
    %c0_24 = arith.constant 0 : index
    %c0_25 = arith.constant 0 : index
    %40 = vector.load %arg6[%c0_23, %c0_24, %c0_25] : memref<3x128x128xbf16, #tpu.memory_space<vmem>>, vector<1x128x128xbf16>
    %41 = vector.shape_cast %40 : vector<1x128x128xbf16> to vector<128x128xbf16>
    %cst_26 = arith.constant dense<0.000000e+00> : vector<256x128xf32>
    %42 = tpu.matmul %37, %41, %cst_26 {dimension_numbers = #tpu.dot_dimension_numbers<[1], [0], [0], [1], [0, 0, 1, 1], [], []>} : vector<256x128xbf16>, vector<128x128xbf16>, vector<256x128xf32> -> vector<256x128xf32>
    %43 = vector.extract_strided_slice %39 {offsets = [2, 0], sizes = [256, 128], strides = [1, 1]} : vector<264x128xbf16> to vector<256x128xbf16>
    %c1_27 = arith.constant 1 : index
    %c0_28 = arith.constant 0 : index
    %c0_29 = arith.constant 0 : index
    %44 = vector.load %arg6[%c1_27, %c0_28, %c0_29] : memref<3x128x128xbf16, #tpu.memory_space<vmem>>, vector<1x128x128xbf16>
    %45 = vector.shape_cast %44 : vector<1x128x128xbf16> to vector<128x128xbf16>
    %cst_30 = arith.constant dense<0.000000e+00> : vector<256x128xf32>
    %46 = tpu.matmul %43, %45, %cst_30 {dimension_numbers = #tpu.dot_dimension_numbers<[1], [0], [0], [1], [0, 0, 1, 1], [], []>} : vector<256x128xbf16>, vector<128x128xbf16>, vector<256x128xf32> -> vector<256x128xf32>
    %47 = arith.addf %42, %46 : vector<256x128xf32>
    %48 = vector.extract_strided_slice %39 {offsets = [4, 0], sizes = [256, 128], strides = [1, 1]} : vector<264x128xbf16> to vector<256x128xbf16>
    %c2_31 = arith.constant 2 : index
    %c0_32 = arith.constant 0 : index
    %c0_33 = arith.constant 0 : index
    %49 = vector.load %arg6[%c2_31, %c0_32, %c0_33] : memref<3x128x128xbf16, #tpu.memory_space<vmem>>, vector<1x128x128xbf16>
    %50 = vector.shape_cast %49 : vector<1x128x128xbf16> to vector<128x128xbf16>
    %cst_34 = arith.constant dense<0.000000e+00> : vector<256x128xf32>
    %51 = tpu.matmul %48, %50, %cst_34 {dimension_numbers = #tpu.dot_dimension_numbers<[1], [0], [0], [1], [0, 0, 1, 1], [], []>} : vector<256x128xbf16>, vector<128x128xbf16>, vector<256x128xf32> -> vector<256x128xf32>
    %52 = arith.addf %47, %51 : vector<256x128xf32>
    %c0_35 = arith.constant 0 : index
    %c0_36 = arith.constant 0 : index
    %53 = vector.load %arg7[%c0_35, %c0_36] : memref<1x128xf32, #tpu.memory_space<vmem>>, vector<1x128xf32>
    %54 = vector.broadcast %53 : vector<1x128xf32> to vector<256x128xf32>
    %55 = arith.addf %52, %54 : vector<256x128xf32>
    %cst_37 = arith.constant 0.000000e+00 : f32
    %56 = vector.broadcast %cst_37 : f32 to vector<256x128xf32>
    %57 = arith.cmpf ogt, %55, %56 : vector<256x128xf32>
    %58 = math.exp %55 : vector<256x128xf32>
    %cst_38 = arith.constant 1.000000e+00 : f32
    %59 = vector.broadcast %cst_38 : f32 to vector<256x128xf32>
    %60 = arith.subf %58, %59 : vector<256x128xf32>
    %61 = arith.select %57, %55, %60 : vector<256x128xi1>, vector<256x128xf32>
    %62 = arith.truncf %61 : vector<256x128xf32> to vector<256x128xbf16>
    %cst_39 = arith.constant 0.000000e+00 : bf16
    %63 = vector.broadcast %cst_39 : bf16 to vector<8x128xbf16>
    %64 = tpu.concatenate %62, %63 in 0 : vector<256x128xbf16>, vector<8x128xbf16> -> vector<264x128xbf16>
    %c0_40 = arith.constant 0 : index
    %c0_41 = arith.constant 0 : index
    %c0_42 = arith.constant 0 : index
    %65 = vector.load %arg8[%c0_40, %c0_41, %c0_42] : memref<3x128x128xbf16, #tpu.memory_space<vmem>>, vector<1x128x128xbf16>
    %66 = vector.shape_cast %65 : vector<1x128x128xbf16> to vector<128x128xbf16>
    %cst_43 = arith.constant dense<0.000000e+00> : vector<256x128xf32>
    %67 = tpu.matmul %62, %66, %cst_43 {dimension_numbers = #tpu.dot_dimension_numbers<[1], [0], [0], [1], [0, 0, 1, 1], [], []>} : vector<256x128xbf16>, vector<128x128xbf16>, vector<256x128xf32> -> vector<256x128xf32>
    %68 = vector.extract_strided_slice %64 {offsets = [4, 0], sizes = [256, 128], strides = [1, 1]} : vector<264x128xbf16> to vector<256x128xbf16>
    %c1_44 = arith.constant 1 : index
    %c0_45 = arith.constant 0 : index
    %c0_46 = arith.constant 0 : index
    %69 = vector.load %arg8[%c1_44, %c0_45, %c0_46] : memref<3x128x128xbf16, #tpu.memory_space<vmem>>, vector<1x128x128xbf16>
    %70 = vector.shape_cast %69 : vector<1x128x128xbf16> to vector<128x128xbf16>
    %cst_47 = arith.constant dense<0.000000e+00> : vector<256x128xf32>
    %71 = tpu.matmul %68, %70, %cst_47 {dimension_numbers = #tpu.dot_dimension_numbers<[1], [0], [0], [1], [0, 0, 1, 1], [], []>} : vector<256x128xbf16>, vector<128x128xbf16>, vector<256x128xf32> -> vector<256x128xf32>
    %72 = arith.addf %67, %71 : vector<256x128xf32>
    %73 = vector.extract_strided_slice %64 {offsets = [8, 0], sizes = [256, 128], strides = [1, 1]} : vector<264x128xbf16> to vector<256x128xbf16>
    %c2_48 = arith.constant 2 : index
    %c0_49 = arith.constant 0 : index
    %c0_50 = arith.constant 0 : index
    %74 = vector.load %arg8[%c2_48, %c0_49, %c0_50] : memref<3x128x128xbf16, #tpu.memory_space<vmem>>, vector<1x128x128xbf16>
    %75 = vector.shape_cast %74 : vector<1x128x128xbf16> to vector<128x128xbf16>
    %cst_51 = arith.constant dense<0.000000e+00> : vector<256x128xf32>
    %76 = tpu.matmul %73, %75, %cst_51 {dimension_numbers = #tpu.dot_dimension_numbers<[1], [0], [0], [1], [0, 0, 1, 1], [], []>} : vector<256x128xbf16>, vector<128x128xbf16>, vector<256x128xf32> -> vector<256x128xf32>
    %77 = arith.addf %72, %76 : vector<256x128xf32>
    %c0_52 = arith.constant 0 : index
    %c0_53 = arith.constant 0 : index
    %78 = vector.load %arg9[%c0_52, %c0_53] : memref<1x128xf32, #tpu.memory_space<vmem>>, vector<1x128xf32>
    %79 = vector.broadcast %78 : vector<1x128xf32> to vector<256x128xf32>
    %80 = arith.addf %77, %79 : vector<256x128xf32>
    %cst_54 = arith.constant 0.000000e+00 : f32
    %81 = vector.broadcast %cst_54 : f32 to vector<256x128xf32>
    %82 = arith.cmpf ogt, %80, %81 : vector<256x128xf32>
    %83 = math.exp %80 : vector<256x128xf32>
    %cst_55 = arith.constant 1.000000e+00 : f32
    %84 = vector.broadcast %cst_55 : f32 to vector<256x128xf32>
    %85 = arith.subf %83, %84 : vector<256x128xf32>
    %86 = arith.select %82, %80, %85 : vector<256x128xi1>, vector<256x128xf32>
    %87 = vector.shape_cast %86 : vector<256x128xf32> to vector<8x32x128xf32>
    %88 = tpu.iota {dimensions = array<i32: 1>} : vector<8x32x128xi32>
    %c4_i32 = arith.constant 4 : i32
    %c0_i32 = arith.constant 0 : i32
    %89 = arith.cmpi eq, %c4_i32, %c0_i32 : i32
    %c1_i32 = arith.constant 1 : i32
    %90 = arith.select %89, %c1_i32, %c4_i32 : i32
    %91 = vector.broadcast %90 : i32 to vector<8x32x128xi32>
    %92 = arith.remsi %88, %91 : vector<8x32x128xi32>
    %c0_i32_56 = arith.constant 0 : i32
    %93 = vector.broadcast %c0_i32_56 : i32 to vector<8x32x128xi32>
    %94 = arith.cmpi ne, %92, %93 : vector<8x32x128xi32>
    %c0_i32_57 = arith.constant 0 : i32
    %95 = vector.broadcast %c0_i32_57 : i32 to vector<8x32x128xi32>
    %96 = arith.cmpi slt, %92, %95 : vector<8x32x128xi32>
    %c0_i32_58 = arith.constant 0 : i32
    %97 = arith.cmpi slt, %90, %c0_i32_58 : i32
    %98 = vector.broadcast %97 : i1 to vector<8x32x128xi1>
    %99 = vector.broadcast %98 : vector<8x32x128xi1> to vector<8x32x128xi1>
    %100 = arith.xori %96, %99 : vector<8x32x128xi1>
    %101 = arith.andi %100, %94 : vector<8x32x128xi1>
    %102 = vector.broadcast %90 : i32 to vector<8x32x128xi32>
    %103 = arith.addi %92, %102 : vector<8x32x128xi32>
    %104 = arith.select %101, %103, %92 : vector<8x32x128xi1>, vector<8x32x128xi32>
    %c0_i32_59 = arith.constant 0 : i32
    %105 = vector.broadcast %c0_i32_59 : i32 to vector<8x32x128xi32>
    %106 = arith.cmpi eq, %104, %105 : vector<8x32x128xi32>
    %c16_i32 = arith.constant 16 : i32
    %107 = vector.broadcast %c16_i32 : i32 to vector<8x32x128xi32>
    %108 = arith.cmpi slt, %88, %107 : vector<8x32x128xi32>
    %109 = arith.andi %106, %108 : vector<8x32x128xi1>
    %cst_60 = arith.constant 0.000000e+00 : f32
    %110 = vector.broadcast %cst_60 : f32 to vector<8x32x128xf32>
    %111 = arith.select %109, %87, %110 : vector<8x32x128xi1>, vector<8x32x128xf32>
    %cst_61 = arith.constant dense<0.000000e+00> : vector<8x128xf32>
    %112 = vector.multi_reduction <add>, %111, %cst_61 [1] : vector<8x32x128xf32> to vector<8x128xf32>
    %113 = arith.truncf %112 : vector<8x128xf32> to vector<8x128xbf16>
    %c0_62 = arith.constant 0 : index
    %c0_63 = arith.constant 0 : index
    %114 = vector.load %arg10[%c0_62, %c0_63] : memref<128x128xbf16, #tpu.memory_space<vmem>>, vector<128x128xbf16>
    %cst_64 = arith.constant dense<0.000000e+00> : vector<8x128xf32>
    %115 = tpu.matmul %113, %114, %cst_64 {dimension_numbers = #tpu.dot_dimension_numbers<[1], [0], [0], [1], [0, 0, 1, 1], [], []>} : vector<8x128xbf16>, vector<128x128xbf16>, vector<8x128xf32> -> vector<8x128xf32>
    %c0_65 = arith.constant 0 : index
    %c0_66 = arith.constant 0 : index
    %116 = vector.load %arg11[%c0_65, %c0_66] : memref<1x128xf32, #tpu.memory_space<vmem>>, vector<1x128xf32>
    %117 = vector.broadcast %116 : vector<1x128xf32> to vector<8x128xf32>
    %118 = arith.addf %115, %117 : vector<8x128xf32>
    %cst_67 = arith.constant 0.000000e+00 : f32
    %119 = vector.broadcast %cst_67 : f32 to vector<8x128xf32>
    %120 = arith.maximumf %118, %119 : vector<8x128xf32>
    %121 = arith.truncf %120 : vector<8x128xf32> to vector<8x128xbf16>
    %c0_68 = arith.constant 0 : index
    %c0_69 = arith.constant 0 : index
    %122 = vector.load %arg12[%c0_68, %c0_69] : memref<128x128xbf16, #tpu.memory_space<vmem>>, vector<128x128xbf16>
    %cst_70 = arith.constant dense<0.000000e+00> : vector<8x128xf32>
    %123 = tpu.matmul %121, %122, %cst_70 {dimension_numbers = #tpu.dot_dimension_numbers<[1], [0], [0], [1], [0, 0, 1, 1], [], []>} : vector<8x128xbf16>, vector<128x128xbf16>, vector<8x128xf32> -> vector<8x128xf32>
    %c0_71 = arith.constant 0 : index
    %c0_72 = arith.constant 0 : index
    %124 = vector.load %arg13[%c0_71, %c0_72] : memref<1x128xf32, #tpu.memory_space<vmem>>, vector<1x128xf32>
    %125 = vector.broadcast %124 : vector<1x128xf32> to vector<8x128xf32>
    %126 = arith.addf %123, %125 : vector<8x128xf32>
    %c0_73 = arith.constant 0 : index
    %c0_74 = arith.constant 0 : index
    %127 = vector.load %arg14[%c0_73, %c0_74] : memref<8x128xf32, #tpu.memory_space<vmem>>, vector<8x128xf32>
    tpu.vector_store %arg14[%c0_73, %c0_74], %126 {strides = array<i32>} : memref<8x128xf32, #tpu.memory_space<vmem>>, vector<8x128xf32>,
    return
  }
  func.func @transform_0(%arg0: i32) -> (i32, i32) {
    %c0_i32 = arith.constant 0 : i32
    %c0_i32_0 = arith.constant 0 : i32
    return %arg0, %c0_i32 : i32, i32
  }
  func.func @transform_1(%arg0: i32) -> (i32, i32) {
    %c0_i32 = arith.constant 0 : i32
    %c0_i32_0 = arith.constant 0 : i32
    %c0_i32_1 = arith.constant 0 : i32
    return %c0_i32, %c0_i32_0 : i32, i32
  }
  func.func @transform_2(%arg0: i32) -> (i32, i32) {
    %c0_i32 = arith.constant 0 : i32
    %c0_i32_0 = arith.constant 0 : i32
    %c0_i32_1 = arith.constant 0 : i32
    return %c0_i32, %c0_i32_0 : i32, i32
  }
  func.func @transform_3(%arg0: i32) -> (i32, i32, i32) {
    %c0_i32 = arith.constant 0 : i32
    %c0_i32_0 = arith.constant 0 : i32
    %c0_i32_1 = arith.constant 0 : i32
    %c0_i32_2 = arith.constant 0 : i32
    return %c0_i32, %c0_i32_0, %c0_i32_1 : i32, i32, i32
  }
  func.func @transform_4(%arg0: i32) -> (i32, i32) {
    %c0_i32 = arith.constant 0 : i32
    %c0_i32_0 = arith.constant 0 : i32
    %c0_i32_1 = arith.constant 0 : i32
    return %c0_i32, %c0_i32_0 : i32, i32
  }
  func.func @transform_5(%arg0: i32) -> (i32, i32, i32) {
    %c0_i32 = arith.constant 0 : i32
    %c0_i32_0 = arith.constant 0 : i32
    %c0_i32_1 = arith.constant 0 : i32
    %c0_i32_2 = arith.constant 0 : i32
    return %c0_i32, %c0_i32_0, %c0_i32_1 : i32, i32, i32
  }
  func.func @transform_6(%arg0: i32) -> (i32, i32) {
    %c0_i32 = arith.constant 0 : i32
    %c0_i32_0 = arith.constant 0 : i32
    %c0_i32_1 = arith.constant 0 : i32
    return %c0_i32, %c0_i32_0 : i32, i32
  }
  func.func @transform_7(%arg0: i32) -> (i32, i32, i32) {
    %c0_i32 = arith.constant 0 : i32
    %c0_i32_0 = arith.constant 0 : i32
    %c0_i32_1 = arith.constant 0 : i32
    %c0_i32_2 = arith.constant 0 : i32
    return %c0_i32, %c0_i32_0, %c0_i32_1 : i32, i32, i32
  }
  func.func @transform_8(%arg0: i32) -> (i32, i32) {
    %c0_i32 = arith.constant 0 : i32
    %c0_i32_0 = arith.constant 0 : i32
    %c0_i32_1 = arith.constant 0 : i32
    return %c0_i32, %c0_i32_0 : i32, i32
  }
  func.func @transform_9(%arg0: i32) -> (i32, i32) {
    %c0_i32 = arith.constant 0 : i32
    %c0_i32_0 = arith.constant 0 : i32
    %c0_i32_1 = arith.constant 0 : i32
    return %c0_i32, %c0_i32_0 : i32, i32
  }
  func.func @transform_10(%arg0: i32) -> (i32, i32) {
    %c0_i32 = arith.constant 0 : i32
    %c0_i32_0 = arith.constant 0 : i32
    %c0_i32_1 = arith.constant 0 : i32
    return %c0_i32, %c0_i32_0 : i32, i32
  }
  func.func @transform_11(%arg0: i32) -> (i32, i32) {
    %c0_i32 = arith.constant 0 : i32
    %c0_i32_0 = arith.constant 0 : i32
    %c0_i32_1 = arith.constant 0 : i32
    return %c0_i32, %c0_i32_0 : i32, i32
  }
  func.func @transform_12(%arg0: i32) -> (i32, i32) {
    %c0_i32 = arith.constant 0 : i32
    %c0_i32_0 = arith.constant 0 : i32
    %c0_i32_1 = arith.constant 0 : i32
    return %c0_i32, %c0_i32_0 : i32, i32
  }
  func.func @transform_13(%arg0: i32) -> (i32, i32) {
    %c0_i32 = arith.constant 0 : i32
    %c0_i32_0 = arith.constant 0 : i32
    return %arg0, %c0_i32 : i32, i32
  }
}

</mosaic_0001>

<bundles_post_ra>
// kernel: news_classifier_forward.1
= control target key start
LH: loop header
LB: loop body
LE: loop exit
PB: predicated region body
PF: predicated region fallthrough
CT: control target
= control target key end

     0   :  { %vm188_vm0 = vcmask 392192   ;;  %vm607_vm7 = vsmask.f32 7424  ;;  %s7443_s1 = inlined_call_operand.vmem [shape: bf16[48,128], index: 1, kind: input, shape index: {}]   ;;  %s7444_s0 = inlined_call_operand.vmem [shape: bf16[256,48], index: 0, kind: input, shape index: {}]   ;;  %s7445_s3 = inlined_call_operand.vmem [shape: bf16[3,128,128], index: 3, kind: input, shape index: {}]   ;;  %s7446_s2 = inlined_call_operand.vmem [shape: f32[1,128], index: 2, kind: input, shape index: {}]   ;;  %s7447_s5 = inlined_call_operand.vmem [shape: bf16[3,128,128], index: 5, kind: input, shape index: {}]   ;;  %s7448_s4 = inlined_call_operand.vmem [shape: f32[1,128], index: 4, kind: input, shape index: {}]   ;;  %s7449_s7 = inlined_call_operand.vmem [shape: bf16[3,128,128], index: 7, kind: input, shape index: {}]   ;;  %s7450_s6 = inlined_call_operand.vmem [shape: f32[1,128], index: 6, kind: input, shape index: {}]   ;;  %s7451_s9 = inlined_call_operand.vmem [shape: bf16[128,128], index: 9, kind: input, shape index: {}]   ;;  %s7452_s11 = inlined_call_operand.vmem [shape: bf16[128,128], index: 11, kind: input, shape index: {}]   ;;  %s7453_s8 = inlined_call_operand.vmem [shape: f32[1,128], index: 8, kind: input, shape index: {}]   ;;  %s7454_s10 = inlined_call_operand.vmem [shape: f32[1,128], index: 10, kind: input, shape index: {}]   ;;  %s7455_s12 = inlined_call_operand.vmem [shape: f32[1,128], index: 12, kind: input, shape index: {}]   ;;  %s7456_s13 = inlined_call_operand.vmem [shape: f32[8,128], index: 13, kind: output, shape index: {}]  }
   0x1   :  { %v5459_v0 = vld [vmem:[%s7443_s1] sm:$0xff]   ;;  %v5460_v1 = vld [vmem:[%s7443_s1 + $0x8] sm:$0xff]   ;;  %v5461_v3 = vld [vmem:[%s7443_s1 + $0x10] sm:$0xff]  }
   0x2   :  { %4818 = vmatprep.subr.bf16.mxu0 %v5459_v0  ;;  %v5462_v2 = vld [vmem:[%s7444_s0] sm:$0xff]   ;;  %v5463_v4 = vld [vmem:[%s7444_s0 + $0x8] sm:$0xff]   ;;  %v5464_v5 = vld [vmem:[%s7444_s0 + $0x10] sm:$0xff]  }
   0x3   :  { %4819 = vmatpush3.bf16.msra.mxu0 %v5459_v0  ;;  %4824 = vmatprep.mubr.msk.bf16.mxu0 %vm188_vm0, %v5462_v2  ;;  %v5465_v6 = vld [vmem:[%s7444_s0 + $0x18] sm:$0xff]   ;;  %v5466_v7 = vld [vmem:[%s7444_s0 + $0x20] sm:$0xff]   ;;  %v5467_v8 = vld [vmem:[%s7444_s0 + $0x28] sm:$0xff]  }
   0x4   :  { %4820 = vmatprep.subr.bf16.mxu0 %v5460_v1  ;;  %v5468_v9 = vld [vmem:[%s7444_s0 + $0x30] sm:$0xff]   ;;  %v5469_v10 = vld [vmem:[%s7444_s0 + $0x38] sm:$0xff]   ;;  %v5470_v11 = vld [vmem:[%s7444_s0 + $0x40] sm:$0xff]  }
   0x5   :  { %v5471_v12 = vld [vmem:[%s7444_s0 + $0x48] sm:$0xff]   ;;  %v5472_v13 = vld [vmem:[%s7444_s0 + $0x50] sm:$0xff]   ;;  %v5473_v14 = vld [vmem:[%s7444_s0 + $0x58] sm:$0xff]  }
   0x6   :  { %v5474_v15 = vld [vmem:[%s7444_s0 + $0x60] sm:$0xff]   ;;  %v5475_v16 = vld [vmem:[%s7444_s0 + $0x68] sm:$0xff]   ;;  %v5476_v17 = vld [vmem:[%s7444_s0 + $0x70] sm:$0xff]  }
   0x7   :  { %4821 = vmatpush3.bf16.msra.mxu0 %v5460_v1  ;;  %v5477_v18 = vld [vmem:[%s7444_s0 + $0x78] sm:$0xff]   ;;  %v5478_v19 = vld [vmem:[%s7445_s3 + $0x40] sm:$0xff]   ;;  %v5479_v20 = vld [vmem:[%s7445_s3 + $0x48] sm:$0xff]  }
   0x8   :  { %4822 = vmatprep.subr.bf16.mxu0 %v5461_v3  ;;  %4856 = vmatprep.subr.bf16.mxu1 %v5478_v19  ;;  %v5480_v21 = vld [vmem:[%s7445_s3 + $0x50] sm:$0xff]   ;;  %v5481_v22 = vld [vmem:[%s7445_s3 + $0x58] sm:$0xff]   ;;  %v5482_v23 = vld [vmem:[%s7445_s3 + $0x60] sm:$0xff]  }
   0x9   :  { %4857 = vmatpush3.bf16.msra.mxu1 %v5478_v19  ;;  %v5483_v24 = vld [vmem:[%s7445_s3 + $0x68] sm:$0xff]   ;;  %v5484_v25 = vld [vmem:[%s7445_s3 + $0x70] sm:$0xff]   ;;  %v5485_v26 = vld [vmem:[%s7445_s3 + $0x78] sm:$0xff]  }
   0xa   :  { %4858 = vmatprep.subr.bf16.mxu1 %v5479_v20  ;;  %v5963_v27 = vld [vmem:[%s7445_s3] sm:$0xff]  }
   0xb   :  { %4823 = vmatpush3.bf16.msra.mxu0 %v5461_v3  ;;  %v5969_v28 = vld [vmem:[%s7446_s2] ss:$0 sm:$0xff] }
   0xd   :  { %4859 = vmatpush3.bf16.msra.mxu1 %v5479_v20 }
   0xe   :  { %4825 = vmatmul.mubr.msk.bf16.vlgmr.msra.gmra.mrb[0].mxu0 %vm188_vm0, %v5463_v4  ;;  %4860 = vmatprep.subr.bf16.mxu1 %v5480_v21 }
   0xf   :  { %4828 = vmatprep.mubr.msk.bf16.mxu0 %vm188_vm0, %v5464_v5 }
  0x11   :  { %4861 = vmatpush3.bf16.msra.mxu1 %v5480_v21 }
  0x12   :  { %4862 = vmatprep.subr.bf16.mxu1 %v5481_v22 }
  0x15   :  { %4863 = vmatpush3.bf16.msra.mxu1 %v5481_v22 }
  0x16   :  { %4829 = vmatmul.mubr.msk.bf16.gmra.mrb[4].mxu0 %vm188_vm0, %v5465_v6  ;;  %4864 = vmatprep.subr.bf16.mxu1 %v5482_v23 }
  0x17   :  { %4832 = vmatprep.mubr.msk.bf16.mxu0 %vm188_vm0, %v5466_v7 }
  0x19   :  { %4865 = vmatpush3.bf16.msra.mxu1 %v5482_v23 }
  0x1a   :  { %4866 = vmatprep.subr.bf16.mxu1 %v5483_v24 }
  0x1d   :  { %4867 = vmatpush3.bf16.msra.mxu1 %v5483_v24 }
  0x1e   :  { %4833 = vmatmul.mubr.msk.bf16.gmra.mrb[8].mxu0 %vm188_vm0, %v5467_v8  ;;  %4868 = vmatprep.subr.bf16.mxu1 %v5484_v25 }
  0x1f   :  { %4836 = vmatprep.mubr.msk.bf16.mxu0 %vm188_vm0, %v5468_v9 }
  0x21   :  { %4869 = vmatpush3.bf16.msra.mxu1 %v5484_v25 }
  0x22   :  { %4870 = vmatprep.subr.bf16.mxu1 %v5485_v26 }
  0x25   :  { %4871 = vmatpush3.bf16.msra.mxu1 %v5485_v26 }
  0x26   :  { %4837 = vmatmul.mubr.msk.bf16.gmra.mrb[12].mxu0 %vm188_vm0, %v5469_v10  ;;  %4904 = vmatprep.subr.bf16.mxu1 %v5963_v27 }
  0x27   :  { %4840 = vmatprep.mubr.msk.bf16.mxu0 %vm188_vm0, %v5470_v11 }
  0x2e   :  { %4841 = vmatmul.mubr.msk.bf16.gmra.mrb[16].mxu0 %vm188_vm0, %v5471_v12 }
  0x2f   :  { %4844 = vmatprep.mubr.msk.bf16.mxu0 %vm188_vm0, %v5472_v13 }
  0x36   :  { %4845 = vmatmul.mubr.msk.bf16.gmra.mrb[20].mxu0 %vm188_vm0, %v5473_v14 }
  0x37   :  { %4848 = vmatprep.mubr.msk.bf16.mxu0 %vm188_vm0, %v5474_v15 }
  0x3e   :  { %4849 = vmatmul.mubr.msk.bf16.gmra.mrb[24].mxu0 %vm188_vm0, %v5475_v16 }
  0x3f   :  { %4852 = vmatprep.mubr.msk.bf16.mxu0 %vm188_vm0, %v5476_v17 }
  0x46   :  { %4853 = vmatmul.mubr.msk.bf16.gmra.mrb[28].mxu0 %vm188_vm0, %v5477_v18 }
  0xe1   :  { %v4826_v29 = vpop.f32.mrb[0].mxu0 }
  0xe2   :  { %v280_v30 = vadd.f32 %v4826_v29, %v5969_v28  ;;  %v271_v31 = vpop.f32.mrb[1].mxu0 }
  0xe3   :  { %v272_v32 = vadd.f32 %v5969_v28, %v271_v31  ;;  %v4827_v33 = vpop.f32.mrb[2].mxu0 }
  0xe4   :  { %v434_v34 = vmul.f32 1.442695, %v280_v30  ;;  %v283_v35 = vadd.f32 %v4827_v33, %v5969_v28  ;;  %v274_v36 = vpop.f32.mrb[3].mxu0  ;;  %vm400_vm1 = vcmp.gt.f32.partialorder %v280_v30, 0.0 }
  0xe5   :  { %v430_v37 = vmul.f32 1.442695, %v272_v32  ;;  %v275_v38 = vadd.f32 %v5969_v28, %v274_v36  ;;  %vm398_vm2 = vcmp.gt.f32.partialorder %v272_v32, 0.0 }
  0xe6   :  { %5566 = vpow2.f32 %v434_v34  ;;  %v436_v39 = vmul.f32 1.442695, %v283_v35  ;;  %vm401_vm3 = vcmp.gt.f32.partialorder %v283_v35, 0.0 }
  0xe7   :  { %5568 = vpow2.f32 %v430_v37  ;;  %v432_v40 = vmul.f32 1.442695, %v275_v38  ;;  %vm399_vm4 = vcmp.gt.f32.partialorder %v275_v38, 0.0 }
  0xe8   :  { %5570 = vpow2.f32 %v436_v39 }
  0xe9   :  { %5572 = vpow2.f32 %v432_v40  ;;  %v4830_v41 = vpop.f32.mrb[4].mxu0 }
  0xea   :  { %v5976_v42 = vadd.f32 %v4830_v41, %v5969_v28  ;;  %v287_v43 = vpop.f32.mrb[5].mxu0 }
  0xeb   :  { %v5979_v44 = vadd.f32 %v5969_v28, %v287_v43  ;;  %v4831_v45 = vpop.f32.mrb[6].mxu0 }
  0xec   :  { %v442_v46 = vmul.f32 1.442695, %v5976_v42  ;;  %v5983_v47 = vadd.f32 %v4831_v45, %v5969_v28  ;;  %v290_v48 = vpop.f32.mrb[7].mxu0  ;;  %vm404_vm5 = vcmp.gt.f32.partialorder %v5976_v42, 0.0 }
  0xed   :  { %v438_v49 = vmul.f32 1.442695, %v5979_v44  ;;  %v5987_v50 = vadd.f32 %v5969_v28, %v290_v48  ;;  %vm402_vm6 = vcmp.gt.f32.partialorder %v5979_v44, 0.0 }
  0xee   :  { %5574 = vpow2.f32 %v442_v46  ;;  %v444_v51 = vmul.f32 1.442695, %v5983_v47  ;;  %vm405_vm8 = vcmp.gt.f32.partialorder %v5983_v47, 0.0 }
  0xef   :  { %5576 = vpow2.f32 %v438_v49  ;;  %v440_v52 = vmul.f32 1.442695, %v5987_v50  ;;  %vm403_vm9 = vcmp.gt.f32.partialorder %v5987_v50, 0.0 }
  0xf0   :  { %v5567_v53 = vpop.eup %5566  ;;  %5578 = vpow2.f32 %v444_v51 }
  0xf1   :  { %v5569_v54 = vpop.eup %5568  ;;  %v4250_v55 = vadd.f32 -1.0, %v5567_v53  ;;  %5580 = vpow2.f32 %v440_v52  ;;  %v4834_v56 = vpop.f32.mrb[8].mxu0 }
  0xf2   :  { %v5571_v57 = vpop.eup %5570  ;;  %v4248_v58 = vadd.f32 -1.0, %v5569_v54  ;;  %v5992_v59 = vadd.f32 %v4834_v56, %v5969_v28  ;;  %v303_v60 = vpop.f32.mrb[9].mxu0 }
  0xf3   :  { %v5573_v61 = vpop.eup %5572  ;;  %v4251_v62 = vadd.f32 -1.0, %v5571_v57  ;;  %v5995_v63 = vadd.f32 %v5969_v28, %v303_v60  ;;  %v4835_v0 = vpop.f32.mrb[10].mxu0  ;;  %v528_v1 = vsel %vm400_vm1, %v280_v30, %v4250_v55 }
  0xf4   :  { %v4249_v2 = vadd.f32 -1.0, %v5573_v61  ;;  %v450_v3 = vmul.f32 1.442695, %v5992_v59  ;;  %v306_v4 = vpop.f32.mrb[11].mxu0  ;;  %v526_v5 = vsel %vm398_vm2, %v272_v32, %v4248_v58  ;;  %v6000_v8 = vadd.f32 %v4835_v0, %v5969_v28 }
  0xf5   :  { %v529_v6 = vsel %vm401_vm3, %v283_v35, %v4251_v62  ;;  %v446_v7 = vmul.f32 1.442695, %v5995_v63  ;;  %v6005_v11 = vadd.f32 %v5969_v28, %v306_v4  ;;  %vm408_vm10 = vcmp.gt.f32.partialorder %v5992_v59, 0.0 }
  0xf6   :  { %v6002_v9 = vpack.c.bf16 %v529_v6, %v528_v1  ;;  %v527_v10 = vsel %vm399_vm4, %v275_v38, %v4249_v2  ;;  %5582 = vpow2.f32 %v450_v3  ;;  %v452_v13 = vmul.f32 1.442695, %v6000_v8 }
  0xf7   :  { %v6007_v12 = vpack.c.bf16 %v527_v10, %v526_v5  ;;  %5584 = vpow2.f32 %v446_v7  ;;  %v448_v15 = vmul.f32 1.442695, %v6005_v11  ;;  %vm406_vm11 = vcmp.gt.f32.partialorder %v5995_v63, 0.0 }
  0xf8   :  { %v5575_v14 = vpop.eup %5574  ;;  %5586 = vpow2.f32 %v452_v13  ;;  %v616_v31 = vshll.u32 %v6002_v9, 16  ;;  %vm409_vm12 = vcmp.gt.f32.partialorder %v6000_v8, 0.0  ;;  %v620_v53 = vshrl.u32 %v6002_v9, 16 }
  0xf9   :  { %v5577_v16 = vpop.eup %5576  ;;  %v4254_v17 = vadd.f32 -1.0, %v5575_v14  ;;  %v4838_v18 = vpop.f32.mrb[12].mxu0  ;;  %v611_v19 = vshll.u32 %v6007_v12, 16  ;;  %5588 = vpow2.f32 %v448_v15  ;;  %v609_v30 = vshrl.u32 %v6007_v12, 16 }
  0xfa   :  { %v5579_v20 = vpop.eup %5578  ;;  %v4252_v21 = vadd.f32 -1.0, %v5577_v16  ;;  %v6017_v22 = vadd.f32 %v4838_v18, %v5969_v28  ;;  %v319_v23 = vpop.f32.mrb[13].mxu0  ;;  %v618_v46 = vrot.slane %v616_v31, 1  ;;  %vm407_vm13 = vcmp.gt.f32.partialorder %v6005_v11, 0.0  ;;  %v5487_v16 = vld [vmem:[%s7445_s3 + $0x8] sm:$0xff]  }
  0xfb   :  { %v5581_v24 = vpop.eup %5580  ;;  %v4255_v25 = vadd.f32 -1.0, %v5579_v20  ;;  %v6021_v26 = vadd.f32 %v5969_v28, %v319_v23  ;;  %v4839_v29 = vpop.f32.mrb[14].mxu0  ;;  %v532_v32 = vsel %vm404_vm5, %v5976_v42, %v4254_v17  ;;  %v613_v36 = vrot.slane %v611_v19, 1 }
  0xfc   :  { %v4253_v33 = vadd.f32 -1.0, %v5581_v24  ;;  %v458_v34 = vmul.f32 1.442695, %v6017_v22  ;;  %v322_v35 = vpop.f32.mrb[15].mxu0  ;;  %v530_v37 = vsel %vm402_vm6, %v5979_v44, %v4252_v21  ;;  %v6037_v40 = vadd.f32 %v4839_v29, %v5969_v28 }
  0xfd   :  { %v533_v38 = vsel %vm405_vm8, %v5983_v47, %v4255_v25  ;;  %v454_v39 = vmul.f32 1.442695, %v6021_v26  ;;  %v6045_v43 = vadd.f32 %v5969_v28, %v322_v35  ;;  %v614_v49 = vor.u32 %v613_v36, %v609_v30 }
  0xfe   :  { %v6039_v41 = vpack.c.bf16 %v533_v38, %v532_v32  ;;  %v531_v42 = vsel %vm403_vm9, %v5987_v50, %v4253_v33  ;;  %5590 = vpow2.f32 %v458_v34  ;;  %v460_v45 = vmul.f32 1.442695, %v6037_v40 }
  0xff   :  { %v6047_v44 = vpack.c.bf16 %v531_v42, %v530_v37  ;;  %5592 = vpow2.f32 %v454_v39  ;;  %v456_v48 = vmul.f32 1.442695, %v6045_v43  ;;  %v619_v55 = vsel %vm607_vm7, %v614_v49, %v618_v46 }
 0x100   :  { %v5583_v47 = vpop.eup %5582  ;;  %5594 = vpow2.f32 %v460_v45  ;;  %4872 = vmatprep.mubr.bf16.mxu1 %v619_v55  ;;  %v622_v0 = vor.u32 %v620_v53, %v618_v46  ;;  %v632_v15 = vshll.u32 %v6039_v41, 16  ;;  %vm412_vm14 = vcmp.gt.f32.partialorder %v6017_v22, 0.0 }
 0x101   :  { %v5585_v51 = vpop.eup %5584  ;;  %v4258_v50 = vadd.f32 -1.0, %v5583_v47  ;;  %v4842_v52 = vpop.f32.mrb[16].mxu0  ;;  %v624_v54 = vshll.u32 %v6047_v44, 16  ;;  %5596 = vpow2.f32 %v456_v48  ;;  %v628_v7 = vshrl.u32 %v6047_v44, 16 }
 0x102   :  { %v6058_v56 = vadd.f32 %v4842_v52, %v5969_v28  ;;  %v335_v57 = vpop.f32.mrb[17].mxu0  ;;  %v5587_v58 = vpop.eup %5586  ;;  %v4256_v60 = vadd.f32 -1.0, %v5585_v51  ;;  %vm410_vm15 = vcmp.gt.f32.partialorder %v6021_v26, 0.0  ;;  %v634_v30 = vrot.slane %v632_v15, 1  ;;  %v5489_v52 = vld [vmem:[%s7445_s3 + $0x18] sm:$0xff]  }
 0x103   :  { %v6061_v61 = vadd.f32 %v5969_v28, %v335_v57  ;;  %v4843_v62 = vpop.f32.mrb[18].mxu0  ;;  %v626_v1 = vrot.slane %v624_v54, 1  ;;  %v5589_v2 = vpop.eup %5588  ;;  %v536_v3 = vsel %vm408_vm10, %v5992_v59, %v4258_v50  ;;  %v4259_v4 = vadd.f32 -1.0, %v5587_v58 }
 0x104   :  { %v466_v5 = vmul.f32 1.442695, %v6058_v56  ;;  %v338_v6 = vpop.f32.mrb[19].mxu0  ;;  %v4257_v10 = vadd.f32 -1.0, %v5589_v2  ;;  %v6070_v14 = vadd.f32 %v4843_v62, %v5969_v28  ;;  %v534_v19 = vsel %vm406_vm11, %v5995_v63, %v4256_v60 }
 0x105   :  { %v462_v13 = vmul.f32 1.442695, %v6061_v61  ;;  %v537_v59 = vsel %vm409_vm12, %v6000_v8, %v4259_v4  ;;  %v6080_v17 = vadd.f32 %v5969_v28, %v338_v6  ;;  %v627_v18 = vsel %vm607_vm7, %v622_v0, %v626_v1 }
 0x106   :  { %5598 = vpow2.f32 %v466_v5  ;;  %v6086_v20 = vpack.c.bf16 %v537_v59, %v536_v3  ;;  %v535_v21 = vsel %vm407_vm13, %v6005_v11, %v4257_v10  ;;  %4873 = vmatmul.mubr.bf16.vlgmr.msra.gmra.mrb[0].mxu1 %v627_v18  ;;  %v468_v24 = vmul.f32 1.442695, %v6070_v14  ;;  %v5488_v11 = vld [vmem:[%s7445_s3 + $0x10] sm:$0xff]  }
 0x107   :  { %5600 = vpow2.f32 %v462_v13  ;;  %v6091_v8 = vpack.c.bf16 %v535_v21, %v534_v19  ;;  %v464_v25 = vmul.f32 1.442695, %v6080_v17  ;;  %4905 = vmatpush3.bf16.msra.mxu1 %v5963_v27  ;;  %v630_v63 = vor.u32 %v628_v7, %v626_v1  ;;  %v5490_v7 = vld [vmem:[%s7445_s3 + $0x20] sm:$0xff]  }
 0x108   :  { %v5591_v23 = vpop.eup %5590  ;;  %4906 = vmatprep.subr.bf16.mxu1 %v5487_v16  ;;  %vm413_vm0 = vcmp.gt.f32.partialorder %v6037_v40, 0.0  ;;  %5602 = vpow2.f32 %v468_v24  ;;  %vm411_vm1 = vcmp.gt.f32.partialorder %v6045_v43, 0.0  ;;  %v636_v47 = vshrl.u32 %v6039_v41, 16 }
 0x109   :  { %v5593_v29 = vpop.eup %5592  ;;  %v4846_v31 = vpop.f32.mrb[20].mxu0  ;;  %v4262_v32 = vadd.f32 -1.0, %v5591_v23  ;;  %5604 = vpow2.f32 %v464_v25  ;;  %v635_v36 = vsel %vm607_vm7, %v630_v63, %v634_v30  ;;  %v640_v50 = vshll.u32 %v6091_v8, 16 }
 0x10a   :  { %v6103_v33 = vadd.f32 %v4846_v31, %v5969_v28  ;;  %v351_v27 = vpop.f32.mrb[21].mxu0  ;;  %v5595_v34 = vpop.eup %5594  ;;  %v4260_v35 = vadd.f32 -1.0, %v5593_v29  ;;  %4876 = vmatprep.mubr.bf16.mxu1 %v635_v36  ;;  %vm416_vm2 = vcmp.gt.f32.partialorder %v6058_v56, 0.0  ;;  %vm414_vm3 = vcmp.gt.f32.partialorder %v6061_v61, 0.0 }
 0x10b   :  { %v6107_v37 = vadd.f32 %v5969_v28, %v351_v27  ;;  %v4847_v38 = vpop.f32.mrb[22].mxu0  ;;  %v5597_v39 = vpop.eup %5596  ;;  %v4263_v42 = vadd.f32 -1.0, %v5595_v34  ;;  %4907 = vmatpush3.bf16.msra.mxu1 %v5487_v16  ;;  %v540_v53 = vsel %vm412_vm14, %v6017_v22, %v4262_v32  ;;  %v638_v2 = vor.u32 %v636_v47, %v634_v30  ;;  %v5491_v32 = vld [vmem:[%s7445_s3 + $0x28] sm:$0xff]  }
 0x10c   :  { %v474_v45 = vmul.f32 1.442695, %v6103_v33  ;;  %v354_v46 = vpop.f32.mrb[23].mxu0  ;;  %v4261_v48 = vadd.f32 -1.0, %v5597_v39  ;;  %v6114_v51 = vadd.f32 %v4847_v38, %v5969_v28  ;;  %4908 = vmatprep.subr.bf16.mxu1 %v5488_v11  ;;  %v538_v57 = vsel %vm410_vm15, %v6021_v26, %v4260_v35 }
 0x10d   :  { %v470_v49 = vmul.f32 1.442695, %v6107_v37  ;;  %v541_v54 = vsel %vm413_vm0, %v6037_v40, %v4263_v42  ;;  %v6128_v55 = vadd.f32 %v5969_v28, %v354_v46  ;;  %v642_v26 = vrot.slane %v640_v50, 1 }
 0x10e   :  { %5606 = vpow2.f32 %v474_v45  ;;  %v6133_v58 = vpack.c.bf16 %v541_v54, %v540_v53  ;;  %v539_v22 = vsel %vm411_vm1, %v6045_v43, %v4261_v48  ;;  %v476_v40 = vmul.f32 1.442695, %v6114_v51 }
 0x10f   :  { %5608 = vpow2.f32 %v470_v49  ;;  %v6138_v62 = vpack.c.bf16 %v539_v22, %v538_v57  ;;  %v472_v0 = vmul.f32 1.442695, %v6128_v55  ;;  %4909 = vmatpush3.bf16.msra.mxu1 %v5488_v11  ;;  %v644_v3 = vshrl.u32 %v6091_v8, 16 }
 0x110   :  { %v5599_v60 = vpop.eup %5598  ;;  %v648_v4 = vshll.u32 %v6086_v20, 16  ;;  %4910 = vmatprep.subr.bf16.mxu1 %v5489_v52  ;;  %vm417_vm4 = vcmp.gt.f32.partialorder %v6070_v14, 0.0  ;;  %vm415_vm5 = vcmp.gt.f32.partialorder %v6080_v17, 0.0  ;;  %5610 = vpow2.f32 %v476_v40 }
 0x111   :  { %v5601_v1 = vpop.eup %5600  ;;  %v4850_v5 = vpop.f32.mrb[24].mxu0  ;;  %v4266_v10 = vadd.f32 -1.0, %v5599_v60  ;;  %5612 = vpow2.f32 %v472_v0  ;;  %v643_v13 = vsel %vm607_vm7, %v638_v2, %v642_v26  ;;  %v646_v15 = vor.u32 %v644_v3, %v642_v26 }
 0x112   :  { %v6148_v43 = vadd.f32 %v4850_v5, %v5969_v28  ;;  %v367_v6 = vpop.f32.mrb[25].mxu0  ;;  %v5603_v59 = vpop.eup %5602  ;;  %v4264_v18 = vadd.f32 -1.0, %v5601_v1  ;;  %vm420_vm6 = vcmp.gt.f32.partialorder %v6103_v33, 0.0  ;;  %4877 = vmatmul.mubr.bf16.gmra.mrb[4].mxu1 %v643_v13  ;;  %v650_v19 = vrot.slane %v648_v4, 1 }
 0x113   :  { %v4851_v16 = vpop.f32.mrb[26].mxu0  ;;  %v5605_v24 = vpop.eup %5604  ;;  %v4267_v25 = vadd.f32 -1.0, %v5603_v59  ;;  %v6157_v29 = vadd.f32 %v5969_v28, %v367_v6  ;;  %4911 = vmatpush3.bf16.msra.mxu1 %v5489_v52  ;;  %vm418_vm8 = vcmp.gt.f32.partialorder %v6107_v37, 0.0  ;;  %vm421_vm9 = vcmp.gt.f32.partialorder %v6114_v51, 0.0 }
 0x114   :  { %v482_v21 = vmul.f32 1.442695, %v6148_v43  ;;  %v370_v23 = vpop.f32.mrb[27].mxu0  ;;  %v6160_v63 = vadd.f32 %v4851_v16, %v5969_v28  ;;  %v4265_v31 = vadd.f32 -1.0, %v5605_v24  ;;  %v651_v11 = vsel %vm607_vm7, %v646_v15, %v650_v19  ;;  %4912 = vmatprep.subr.bf16.mxu1 %v5490_v7  ;;  %v5493_v16 = vld [vmem:[%s7445_s3 + $0x38] sm:$0xff]  }
 0x115   :  { %v6163_v30 = vadd.f32 %v5969_v28, %v370_v23  ;;  %v544_v27 = vsel %vm416_vm2, %v6058_v56, %v4266_v10  ;;  %v545_v34 = vsel %vm417_vm4, %v6070_v14, %v4267_v25  ;;  %4880 = vmatprep.mubr.bf16.mxu1 %v651_v11  ;;  %v478_v35 = vmul.f32 1.442695, %v6157_v29 }
 0x116   :  { %5614 = vpow2.f32 %v482_v21  ;;  %v652_v36 = vshrl.u32 %v6086_v20, 16  ;;  %v542_v39 = vsel %vm414_vm3, %v6061_v61, %v4264_v18  ;;  %v6182_v42 = vpack.c.bf16 %v545_v34, %v544_v27 }
 0x117   :  { %v543_v56 = vsel %vm415_vm5, %v6080_v17, %v4265_v31  ;;  %v484_v45 = vmul.f32 1.442695, %v6160_v63  ;;  %5616 = vpow2.f32 %v478_v35  ;;  %v480_v48 = vmul.f32 1.442695, %v6163_v30  ;;  %4913 = vmatpush3.bf16.msra.mxu1 %v5490_v7  ;;  %v5492_v17 = vld [vmem:[%s7445_s3 + $0x30] sm:$0xff]  }
 0x118   :  { %v5607_v38 = vpop.eup %5606  ;;  %v6188_v14 = vpack.c.bf16 %v543_v56, %v542_v39  ;;  %vm419_vm10 = vcmp.gt.f32.partialorder %v6128_v55, 0.0  ;;  %v654_v61 = vor.u32 %v652_v36, %v650_v19  ;;  %v656_v50 = vshll.u32 %v6138_v62, 16  ;;  %4914 = vmatprep.subr.bf16.mxu1 %v5491_v32 }
 0x119   :  { %v5609_v46 = vpop.eup %5608  ;;  %v4270_v47 = vadd.f32 -1.0, %v5607_v38  ;;  %v4854_v49 = vpop.f32.mrb[28].mxu0  ;;  %5618 = vpow2.f32 %v484_v45  ;;  %v664_v54 = vshll.u32 %v6133_v58, 16  ;;  %v660_v0 = vshrl.u32 %v6138_v62, 16 }
 0x11a   :  { %v383_v52 = vpop.f32.mrb[29].mxu0  ;;  %v4268_v53 = vadd.f32 -1.0, %v5609_v46  ;;  %5620 = vpow2.f32 %v480_v48  ;;  %v6198_v57 = vadd.f32 %v4854_v49, %v5969_v28  ;;  %v5611_v60 = vpop.eup %5610  ;;  %v658_v40 = vrot.slane %v656_v50, 1 }
 0x11b   :  { %v4855_v22 = vpop.f32.mrb[30].mxu0  ;;  %v6202_v1 = vadd.f32 %v5969_v28, %v383_v52  ;;  %v5613_v3 = vpop.eup %5612  ;;  %v548_v4 = vsel %vm420_vm6, %v6103_v33, %v4270_v47  ;;  %v4271_v5 = vadd.f32 -1.0, %v5611_v60  ;;  %vm424_vm11 = vcmp.gt.f32.partialorder %v6148_v43, 0.0  ;;  %4915 = vmatpush3.bf16.msra.mxu1 %v5491_v32  ;;  %v6242_v32 = vld [vmem:[%s7445_s3 + $0x80] sm:$0xff]  }
 0x11c   :  { %v6205_v2 = vadd.f32 %v4855_v22, %v5969_v28  ;;  %v386_v26 = vpop.f32.mrb[31].mxu0  ;;  %v490_v6 = vmul.f32 1.442695, %v6198_v57  ;;  %v4269_v7 = vadd.f32 -1.0, %v5613_v3  ;;  %vm422_vm12 = vcmp.gt.f32.partialorder %v6157_v29, 0.0  ;;  %4916 = vmatprep.subr.bf16.mxu1 %v5492_v17 }
 0x11d   :  { %v659_v10 = vsel %vm607_vm7, %v654_v61, %v658_v40  ;;  %v662_v13 = vor.u32 %v660_v0, %v658_v40  ;;  %v666_v15 = vrot.slane %v664_v54, 1  ;;  %v546_v33 = vsel %vm418_vm8, %v6107_v37, %v4268_v53 }
 0x11e   :  { %v549_v59 = vsel %vm421_vm9, %v6114_v51, %v4271_v5  ;;  %4881 = vmatmul.mubr.bf16.gmra.mrb[8].mxu1 %v659_v10  ;;  %5622 = vpow2.f32 %v490_v6  ;;  %v486_v18 = vmul.f32 1.442695, %v6202_v1  ;;  %v547_v23 = vsel %vm419_vm10, %v6128_v55, %v4269_v7 }
 0x11f   :  { %v6224_v21 = vpack.c.bf16 %v549_v59, %v548_v4  ;;  %v667_v24 = vsel %vm607_vm7, %v662_v13, %v666_v15  ;;  %v492_v25 = vmul.f32 1.442695, %v6205_v2  ;;  %v6231_v37 = vpack.c.bf16 %v547_v23, %v546_v33  ;;  %4917 = vmatpush3.bf16.msra.mxu1 %v5492_v17 }
 0x120   :  { %v5615_v19 = vpop.eup %5614  ;;  %4884 = vmatprep.mubr.bf16.mxu1 %v667_v24  ;;  %5624 = vpow2.f32 %v486_v18  ;;  %v6234_v51 = vadd.f32 %v5969_v28, %v386_v26  ;;  %vm425_vm13 = vcmp.gt.f32.partialorder %v6160_v63, 0.0  ;;  %v668_v11 = vshrl.u32 %v6133_v58, 16  ;;  %4918 = vmatprep.subr.bf16.mxu1 %v5493_v16 }
 0x121   :  { %v4274_v31 = vadd.f32 -1.0, %v5615_v19  ;;  %5626 = vpow2.f32 %v492_v25  ;;  %v672_v55 = vshll.u32 %v6188_v14, 16  ;;  %v5617_v27 = vpop.eup %5616  ;;  %vm423_vm14 = vcmp.gt.f32.partialorder %v6163_v30, 0.0 }
 0x122   :  { %v488_v28 = vmul.f32 1.442695, %v6234_v51  ;;  %v676_v34 = vshrl.u32 %v6188_v14, 16  ;;  %v680_v35 = vshll.u32 %v6182_v42, 16  ;;  %v4272_v39 = vadd.f32 -1.0, %v5617_v27 }
 0x123   :  { %v5619_v36 = vpop.eup %5618  ;;  %v552_v38 = vsel %vm424_vm11, %v6148_v43, %v4274_v31  ;;  %v670_v56 = vor.u32 %v668_v11, %v666_v15  ;;  %v674_v45 = vrot.slane %v672_v55, 1  ;;  %v684_v48 = vshrl.u32 %v6182_v42, 16  ;;  %4919 = vmatpush3.bf16.msra.mxu1 %v5493_v16 }
 0x124   :  { %v5621_v46 = vpop.eup %5620  ;;  %v4275_v47 = vadd.f32 -1.0, %v5619_v36  ;;  %5628 = vpow2.f32 %v488_v28  ;;  %v688_v49 = vshll.u32 %v6231_v37, 16  ;;  %v682_v17 = vrot.slane %v680_v35, 1  ;;  %4952 = vmatprep.subr.bf16.mxu1 %v6242_v32 }
 0x125   :  { %v4273_v61 = vadd.f32 -1.0, %v5621_v46  ;;  %v675_v50 = vsel %vm607_vm7, %v670_v56, %v674_v45  ;;  %v678_v52 = vor.u32 %v676_v34, %v674_v45  ;;  %v550_v43 = vsel %vm422_vm12, %v6157_v29, %v4272_v39 }
 0x126   :  { %v553_v53 = vsel %vm425_vm13, %v6160_v63, %v4275_v47  ;;  %4885 = vmatmul.mubr.bf16.gmra.mrb[12].mxu1 %v675_v50  ;;  %v690_v54 = vrot.slane %v688_v49, 1  ;;  %v692_v22 = vshrl.u32 %v6231_v37, 16  ;;  %v696_v26 = vshll.u32 %v6224_v21, 16 }
 0x127   :  { %v6262_v60 = vpack.c.bf16 %v553_v53, %v552_v38  ;;  %v551_v40 = vsel %vm423_vm14, %v6163_v30, %v4273_v61  ;;  %v683_v0 = vsel %vm607_vm7, %v678_v52, %v682_v17  ;;  %v686_v63 = vor.u32 %v684_v48, %v682_v17 }
 0x128   :  { %v5623_v3 = vpop.eup %5622  ;;  %v6269_v29 = vpack.c.bf16 %v551_v40, %v550_v43  ;;  %4888 = vmatprep.mubr.bf16.mxu1 %v683_v0  ;;  %v694_v4 = vor.u32 %v692_v22, %v690_v54  ;;  %v698_v7 = vrot.slane %v696_v26, 1  ;;  %vm428_vm15 = vcmp.gt.f32.partialorder %v6198_v57, 0.0  ;;  %v5503_v22 = vld [vmem:[%s7447_s5 + $0x48] sm:$0xff]   ;;  %v5504_v0 = vld [vmem:[%s7447_s5 + $0x50] sm:$0xff]   ;;  %v5505_v26 = vld [vmem:[%s7447_s5 + $0x58] sm:$0xff]  }
 0x129   :  { %v4278_v6 = vadd.f32 -1.0, %v5623_v3  ;;  %v691_v15 = vsel %vm607_vm7, %v686_v63, %v690_v54  ;;  %vm429_vm0 = vcmp.gt.f32.partialorder %v6205_v2, 0.0  ;;  %v712_v25 = vshll.u32 %v6262_v60, 16  ;;  %v5502_v54 = vld [vmem:[%s7447_s5 + $0x40] sm:$0xff]   ;;  %v5495_v40 = vld [vmem:[%s7445_s3 + $0x88] sm:$0xff]   ;;  %v5496_v3 = vld [vmem:[%s7445_s3 + $0x90] sm:$0xff]  }
 0x12a   :  { %v5625_v5 = vpop.eup %5624  ;;  %v704_v10 = vshll.u32 %v6269_v29, 16  ;;  %v699_v30 = vsel %vm607_vm7, %v694_v4, %v698_v7  ;;  %v708_v24 = vshrl.u32 %v6269_v29, 16  ;;  %v700_v55 = vshrl.u32 %v6224_v21, 16  ;;  %5000 = vmatprep.subr.bf16.mxu0 %v5502_v54  ;;  %v5497_v4 = vld [vmem:[%s7445_s3 + $0x98] sm:$0xff]   ;;  %v5499_v63 = vld [vmem:[%s7445_s3 + $0xa8] sm:$0xff]  }
 0x12b   :  { %v5627_v13 = vpop.eup %5626  ;;  %v4276_v59 = vadd.f32 -1.0, %v5625_v5  ;;  %v556_v19 = vsel %vm428_vm15, %v6198_v57, %v4278_v6  ;;  %vm426_vm1 = vcmp.gt.f32.partialorder %v6202_v1, 0.0  ;;  %vm427_vm2 = vcmp.gt.f32.partialorder %v6234_v51, 0.0  ;;  %5001 = vmatpush3.bf16.msra.mxu0 %v5502_v54  ;;  %v5500_v5 = vld [vmem:[%s7445_s3 + $0xb0] sm:$0xff]   ;;  %v5501_v6 = vld [vmem:[%s7445_s3 + $0xb8] sm:$0xff]  }
 0x12c   :  { %v4279_v16 = vadd.f32 -1.0, %v5627_v13  ;;  %v706_v33 = vrot.slane %v704_v10, 1  ;;  %v702_v28 = vor.u32 %v700_v55, %v698_v7  ;;  %v714_v35 = vrot.slane %v712_v25, 1  ;;  %5002 = vmatprep.subr.bf16.mxu0 %v5503_v22 }
 0x12d   :  { %v554_v57 = vsel %vm426_vm1, %v6202_v1, %v4276_v59  ;;  %v716_v1 = vshrl.u32 %v6262_v60, 16  ;;  %v5790_v17 = vmov 0   ;;  %v1209_v7 = vrot.slane %v6007_v12, 1 }
 0x12e   :  { %v5629_v18 = vpop.eup %5628  ;;  %v557_v23 = vsel %vm429_vm0, %v6205_v2, %v4279_v16  ;;  %4889 = vmatmul.mubr.bf16.gmra.mrb[16].mxu1 %v691_v15  ;;  %v710_v27 = vor.u32 %v708_v24, %v706_v33  ;;  %v707_v36 = vsel %vm607_vm7, %v702_v28, %v706_v33  ;;  %v6299_v43 = vrot.slane %v5790_v17, 1 }
 0x12f   :  { %v6280_v31 = vpack.c.bf16 %v557_v23, %v556_v19  ;;  %v4277_v11 = vadd.f32 -1.0, %v5629_v18  ;;  %4892 = vmatprep.mubr.bf16.mxu1 %v699_v30  ;;  %v718_v47 = vor.u32 %v716_v1, %v714_v35  ;;  %5003 = vmatpush3.bf16.msra.mxu0 %v5503_v22  ;;  %v1210_v10 = vrot.slane %v6002_v9, 1 }
 0x130   :  { %v715_v38 = vsel %vm607_vm7, %v710_v27, %v714_v35  ;;  %5004 = vmatprep.subr.bf16.mxu0 %v5504_v0  ;;  %v1212_v15 = vrot.slane %v6047_v44, 1  ;;  %v1214_v16 = vrot.slane %v6039_v41, 1  ;;  %v5509_v35 = vld [vmem:[%s7447_s5 + $0x78] sm:$0xff]  }
 0x131   :  { %v555_v2 = vsel %vm427_vm2, %v6234_v51, %v4277_v11  ;;  %v728_v46 = vshll.u32 %v6280_v31, 16  ;;  %v732_v50 = vshrl.u32 %v6280_v31, 16 }
 0x132   :  { %v6287_v34 = vpack.c.bf16 %v555_v2, %v554_v57 }
 0x133   :  { %v730_v48 = vrot.slane %v728_v46, 1  ;;  %5005 = vmatpush3.bf16.msra.mxu0 %v5504_v0 }
 0x134   :  { %v720_v39 = vshll.u32 %v6287_v34, 16  ;;  %v724_v45 = vshrl.u32 %v6287_v34, 16  ;;  %5006 = vmatprep.subr.bf16.mxu0 %v5505_v26 }
 0x135   :  { %v734_v52 = vor.u32 %v732_v50, %v730_v48 }
 0x136   :  { %4893 = vmatmul.mubr.bf16.gmra.mrb[20].mxu1 %v707_v36  ;;  %v722_v56 = vrot.slane %v720_v39, 1  ;;  %v6401_v36 = vld [vmem:[%s7447_s5] sm:$0xff]  }
 0x137   :  { %4896 = vmatprep.mubr.bf16.mxu1 %v715_v38  ;;  %v739_v53 = vsel %vm607_vm7, %v734_v52, %v6299_v43  ;;  %5007 = vmatpush3.bf16.msra.mxu0 %v5505_v26  ;;  %v6407_v38 = vld [vmem:[%s7448_s4] ss:$0 sm:$0xff] }
 0x138   :  { %v726_v51 = vor.u32 %v724_v45, %v722_v56  ;;  %v723_v49 = vsel %vm607_vm7, %v718_v47, %v722_v56 }
 0x13a   :  { %v731_v61 = vsel %vm607_vm7, %v726_v51, %v730_v48  ;;  %vm1208_vm7 = vcmask 1046528  }
 0x13b   :  { %v1211_v13 = vsel %vm1208_vm7, %v1209_v7, %v1210_v10  ;;  %v1213_v30 = vsel %vm1208_vm7, %v1210_v10, %v1212_v15  ;;  %v1215_v33 = vsel %vm1208_vm7, %v1212_v15, %v1214_v16 }
 0x13e   :  { %4897 = vmatmul.mubr.bf16.gmra.mrb[24].mxu1 %v723_v49 }
 0x13f   :  { %4900 = vmatprep.mubr.bf16.mxu1 %v731_v61 }
 0x146   :  { %4901 = vmatmul.mubr.bf16.gmra.mrb[28].mxu1 %v739_v53 }
 0x147   :  { %4920 = vmatprep.mubr.bf16.mxu1 %v6007_v12  ;;  %v1216_v12 = vrot.slane %v6091_v8, 1 }
 0x149   :  { %v1217_v59 = vsel %vm1208_vm7, %v1214_v16, %v1216_v12 }
 0x14e   :  { %4921 = vmatmul.mubr.bf16.vlgmr.msra.gmra.mrb[0].mxu1 %v6002_v9  ;;  %v1218_v9 = vrot.slane %v6086_v20, 1 }
 0x14f   :  { %4953 = vmatpush3.bf16.msra.mxu1 %v6242_v32  ;;  %4924 = vmatprep.mubr.bf16.mxu1 %v6047_v44  ;;  %v5498_v32 = vld [vmem:[%s7445_s3 + $0xa0] sm:$0xff]   ;;  %v1220_v44 = vrot.slane %v6138_v62, 1 }
 0x150   :  { %4954 = vmatprep.subr.bf16.mxu1 %v5495_v40  ;;  %v1219_v18 = vsel %vm1208_vm7, %v1216_v12, %v1218_v9 }
 0x151   :  { %v1221_v19 = vsel %vm1208_vm7, %v1218_v9, %v1220_v44 }
 0x153   :  { %4955 = vmatpush3.bf16.msra.mxu1 %v5495_v40 }
 0x154   :  { %4956 = vmatprep.subr.bf16.mxu1 %v5496_v3 }
 0x156   :  { %4925 = vmatmul.mubr.bf16.gmra.mrb[4].mxu1 %v6039_v41  ;;  %v1222_v41 = vrot.slane %v6133_v58, 1 }
 0x157   :  { %4928 = vmatprep.mubr.bf16.mxu1 %v6091_v8  ;;  %4957 = vmatpush3.bf16.msra.mxu1 %v5496_v3  ;;  %v1224_v8 = vrot.slane %v6188_v14, 1 }
 0x158   :  { %4958 = vmatprep.subr.bf16.mxu1 %v5497_v4  ;;  %v1223_v23 = vsel %vm1208_vm7, %v1220_v44, %v1222_v41 }
 0x159   :  { %v1225_v24 = vsel %vm1208_vm7, %v1222_v41, %v1224_v8 }
 0x15b   :  { %4959 = vmatpush3.bf16.msra.mxu1 %v5497_v4 }
 0x15c   :  { %4960 = vmatprep.subr.bf16.mxu1 %v5498_v32 }
 0x15e   :  { %4929 = vmatmul.mubr.bf16.gmra.mrb[8].mxu1 %v6086_v20  ;;  %v1226_v20 = vrot.slane %v6182_v42, 1 }
 0x15f   :  { %4932 = vmatprep.mubr.bf16.mxu1 %v6138_v62  ;;  %4961 = vmatpush3.bf16.msra.mxu1 %v5498_v32  ;;  %v1228_v62 = vrot.slane %v6231_v37, 1 }
 0x160   :  { %4962 = vmatprep.subr.bf16.mxu1 %v5499_v63  ;;  %v1227_v25 = vsel %vm1208_vm7, %v1224_v8, %v1226_v20 }
 0x161   :  { %v1229_v11 = vsel %vm1208_vm7, %v1226_v20, %v1228_v62 }
 0x163   :  { %4963 = vmatpush3.bf16.msra.mxu1 %v5499_v63 }
 0x164   :  { %4964 = vmatprep.subr.bf16.mxu1 %v5500_v5 }
 0x166   :  { %4933 = vmatmul.mubr.bf16.gmra.mrb[12].mxu1 %v6133_v58  ;;  %v1230_v58 = vrot.slane %v6224_v21, 1 }
 0x167   :  { %4936 = vmatprep.mubr.bf16.mxu1 %v6188_v14  ;;  %4965 = vmatpush3.bf16.msra.mxu1 %v5500_v5  ;;  %v1232_v14 = vrot.slane %v6269_v29, 1 }
 0x168   :  { %4966 = vmatprep.subr.bf16.mxu1 %v5501_v6  ;;  %v1231_v55 = vsel %vm1208_vm7, %v1228_v62, %v1230_v58 }
 0x169   :  { %v1233_v27 = vsel %vm1208_vm7, %v1230_v58, %v1232_v14 }
 0x16b   :  { %4967 = vmatpush3.bf16.msra.mxu1 %v5501_v6 }
 0x16e   :  { %4937 = vmatmul.mubr.bf16.gmra.mrb[16].mxu1 %v6182_v42  ;;  %v1234_v42 = vrot.slane %v6262_v60, 1 }
 0x16f   :  { %4940 = vmatprep.mubr.bf16.mxu1 %v6231_v37  ;;  %v1236_v37 = vrot.slane %v6287_v34, 1 }
 0x170   :  { %v1235_v57 = vsel %vm1208_vm7, %v1232_v14, %v1234_v42 }
 0x171   :  { %v1237_v2 = vsel %vm1208_vm7, %v1234_v42, %v1236_v37 }
 0x176   :  { %4941 = vmatmul.mubr.bf16.gmra.mrb[20].mxu1 %v6224_v21  ;;  %v1238_v21 = vrot.slane %v6280_v31, 1 }
 0x177   :  { %4944 = vmatprep.mubr.bf16.mxu1 %v6269_v29 }
 0x178   :  { %v1239_v28 = vsel %vm1208_vm7, %v1236_v37, %v1238_v21  ;;  %v1241_v29 = vsel %vm1208_vm7, %v1238_v21, %v6299_v43 }
 0x17e   :  { %4945 = vmatmul.mubr.bf16.gmra.mrb[24].mxu1 %v6262_v60  ;;  %v5506_v60 = vld [vmem:[%s7447_s5 + $0x60] sm:$0xff]  }
 0x17f   :  { %4948 = vmatprep.mubr.bf16.mxu1 %v6287_v34  ;;  %5008 = vmatprep.subr.bf16.mxu0 %v5506_v60  ;;  %v5508_v34 = vld [vmem:[%s7447_s5 + $0x70] sm:$0xff]  }
 0x180   :  { %5009 = vmatpush3.bf16.msra.mxu0 %v5506_v60 }
 0x186   :  { %4949 = vmatmul.mubr.bf16.gmra.mrb[28].mxu1 %v6280_v31  ;;  %v5507_v31 = vld [vmem:[%s7447_s5 + $0x68] sm:$0xff]  }
 0x187   :  { %4968 = vmatprep.mubr.bf16.mxu1 %v1211_v13  ;;  %5010 = vmatprep.subr.bf16.mxu0 %v5507_v31 }
 0x188   :  { %5011 = vmatpush3.bf16.msra.mxu0 %v5507_v31 }
 0x189   :  { %5012 = vmatprep.subr.bf16.mxu0 %v5508_v34 }
 0x18c   :  { %5013 = vmatpush3.bf16.msra.mxu0 %v5508_v34 }
 0x18d   :  { %5014 = vmatprep.subr.bf16.mxu0 %v5509_v35 }
 0x18e   :  { %4969 = vmatmul.mubr.bf16.vlgmr.msra.gmra.mrb[0].mxu1 %v1213_v30 }
 0x18f   :  { %4972 = vmatprep.mubr.bf16.mxu1 %v1215_v33 }
 0x190   :  { %5015 = vmatpush3.bf16.msra.mxu0 %v5509_v35 }
 0x191   :  { %5048 = vmatprep.subr.bf16.mxu0 %v6401_v36 }
 0x196   :  { %4973 = vmatmul.mubr.bf16.gmra.mrb[4].mxu1 %v1217_v59 }
 0x197   :  { %4976 = vmatprep.mubr.bf16.mxu1 %v1219_v18 }
 0x19e   :  { %4977 = vmatmul.mubr.bf16.gmra.mrb[8].mxu1 %v1221_v19 }
 0x19f   :  { %4980 = vmatprep.mubr.bf16.mxu1 %v1223_v23 }
 0x1a6   :  { %4981 = vmatmul.mubr.bf16.gmra.mrb[12].mxu1 %v1225_v24 }
 0x1a7   :  { %4984 = vmatprep.mubr.bf16.mxu1 %v1227_v25 }
 0x1ae   :  { %4985 = vmatmul.mubr.bf16.gmra.mrb[16].mxu1 %v1229_v11 }
 0x1af   :  { %4988 = vmatprep.mubr.bf16.mxu1 %v1231_v55 }
 0x1b6   :  { %4989 = vmatmul.mubr.bf16.gmra.mrb[20].mxu1 %v1233_v27 }
 0x1b7   :  { %4992 = vmatprep.mubr.bf16.mxu1 %v1235_v57 }
 0x1be   :  { %4993 = vmatmul.mubr.bf16.gmra.mrb[24].mxu1 %v1237_v2 }
 0x1bf   :  { %4996 = vmatprep.mubr.bf16.mxu1 %v1239_v28 }
 0x1c6   :  { %4997 = vmatmul.mubr.bf16.gmra.mrb[28].mxu1 %v1241_v29 }
 0x261   :  { %v4970_v39 = vpop.f32.mrb[0].mxu1 }
 0x262   :  { %v1508_v56 = vadd.f32 %v4970_v39, %v6407_v38  ;;  %v1340_v45 = vpop.f32.mrb[1].mxu1 }
 0x263   :  { %v1506_v46 = vadd.f32 %v6407_v38, %v1340_v45  ;;  %v4971_v1 = vpop.f32.mrb[2].mxu1 }
 0x264   :  { %v1574_v51 = vmul.f32 1.442695, %v1508_v56  ;;  %v1509_v47 = vadd.f32 %v4971_v1, %v6407_v38  ;;  %v1343_v48 = vpop.f32.mrb[3].mxu1  ;;  %vm1540_vm3 = vcmp.gt.f32.partialorder %v1508_v56, 0.0 }
 0x265   :  { %v1570_v49 = vmul.f32 1.442695, %v1506_v46  ;;  %v1507_v61 = vadd.f32 %v6407_v38, %v1343_v48  ;;  %vm1538_vm4 = vcmp.gt.f32.partialorder %v1506_v46, 0.0 }
 0x266   :  { %5630 = vpow2.f32 %v1574_v51  ;;  %v1576_v50 = vmul.f32 1.442695, %v1509_v47  ;;  %vm1541_vm5 = vcmp.gt.f32.partialorder %v1509_v47, 0.0 }
 0x267   :  { %5632 = vpow2.f32 %v1570_v49  ;;  %v1572_v52 = vmul.f32 1.442695, %v1507_v61  ;;  %vm1539_vm6 = vcmp.gt.f32.partialorder %v1507_v61, 0.0 }
 0x268   :  { %5634 = vpow2.f32 %v1576_v50 }
 0x269   :  { %5636 = vpow2.f32 %v1572_v52  ;;  %v4974_v53 = vpop.f32.mrb[4].mxu1 }
 0x26a   :  { %v6414_v54 = vadd.f32 %v4974_v53, %v6407_v38  ;;  %v1356_v22 = vpop.f32.mrb[5].mxu1 }
 0x26b   :  { %v6417_v40 = vadd.f32 %v6407_v38, %v1356_v22  ;;  %v4975_v0 = vpop.f32.mrb[6].mxu1 }
 0x26c   :  { %v1582_v26 = vmul.f32 1.442695, %v6414_v54  ;;  %v6421_v3 = vadd.f32 %v4975_v0, %v6407_v38  ;;  %v1359_v4 = vpop.f32.mrb[7].mxu1  ;;  %vm1544_vm8 = vcmp.gt.f32.partialorder %v6414_v54, 0.0 }
 0x26d   :  { %v1578_v32 = vmul.f32 1.442695, %v6417_v40  ;;  %v6425_v63 = vadd.f32 %v6407_v38, %v1359_v4  ;;  %vm1542_vm9 = vcmp.gt.f32.partialorder %v6417_v40, 0.0 }
 0x26e   :  { %5638 = vpow2.f32 %v1582_v26  ;;  %v1584_v5 = vmul.f32 1.442695, %v6421_v3  ;;  %vm1545_vm10 = vcmp.gt.f32.partialorder %v6421_v3, 0.0 }
 0x26f   :  { %5640 = vpow2.f32 %v1578_v32  ;;  %v1580_v6 = vmul.f32 1.442695, %v6425_v63  ;;  %vm1543_vm11 = vcmp.gt.f32.partialorder %v6425_v63, 0.0 }
 0x270   :  { %v5631_v7 = vpop.eup %5630  ;;  %5642 = vpow2.f32 %v1584_v5 }
 0x271   :  { %v5633_v10 = vpop.eup %5632  ;;  %v4339_v13 = vadd.f32 -1.0, %v5631_v7  ;;  %5644 = vpow2.f32 %v1580_v6  ;;  %v4978_v15 = vpop.f32.mrb[8].mxu1 }
 0x272   :  { %v5635_v16 = vpop.eup %5634  ;;  %v4337_v30 = vadd.f32 -1.0, %v5633_v10  ;;  %v6430_v33 = vadd.f32 %v4978_v15, %v6407_v38  ;;  %v1372_v12 = vpop.f32.mrb[9].mxu1  ;;  %v5511_v15 = vld [vmem:[%s7447_s5 + $0x8] sm:$0xff]  }
 0x273   :  { %v5637_v9 = vpop.eup %5636  ;;  %v4340_v59 = vadd.f32 -1.0, %v5635_v16  ;;  %v6433_v18 = vadd.f32 %v6407_v38, %v1372_v12  ;;  %v4979_v44 = vpop.f32.mrb[10].mxu1  ;;  %v1668_v41 = vsel %vm1540_vm3, %v1508_v56, %v4339_v13 }
 0x274   :  { %v4338_v19 = vadd.f32 -1.0, %v5637_v9  ;;  %v1590_v23 = vmul.f32 1.442695, %v6430_v33  ;;  %v1375_v8 = vpop.f32.mrb[11].mxu1  ;;  %v1666_v20 = vsel %vm1538_vm4, %v1506_v46, %v4337_v30  ;;  %v6438_v62 = vadd.f32 %v4979_v44, %v6407_v38 }
 0x275   :  { %v1669_v24 = vsel %vm1541_vm5, %v1509_v47, %v4340_v59  ;;  %v1586_v25 = vmul.f32 1.442695, %v6433_v18  ;;  %v6443_v55 = vadd.f32 %v6407_v38, %v1375_v8  ;;  %vm1548_vm12 = vcmp.gt.f32.partialorder %v6430_v33, 0.0 }
 0x276   :  { %v6440_v58 = vpack.c.bf16 %v1669_v24, %v1668_v41  ;;  %v1667_v11 = vsel %vm1539_vm6, %v1507_v61, %v4338_v19  ;;  %5646 = vpow2.f32 %v1590_v23  ;;  %v1592_v42 = vmul.f32 1.442695, %v6438_v62 }
 0x277   :  { %v6445_v14 = vpack.c.bf16 %v1667_v11, %v1666_v20  ;;  %5648 = vpow2.f32 %v1586_v25  ;;  %v1588_v57 = vmul.f32 1.442695, %v6443_v55  ;;  %vm1546_vm13 = vcmp.gt.f32.partialorder %v6433_v18, 0.0 }
 0x278   :  { %v5639_v27 = vpop.eup %5638  ;;  %v1764_v37 = vrot.slane %v6440_v58, 1  ;;  %5650 = vpow2.f32 %v1592_v42  ;;  %vm1549_vm14 = vcmp.gt.f32.partialorder %v6438_v62, 0.0  ;;  %vm1547_vm15 = vcmp.gt.f32.partialorder %v6443_v55, 0.0 }
 0x279   :  { %v5641_v21 = vpop.eup %5640  ;;  %v4343_v2 = vadd.f32 -1.0, %v5639_v27  ;;  %v4982_v28 = vpop.f32.mrb[12].mxu1  ;;  %v1763_v29 = vrot.slane %v6445_v14, 1  ;;  %5652 = vpow2.f32 %v1588_v57  ;;  %v5512_v57 = vld [vmem:[%s7447_s5 + $0x10] sm:$0xff]  }
 0x27a   :  { %v5643_v60 = vpop.eup %5642  ;;  %v4341_v31 = vadd.f32 -1.0, %v5641_v21  ;;  %v6454_v34 = vadd.f32 %v4982_v28, %v6407_v38  ;;  %v1388_v35 = vpop.f32.mrb[13].mxu1 }
 0x27b   :  { %v5645_v39 = vpop.eup %5644  ;;  %v4344_v56 = vadd.f32 -1.0, %v5643_v60  ;;  %v6458_v45 = vadd.f32 %v6407_v38, %v1388_v35  ;;  %v4983_v46 = vpop.f32.mrb[14].mxu1  ;;  %v1765_v1 = vsel %vm1208_vm7, %v1763_v29, %v1764_v37  ;;  %v1672_v51 = vsel %vm1544_vm8, %v6414_v54, %v4343_v2 }
 0x27c   :  { %v4342_v47 = vadd.f32 -1.0, %v5645_v39  ;;  %v1598_v48 = vmul.f32 1.442695, %v6454_v34  ;;  %v1391_v49 = vpop.f32.mrb[15].mxu1  ;;  %5016 = vmatprep.mubr.bf16.mxu0 %v1765_v1  ;;  %v1670_v61 = vsel %vm1542_vm9, %v6417_v40, %v4341_v31  ;;  %v6472_v53 = vadd.f32 %v4983_v46, %v6407_v38  ;;  %v5513_v39 = vld [vmem:[%s7447_s5 + $0x18] sm:$0xff]  }
 0x27d   :  { %v1673_v50 = vsel %vm1545_vm10, %v6421_v3, %v4344_v56  ;;  %v1594_v52 = vmul.f32 1.442695, %v6458_v45  ;;  %v6478_v0 = vadd.f32 %v6407_v38, %v1391_v49  ;;  %vm1552_vm0 = vcmp.gt.f32.partialorder %v6454_v34, 0.0 }
 0x27e   :  { %v6474_v22 = vpack.c.bf16 %v1673_v50, %v1672_v51  ;;  %v1671_v54 = vsel %vm1543_vm11, %v6425_v63, %v4342_v47  ;;  %5654 = vpow2.f32 %v1598_v48  ;;  %v1600_v40 = vmul.f32 1.442695, %v6472_v53 }
 0x27f   :  { %v6480_v26 = vpack.c.bf16 %v1671_v54, %v1670_v61  ;;  %5656 = vpow2.f32 %v1594_v52  ;;  %v1596_v3 = vmul.f32 1.442695, %v6478_v0  ;;  %vm1550_vm1 = vcmp.gt.f32.partialorder %v6458_v45, 0.0 }
 0x280   :  { %v5647_v4 = vpop.eup %5646  ;;  %v1768_v32 = vrot.slane %v6474_v22, 1  ;;  %5658 = vpow2.f32 %v1600_v40  ;;  %vm1553_vm2 = vcmp.gt.f32.partialorder %v6472_v53, 0.0  ;;  %vm1551_vm3 = vcmp.gt.f32.partialorder %v6478_v0, 0.0 }
 0x281   :  { %v5649_v5 = vpop.eup %5648  ;;  %v4986_v6 = vpop.f32.mrb[16].mxu1  ;;  %v1766_v7 = vrot.slane %v6480_v26, 1  ;;  %v4347_v63 = vadd.f32 -1.0, %v5647_v4  ;;  %5660 = vpow2.f32 %v1596_v3 }
 0x282   :  { %v6488_v10 = vadd.f32 %v4986_v6, %v6407_v38  ;;  %v1404_v13 = vpop.f32.mrb[17].mxu1  ;;  %v5651_v16 = vpop.eup %5650  ;;  %v4345_v30 = vadd.f32 -1.0, %v5649_v5 }
 0x283   :  { %v6494_v12 = vadd.f32 %v6407_v38, %v1404_v13  ;;  %v4987_v9 = vpop.f32.mrb[18].mxu1  ;;  %v1767_v59 = vsel %vm1208_vm7, %v1764_v37, %v1766_v7  ;;  %v1769_v44 = vsel %vm1208_vm7, %v1766_v7, %v1768_v32  ;;  %v5653_v41 = vpop.eup %5652  ;;  %v4348_v19 = vadd.f32 -1.0, %v5651_v16 }
 0x284   :  { %v1606_v23 = vmul.f32 1.442695, %v6488_v10  ;;  %v1407_v8 = vpop.f32.mrb[19].mxu1  ;;  %5017 = vmatmul.mubr.bf16.vlgmr.msra.gmra.mrb[32].mxu0 %v1767_v59  ;;  %v4346_v20 = vadd.f32 -1.0, %v5653_v41  ;;  %v6506_v25 = vadd.f32 %v4987_v9, %v6407_v38  ;;  %v1676_v11 = vsel %vm1548_vm12, %v6430_v33, %v4347_v63  ;;  %v5515_v41 = vld [vmem:[%s7447_s5 + $0x28] sm:$0xff]  }
 0x285   :  { %v1602_v24 = vmul.f32 1.442695, %v6494_v12  ;;  %5049 = vmatpush3.bf16.msra.mxu0 %v6401_v36  ;;  %5020 = vmatprep.mubr.bf16.mxu0 %v1769_v44  ;;  %v1677_v42 = vsel %vm1549_vm14, %v6438_v62, %v4348_v19  ;;  %v6514_v27 = vadd.f32 %v6407_v38, %v1407_v8  ;;  %v1674_v36 = vsel %vm1546_vm13, %v6433_v18, %v4345_v30 }
 0x286   :  { %5662 = vpow2.f32 %v1606_v23  ;;  %5050 = vmatprep.subr.bf16.mxu0 %v5511_v15  ;;  %v6522_v37 = vpack.c.bf16 %v1677_v42, %v1676_v11  ;;  %v1675_v21 = vsel %vm1547_vm15, %v6443_v55, %v4346_v20  ;;  %v1608_v2 = vmul.f32 1.442695, %v6506_v25 }
 0x287   :  { %5664 = vpow2.f32 %v1602_v24  ;;  %v6525_v62 = vpack.c.bf16 %v1675_v21, %v1674_v36  ;;  %v1604_v28 = vmul.f32 1.442695, %v6514_v27  ;;  %vm1556_vm4 = vcmp.gt.f32.partialorder %v6488_v10, 0.0 }
 0x288   :  { %v5655_v33 = vpop.eup %5654  ;;  %5666 = vpow2.f32 %v1608_v2  ;;  %v1772_v50 = vrot.slane %v6522_v37, 1  ;;  %vm1554_vm5 = vcmp.gt.f32.partialorder %v6494_v12, 0.0  ;;  %vm1557_vm6 = vcmp.gt.f32.partialorder %v6506_v25, 0.0 }
 0x289   :  { %v5657_v29 = vpop.eup %5656  ;;  %v4351_v60 = vadd.f32 -1.0, %v5655_v33  ;;  %v4990_v31 = vpop.f32.mrb[20].mxu1  ;;  %5051 = vmatpush3.bf16.msra.mxu0 %v5511_v15  ;;  %v1770_v35 = vrot.slane %v6525_v62, 1  ;;  %5668 = vpow2.f32 %v1604_v28  ;;  %vm1555_vm8 = vcmp.gt.f32.partialorder %v6514_v27, 0.0 }
 0x28a   :  { %v6532_v18 = vadd.f32 %v4990_v31, %v6407_v38  ;;  %v1420_v55 = vpop.f32.mrb[21].mxu1  ;;  %5052 = vmatprep.subr.bf16.mxu0 %v5512_v57  ;;  %v5659_v56 = vpop.eup %5658  ;;  %v4349_v46 = vadd.f32 -1.0, %v5657_v29 }
 0x28b   :  { %v6540_v1 = vadd.f32 %v6407_v38, %v1420_v55  ;;  %v4991_v51 = vpop.f32.mrb[22].mxu1  ;;  %v5661_v47 = vpop.eup %5660  ;;  %v4352_v48 = vadd.f32 -1.0, %v5659_v56  ;;  %v1680_v52 = vsel %vm1552_vm0, %v6454_v34, %v4351_v60  ;;  %v1771_v6 = vsel %vm1208_vm7, %v1768_v32, %v1770_v35  ;;  %v5514_v34 = vld [vmem:[%s7447_s5 + $0x20] sm:$0xff]  }
 0x28c   :  { %v1614_v49 = vmul.f32 1.442695, %v6532_v18  ;;  %v1423_v61 = vpop.f32.mrb[23].mxu1  ;;  %v4350_v54 = vadd.f32 -1.0, %v5661_v47  ;;  %v6550_v4 = vadd.f32 %v4991_v51, %v6407_v38  ;;  %v1678_v7 = vsel %vm1550_vm1, %v6458_v45, %v4349_v46  ;;  %5021 = vmatmul.mubr.bf16.gmra.mrb[36].mxu0 %v1771_v6 }
 0x28d   :  { %v1610_v40 = vmul.f32 1.442695, %v6540_v1  ;;  %5053 = vmatpush3.bf16.msra.mxu0 %v5512_v57  ;;  %v1681_v3 = vsel %vm1553_vm2, %v6472_v53, %v4352_v48  ;;  %v6554_v5 = vadd.f32 %v6407_v38, %v1423_v61  ;;  %v1773_v45 = vsel %vm1208_vm7, %v1770_v35, %v1772_v50 }
 0x28e   :  { %5670 = vpow2.f32 %v1614_v49  ;;  %5054 = vmatprep.subr.bf16.mxu0 %v5513_v39  ;;  %v6565_v63 = vpack.c.bf16 %v1681_v3, %v1680_v52  ;;  %v1679_v53 = vsel %vm1551_vm3, %v6478_v0, %v4350_v54  ;;  %v1616_v32 = vmul.f32 1.442695, %v6550_v4  ;;  %5024 = vmatprep.mubr.bf16.mxu0 %v1773_v45  ;;  %v5517_v3 = vld [vmem:[%s7447_s5 + $0x38] sm:$0xff]  }
 0x28f   :  { %5672 = vpow2.f32 %v1610_v40  ;;  %v6570_v15 = vpack.c.bf16 %v1679_v53, %v1678_v7  ;;  %v1612_v16 = vmul.f32 1.442695, %v6554_v5  ;;  %vm1560_vm9 = vcmp.gt.f32.partialorder %v6532_v18, 0.0 }
 0x290   :  { %v5663_v13 = vpop.eup %5662  ;;  %5674 = vpow2.f32 %v1616_v32  ;;  %v1776_v28 = vrot.slane %v6565_v63, 1  ;;  %vm1558_vm10 = vcmp.gt.f32.partialorder %v6540_v1, 0.0  ;;  %vm1561_vm11 = vcmp.gt.f32.partialorder %v6550_v4, 0.0 }
 0x291   :  { %v5665_v30 = vpop.eup %5664  ;;  %v4994_v9 = vpop.f32.mrb[24].mxu1  ;;  %5055 = vmatpush3.bf16.msra.mxu0 %v5513_v39  ;;  %v4355_v59 = vadd.f32 -1.0, %v5663_v13  ;;  %5676 = vpow2.f32 %v1612_v16  ;;  %v1774_v57 = vrot.slane %v6570_v15, 1  ;;  %vm1559_vm12 = vcmp.gt.f32.partialorder %v6554_v5, 0.0 }
 0x292   :  { %v6580_v0 = vadd.f32 %v4994_v9, %v6407_v38  ;;  %v1436_v44 = vpop.f32.mrb[25].mxu1  ;;  %5056 = vmatprep.subr.bf16.mxu0 %v5514_v34  ;;  %v4353_v19 = vadd.f32 -1.0, %v5665_v30  ;;  %v5667_v20 = vpop.eup %5666 }
 0x293   :  { %v6587_v23 = vadd.f32 %v6407_v38, %v1436_v44  ;;  %v4995_v8 = vpop.f32.mrb[26].mxu1  ;;  %v5669_v36 = vpop.eup %5668  ;;  %v4356_v21 = vadd.f32 -1.0, %v5667_v20  ;;  %v1684_v29 = vsel %vm1556_vm4, %v6488_v10, %v4355_v59  ;;  %v5516_v10 = vld [vmem:[%s7447_s5 + $0x30] sm:$0xff]   ;;  %v1777_v48 = vsel %vm1208_vm7, %v1774_v57, %v1776_v28 }
 0x294   :  { %v1622_v24 = vmul.f32 1.442695, %v6580_v0  ;;  %v6592_v11 = vadd.f32 %v4995_v8, %v6407_v38  ;;  %v1439_v42 = vpop.f32.mrb[27].mxu1  ;;  %v4354_v60 = vadd.f32 -1.0, %v5669_v36  ;;  %v1682_v55 = vsel %vm1554_vm5, %v6494_v12, %v4353_v19 }
 0x295   :  { %v1618_v33 = vmul.f32 1.442695, %v6587_v23  ;;  %v6597_v2 = vadd.f32 %v6407_v38, %v1439_v42  ;;  %5057 = vmatpush3.bf16.msra.mxu0 %v5514_v34  ;;  %v1685_v35 = vsel %vm1557_vm6, %v6506_v25, %v4356_v21  ;;  %v1775_v12 = vsel %vm1208_vm7, %v1772_v50, %v1774_v57 }
 0x296   :  { %5678 = vpow2.f32 %v1622_v24  ;;  %v1624_v31 = vmul.f32 1.442695, %v6592_v11  ;;  %5058 = vmatprep.subr.bf16.mxu0 %v5515_v41  ;;  %v6614_v46 = vpack.c.bf16 %v1685_v35, %v1684_v29  ;;  %v1683_v51 = vsel %vm1555_vm8, %v6514_v27, %v4354_v60  ;;  %5025 = vmatmul.mubr.bf16.gmra.mrb[40].mxu0 %v1775_v12 }
 0x297   :  { %5680 = vpow2.f32 %v1618_v33  ;;  %v1620_v39 = vmul.f32 1.442695, %v6597_v2  ;;  %v6622_v47 = vpack.c.bf16 %v1683_v51, %v1682_v55  ;;  %5028 = vmatprep.mubr.bf16.mxu0 %v1777_v48  ;;  %vm1564_vm13 = vcmp.gt.f32.partialorder %v6580_v0, 0.0 }
 0x298   :  { %v5671_v56 = vpop.eup %5670  ;;  %5682 = vpow2.f32 %v1624_v31  ;;  %v1780_v9 = vrot.slane %v6614_v46, 1  ;;  %vm1565_vm14 = vcmp.gt.f32.partialorder %v6592_v11, 0.0  ;;  %vm1562_vm15 = vcmp.gt.f32.partialorder %v6587_v23, 0.0 }
 0x299   :  { %v5673_v25 = vpop.eup %5672  ;;  %5684 = vpow2.f32 %v1620_v39  ;;  %v4998_v49 = vpop.f32.mrb[28].mxu1  ;;  %v4359_v61 = vadd.f32 -1.0, %v5671_v56  ;;  %5059 = vmatpush3.bf16.msra.mxu0 %v5515_v41  ;;  %v1778_v13 = vrot.slane %v6622_v47, 1  ;;  %vm1563_vm0 = vcmp.gt.f32.partialorder %v6597_v2, 0.0 }
 0x29a   :  { %v6629_v27 = vadd.f32 %v4998_v49, %v6407_v38  ;;  %v1452_v52 = vpop.f32.mrb[29].mxu1  ;;  %v4357_v50 = vadd.f32 -1.0, %v5673_v25  ;;  %5060 = vmatprep.subr.bf16.mxu0 %v5516_v10  ;;  %v5675_v6 = vpop.eup %5674 }
 0x29b   :  { %v6634_v54 = vadd.f32 %v6407_v38, %v1452_v52  ;;  %v4999_v40 = vpop.f32.mrb[30].mxu1  ;;  %v5677_v32 = vpop.eup %5676  ;;  %v4360_v16 = vadd.f32 -1.0, %v5675_v6  ;;  %v1688_v59 = vsel %vm1560_vm9, %v6532_v18, %v4359_v61  ;;  %v6664_v18 = vld [vmem:[%s7447_s5 + $0x80] sm:$0xff]   ;;  %v1781_v21 = vsel %vm1208_vm7, %v1778_v13, %v1780_v9 }
 0x29c   :  { %v1630_v34 = vmul.f32 1.442695, %v6629_v27  ;;  %v6642_v7 = vadd.f32 %v4999_v40, %v6407_v38  ;;  %v1455_v53 = vpop.f32.mrb[31].mxu1  ;;  %v4358_v44 = vadd.f32 -1.0, %v5677_v32  ;;  %v1686_v19 = vsel %vm1558_vm10, %v6540_v1, %v4357_v50 }
 0x29d   :  { %v1626_v30 = vmul.f32 1.442695, %v6634_v54  ;;  %v6647_v45 = vadd.f32 %v6407_v38, %v1455_v53  ;;  %5061 = vmatpush3.bf16.msra.mxu0 %v5516_v10  ;;  %v1689_v38 = vsel %vm1561_vm11, %v6550_v4, %v4360_v16  ;;  %v1779_v4 = vsel %vm1208_vm7, %v1776_v28, %v1778_v13 }
 0x29e   :  { %5686 = vpow2.f32 %v1630_v34  ;;  %v1632_v41 = vmul.f32 1.442695, %v6642_v7  ;;  %5062 = vmatprep.subr.bf16.mxu0 %v5517_v3  ;;  %v6666_v24 = vpack.c.bf16 %v1689_v38, %v1688_v59  ;;  %v1687_v1 = vsel %vm1559_vm12, %v6554_v5, %v4358_v44  ;;  %5029 = vmatmul.mubr.bf16.gmra.mrb[44].mxu0 %v1779_v4  ;;  %v5526_v44 = vld [vmem:[%s7449_s7 + $0x40] sm:$0xff]   ;;  %v5530_v38 = vld [vmem:[%s7449_s7 + $0x58] sm:$0xff]   ;;  %v5524_v4 = vld [vmem:[%s7447_s5 + $0xb0] sm:$0xff]  }
 0x29f   :  { %5688 = vpow2.f32 %v1626_v30  ;;  %v1628_v8 = vmul.f32 1.442695, %v6647_v45  ;;  %v6674_v57 = vpack.c.bf16 %v1687_v1, %v1686_v19  ;;  %5032 = vmatprep.mubr.bf16.mxu0 %v1781_v21  ;;  %vm1568_vm1 = vcmp.gt.f32.partialorder %v6629_v27, 0.0  ;;  %5144 = vmatprep.subr.bf16.mxu1 %v5526_v44  ;;  %v5519_v19 = vld [vmem:[%s7447_s5 + $0x88] sm:$0xff]   ;;  %v5522_v1 = vld [vmem:[%s7447_s5 + $0xa0] sm:$0xff]  }
 0x2a0   :  { %v5679_v20 = vpop.eup %5678  ;;  %5690 = vpow2.f32 %v1632_v41  ;;  %v1784_v55 = vrot.slane %v6666_v24, 1  ;;  %vm1569_vm2 = vcmp.gt.f32.partialorder %v6642_v7, 0.0  ;;  %vm1566_vm3 = vcmp.gt.f32.partialorder %v6634_v54, 0.0  ;;  %v5527_v41 = vld [vmem:[%s7449_s7 + $0x48] sm:$0xff]   ;;  %5145 = vmatpush3.bf16.msra.mxu1 %v5526_v44 }
 0x2a1   :  { %v5681_v42 = vpop.eup %5680  ;;  %v4363_v36 = vadd.f32 -1.0, %v5679_v20  ;;  %5692 = vpow2.f32 %v1628_v8  ;;  %5063 = vmatpush3.bf16.msra.mxu0 %v5517_v3  ;;  %v1782_v5 = vrot.slane %v6674_v57, 1  ;;  %vm1567_vm4 = vcmp.gt.f32.partialorder %v6647_v45, 0.0  ;;  %5146 = vmatprep.subr.bf16.mxu1 %v5527_v41  ;;  %v5520_v8 = vld [vmem:[%s7447_s5 + $0x90] sm:$0xff]   ;;  %v5521_v20 = vld [vmem:[%s7447_s5 + $0x98] sm:$0xff]  }
 0x2a2   :  { %v5683_v33 = vpop.eup %5682  ;;  %v4361_v29 = vadd.f32 -1.0, %v5681_v42  ;;  %5096 = vmatprep.subr.bf16.mxu0 %v6664_v18  ;;  %v5525_v42 = vld [vmem:[%s7447_s5 + $0xb8] sm:$0xff]   ;;  %v2247_v21 = vrot.slane %v6445_v14, 2 }
 0x2a3   :  { %v5685_v60 = vpop.eup %5684  ;;  %v4364_v31 = vadd.f32 -1.0, %v5683_v33  ;;  %v1692_v35 = vsel %vm1564_vm13, %v6580_v0, %v4363_v36  ;;  %v1783_v12 = vsel %vm1208_vm7, %v1780_v9, %v1782_v5  ;;  %v1785_v48 = vsel %vm1208_vm7, %v1782_v5, %v1784_v55  ;;  %v5529_v36 = vld [vmem:[%s7449_s7] sm:$0xff]   ;;  %v5531_v5 = vld [vmem:[%s7449_s7 + $0x8] sm:$0xff]  }
 0x2a4   :  { %v4362_v28 = vadd.f32 -1.0, %v5685_v60  ;;  %v1690_v10 = vsel %vm1562_vm15, %v6587_v23, %v4361_v29  ;;  %5147 = vmatpush3.bf16.msra.mxu1 %v5527_v41  ;;  %v2248_v33 = vrot.slane %v6440_v58, 2  ;;  %v2250_v60 = vrot.slane %v6480_v26, 2 }
 0x2a5   :  { %v1693_v39 = vsel %vm1565_vm14, %v6592_v11, %v4364_v31  ;;  %v2252_v31 = vrot.slane %v6474_v22, 2  ;;  %vm3284_vm13 = vcmask 1043456  }
 0x2a6   :  { %v6687_v56 = vpack.c.bf16 %v1693_v39, %v1692_v35  ;;  %v1691_v51 = vsel %vm1563_vm0, %v6597_v2, %v4362_v28  ;;  %5033 = vmatmul.mubr.bf16.gmra.mrb[48].mxu0 %v1783_v12  ;;  %v2256_v28 = vrot.slane %v6522_v37, 2  ;;  %v2258_v35 = vrot.slane %v6570_v15, 2 }
 0x2a7   :  { %v6691_v25 = vpack.c.bf16 %v1691_v51, %v1690_v10  ;;  %5036 = vmatprep.mubr.bf16.mxu0 %v1785_v48  ;;  %v2260_v39 = vrot.slane %v6565_v63, 2 }
 0x2a8   :  { %v5687_v49 = vpop.eup %5686  ;;  %v1788_v3 = vrot.slane %v6687_v56, 1 }
 0x2a9   :  { %v5689_v0 = vpop.eup %5688  ;;  %v4367_v61 = vadd.f32 -1.0, %v5687_v49  ;;  %v1786_v50 = vrot.slane %v6691_v25, 1 }
 0x2aa   :  { %v5691_v52 = vpop.eup %5690  ;;  %v4365_v11 = vadd.f32 -1.0, %v5689_v0 }
 0x2ab   :  { %v5693_v23 = vpop.eup %5692  ;;  %v4368_v40 = vadd.f32 -1.0, %v5691_v52  ;;  %v1696_v6 = vsel %vm1568_vm1, %v6629_v27, %v4367_v61  ;;  %v1787_v16 = vsel %vm1208_vm7, %v1784_v55, %v1786_v50  ;;  %v1789_v9 = vsel %vm1208_vm7, %v1786_v50, %v1788_v3 }
 0x2ac   :  { %v4366_v2 = vadd.f32 -1.0, %v5693_v23  ;;  %v1694_v53 = vsel %vm1566_vm3, %v6634_v54, %v4365_v11  ;;  %v5532_v23 = vld [vmem:[%s7449_s7 + $0x10] sm:$0xff]  }
 0x2ad   :  { %v1697_v34 = vsel %vm1569_vm2, %v6642_v7, %v4368_v40  ;;  %v5533_v40 = vld [vmem:[%s7449_s7 + $0x60] sm:$0xff]  }
 0x2ae   :  { %v6703_v13 = vpack.c.bf16 %v1697_v34, %v1696_v6  ;;  %v1695_v32 = vsel %vm1567_vm4, %v6647_v45, %v4366_v2  ;;  %5037 = vmatmul.mubr.bf16.gmra.mrb[52].mxu0 %v1787_v16  ;;  %v5535_v2 = vld [vmem:[%s7449_s7 + $0x20] sm:$0xff]   ;;  %v5536_v6 = vld [vmem:[%s7449_s7 + $0x68] sm:$0xff]   ;;  %v5541_v16 = vld [vmem:[%s7449_s7 + $0x78] sm:$0xff]  }
 0x2af   :  { %v6707_v30 = vpack.c.bf16 %v1695_v32, %v1694_v53  ;;  %5040 = vmatprep.mubr.bf16.mxu0 %v1789_v9  ;;  %v5537_v34 = vld [vmem:[%s7449_s7 + $0x28] sm:$0xff]   ;;  %v5538_v53 = vld [vmem:[%s7449_s7 + $0x30] sm:$0xff]   ;;  %v5540_v32 = vld [vmem:[%s7449_s7 + $0x38] sm:$0xff]  }
 0x2b0   :  { %v1792_v7 = vrot.slane %v6703_v13, 1  ;;  %v6847_v9 = vld [vmem:[%s7450_s6] ss:$0 sm:$0xff] }
 0x2b1   :  { %v1790_v27 = vrot.slane %v6707_v30, 1 }
 0x2b2   :  { %v1794_v45 = vsel %vm1208_vm7, %v1792_v7, %v6299_v43  ;;  %v5528_v43 = vld [vmem:[%s7449_s7 + $0x50] sm:$0xff]  }
 0x2b3   :  { %v1791_v59 = vsel %vm1208_vm7, %v1788_v3, %v1790_v27  ;;  %v1793_v54 = vsel %vm1208_vm7, %v1790_v27, %v1792_v7  ;;  %5148 = vmatprep.subr.bf16.mxu1 %v5528_v43  ;;  %vm2246_vm7 = vcmask 1045504   ;;  %v5534_v3 = vld [vmem:[%s7449_s7 + $0x18] sm:$0xff]  }
 0x2b4   :  { %5149 = vmatpush3.bf16.msra.mxu1 %v5528_v43  ;;  %v2249_v29 = vsel %vm2246_vm7, %v2247_v21, %v2248_v33  ;;  %v2251_v55 = vsel %vm2246_vm7, %v2248_v33, %v2250_v60  ;;  %v2259_v10 = vsel %vm2246_vm7, %v2256_v28, %v2258_v35  ;;  %v2261_v51 = vsel %vm2246_vm7, %v2258_v35, %v2260_v39 }
 0x2b5   :  { %5150 = vmatprep.subr.bf16.mxu1 %v5530_v38 }
 0x2b6   :  { %5041 = vmatmul.mubr.bf16.gmra.mrb[56].mxu0 %v1791_v59 }
 0x2b7   :  { %5044 = vmatprep.mubr.bf16.mxu0 %v1793_v54 }
 0x2b8   :  { %5151 = vmatpush3.bf16.msra.mxu1 %v5530_v38 }
 0x2b9   :  { %5152 = vmatprep.subr.bf16.mxu1 %v5533_v40 }
 0x2bc   :  { %5153 = vmatpush3.bf16.msra.mxu1 %v5533_v40 }
 0x2bd   :  { %5154 = vmatprep.subr.bf16.mxu1 %v5536_v6 }
 0x2be   :  { %5045 = vmatmul.mubr.bf16.gmra.mrb[60].mxu0 %v1794_v45 }
 0x2bf   :  { %5064 = vmatprep.mubr.bf16.mxu0 %v6445_v14  ;;  %v2253_v14 = vsel %vm2246_vm7, %v2250_v60, %v2252_v31 }
 0x2c0   :  { %5155 = vmatpush3.bf16.msra.mxu1 %v5536_v6 }
 0x2c6   :  { %5065 = vmatmul.mubr.bf16.vlgmr.msra.gmra.mrb[32].mxu0 %v6440_v58  ;;  %v2254_v58 = vrot.slane %v6525_v62, 2 }
 0x2c7   :  { %5097 = vmatpush3.bf16.msra.mxu0 %v6664_v18  ;;  %5068 = vmatprep.mubr.bf16.mxu0 %v6480_v26  ;;  %v5523_v18 = vld [vmem:[%s7447_s5 + $0xa8] sm:$0xff]  }
 0x2c8   :  { %5098 = vmatprep.subr.bf16.mxu0 %v5519_v19  ;;  %v2255_v26 = vsel %vm2246_vm7, %v2252_v31, %v2254_v58 }
 0x2cb   :  { %5099 = vmatpush3.bf16.msra.mxu0 %v5519_v19 }
 0x2cc   :  { %5100 = vmatprep.subr.bf16.mxu0 %v5520_v8 }
 0x2ce   :  { %5069 = vmatmul.mubr.bf16.gmra.mrb[36].mxu0 %v6474_v22  ;;  %v2257_v22 = vsel %vm2246_vm7, %v2254_v58, %v2256_v28 }
 0x2cf   :  { %5072 = vmatprep.mubr.bf16.mxu0 %v6525_v62  ;;  %5101 = vmatpush3.bf16.msra.mxu0 %v5520_v8  ;;  %v2262_v62 = vrot.slane %v6622_v47, 2 }
 0x2d0   :  { %5102 = vmatprep.subr.bf16.mxu0 %v5521_v20 }
 0x2d1   :  { %v2263_v12 = vsel %vm2246_vm7, %v2260_v39, %v2262_v62 }
 0x2d3   :  { %5103 = vmatpush3.bf16.msra.mxu0 %v5521_v20 }
 0x2d4   :  { %5104 = vmatprep.subr.bf16.mxu0 %v5522_v1 }
 0x2d6   :  { %5073 = vmatmul.mubr.bf16.gmra.mrb[40].mxu0 %v6522_v37  ;;  %v2264_v37 = vrot.slane %v6614_v46, 2 }
 0x2d7   :  { %5076 = vmatprep.mubr.bf16.mxu0 %v6570_v15  ;;  %5105 = vmatpush3.bf16.msra.mxu0 %v5522_v1  ;;  %v2266_v15 = vrot.slane %v6674_v57, 2 }
 0x2d8   :  { %5106 = vmatprep.subr.bf16.mxu0 %v5523_v18  ;;  %v2265_v48 = vsel %vm2246_vm7, %v2262_v62, %v2264_v37 }
 0x2d9   :  { %v2267_v49 = vsel %vm2246_vm7, %v2264_v37, %v2266_v15 }
 0x2db   :  { %5107 = vmatpush3.bf16.msra.mxu0 %v5523_v18 }
 0x2dc   :  { %5108 = vmatprep.subr.bf16.mxu0 %v5524_v4 }
 0x2de   :  { %5077 = vmatmul.mubr.bf16.gmra.mrb[44].mxu0 %v6565_v63  ;;  %v2268_v63 = vrot.slane %v6666_v24, 2 }
 0x2df   :  { %5080 = vmatprep.mubr.bf16.mxu0 %v6622_v47  ;;  %5109 = vmatpush3.bf16.msra.mxu0 %v5524_v4  ;;  %v2270_v47 = vrot.slane %v6691_v25, 2 }
 0x2e0   :  { %5110 = vmatprep.subr.bf16.mxu0 %v5525_v42  ;;  %v2269_v0 = vsel %vm2246_vm7, %v2266_v15, %v2268_v63 }
 0x2e1   :  { %v2271_v61 = vsel %vm2246_vm7, %v2268_v63, %v2270_v47 }
 0x2e3   :  { %5111 = vmatpush3.bf16.msra.mxu0 %v5525_v42 }
 0x2e4   :  { %5192 = vmatprep.subr.bf16.mxu0 %v5529_v36 }
 0x2e6   :  { %5081 = vmatmul.mubr.bf16.gmra.mrb[48].mxu0 %v6614_v46  ;;  %v2272_v46 = vrot.slane %v6687_v56, 2 }
 0x2e7   :  { %5084 = vmatprep.mubr.bf16.mxu0 %v6674_v57  ;;  %v2274_v57 = vrot.slane %v6707_v30, 2 }
 0x2e8   :  { %v2273_v52 = vsel %vm2246_vm7, %v2270_v47, %v2272_v46 }
 0x2e9   :  { %v2275_v11 = vsel %vm2246_vm7, %v2272_v46, %v2274_v57 }
 0x2ee   :  { %5085 = vmatmul.mubr.bf16.gmra.mrb[52].mxu0 %v6666_v24  ;;  %v2276_v24 = vrot.slane %v6703_v13, 2 }
 0x2ef   :  { %5088 = vmatprep.mubr.bf16.mxu0 %v6691_v25  ;;  %v6804_v25 = vrot.slane %v5790_v17, 2 }
 0x2f0   :  { %v2277_v50 = vsel %vm2246_vm7, %v2274_v57, %v2276_v24 }
 0x2f6   :  { %5089 = vmatmul.mubr.bf16.gmra.mrb[56].mxu0 %v6687_v56  ;;  %v2279_v56 = vsel %vm2246_vm7, %v2276_v24, %v6804_v25 }
 0x2f7   :  { %5092 = vmatprep.mubr.bf16.mxu0 %v6707_v30  ;;  %v6841_v30 = vld [vmem:[%s7449_s7 + $0x80] sm:$0xff]  }
 0x2fe   :  { %5093 = vmatmul.mubr.bf16.gmra.mrb[60].mxu0 %v6703_v13  ;;  %v5539_v13 = vld [vmem:[%s7449_s7 + $0x70] sm:$0xff]  }
 0x2ff   :  { %5112 = vmatprep.mubr.bf16.mxu0 %v2249_v29  ;;  %5156 = vmatprep.subr.bf16.mxu1 %v5539_v13 }
 0x300   :  { %5157 = vmatpush3.bf16.msra.mxu1 %v5539_v13 }
 0x301   :  { %5158 = vmatprep.subr.bf16.mxu1 %v5541_v16 }
 0x304   :  { %5159 = vmatpush3.bf16.msra.mxu1 %v5541_v16 }
 0x305   :  { %5240 = vmatprep.subr.bf16.mxu1 %v6841_v30 }
 0x306   :  { %5113 = vmatmul.mubr.bf16.vlgmr.msra.gmra.mrb[32].mxu0 %v2251_v55 }
 0x307   :  { %5116 = vmatprep.mubr.bf16.mxu0 %v2253_v14  ;;  %5193 = vmatpush3.bf16.msra.mxu0 %v5529_v36 }
 0x308   :  { %5194 = vmatprep.subr.bf16.mxu0 %v5531_v5 }
 0x30b   :  { %5195 = vmatpush3.bf16.msra.mxu0 %v5531_v5 }
 0x30c   :  { %5196 = vmatprep.subr.bf16.mxu0 %v5532_v23 }
 0x30e   :  { %5117 = vmatmul.mubr.bf16.gmra.mrb[36].mxu0 %v2255_v26 }
 0x30f   :  { %5120 = vmatprep.mubr.bf16.mxu0 %v2257_v22  ;;  %5197 = vmatpush3.bf16.msra.mxu0 %v5532_v23 }
 0x310   :  { %5198 = vmatprep.subr.bf16.mxu0 %v5534_v3 }
 0x313   :  { %5199 = vmatpush3.bf16.msra.mxu0 %v5534_v3 }
 0x314   :  { %5200 = vmatprep.subr.bf16.mxu0 %v5535_v2 }
 0x316   :  { %5121 = vmatmul.mubr.bf16.gmra.mrb[40].mxu0 %v2259_v10 }
 0x317   :  { %5124 = vmatprep.mubr.bf16.mxu0 %v2261_v51  ;;  %5201 = vmatpush3.bf16.msra.mxu0 %v5535_v2 }
 0x318   :  { %5202 = vmatprep.subr.bf16.mxu0 %v5537_v34 }
 0x31b   :  { %5203 = vmatpush3.bf16.msra.mxu0 %v5537_v34 }
 0x31c   :  { %5204 = vmatprep.subr.bf16.mxu0 %v5538_v53 }
 0x31e   :  { %5125 = vmatmul.mubr.bf16.gmra.mrb[44].mxu0 %v2263_v12 }
 0x31f   :  { %5128 = vmatprep.mubr.bf16.mxu0 %v2265_v48  ;;  %5205 = vmatpush3.bf16.msra.mxu0 %v5538_v53 }
 0x320   :  { %5206 = vmatprep.subr.bf16.mxu0 %v5540_v32 }
 0x323   :  { %5207 = vmatpush3.bf16.msra.mxu0 %v5540_v32 }
 0x326   :  { %5129 = vmatmul.mubr.bf16.gmra.mrb[48].mxu0 %v2267_v49 }
 0x327   :  { %5132 = vmatprep.mubr.bf16.mxu0 %v2269_v0 }
 0x32e   :  { %5133 = vmatmul.mubr.bf16.gmra.mrb[52].mxu0 %v2271_v61 }
 0x32f   :  { %5136 = vmatprep.mubr.bf16.mxu0 %v2273_v52 }
 0x336   :  { %5137 = vmatmul.mubr.bf16.gmra.mrb[56].mxu0 %v2275_v11 }
 0x337   :  { %5140 = vmatprep.mubr.bf16.mxu0 %v2277_v50 }
 0x33e   :  { %5141 = vmatmul.mubr.bf16.gmra.mrb[60].mxu0 %v2279_v56 }
 0x3d9   :  { %v5114_v27 = vpop.f32.mrb[32].mxu0 }
 0x3da   :  { %v2546_v7 = vadd.f32 %v5114_v27, %v6847_v9  ;;  %v2378_v59 = vpop.f32.mrb[33].mxu0 }
 0x3db   :  { %v2544_v54 = vadd.f32 %v6847_v9, %v2378_v59  ;;  %v5115_v45 = vpop.f32.mrb[34].mxu0 }
 0x3dc   :  { %v2612_v44 = vmul.f32 1.442695, %v2546_v7  ;;  %v2547_v41 = vadd.f32 %v5115_v45, %v6847_v9  ;;  %v2381_v19 = vpop.f32.mrb[35].mxu0  ;;  %vm2578_vm5 = vcmp.gt.f32.partialorder %v2546_v7, 0.0 }
 0x3dd   :  { %v2608_v43 = vmul.f32 1.442695, %v2544_v54  ;;  %v2545_v38 = vadd.f32 %v6847_v9, %v2381_v19  ;;  %vm2576_vm8 = vcmp.gt.f32.partialorder %v2544_v54, 0.0 }
 0x3de   :  { %5694 = vpow2.f32 %v2612_v44  ;;  %v2614_v8 = vmul.f32 1.442695, %v2547_v41  ;;  %vm2579_vm6 = vcmp.gt.f32.partialorder %v2547_v41, 0.0 }
 0x3df   :  { %5696 = vpow2.f32 %v2608_v43  ;;  %v2610_v20 = vmul.f32 1.442695, %v2545_v38  ;;  %vm2577_vm9 = vcmp.gt.f32.partialorder %v2545_v38, 0.0 }
 0x3e0   :  { %5698 = vpow2.f32 %v2614_v8 }
 0x3e1   :  { %5700 = vpow2.f32 %v2610_v20  ;;  %v5118_v1 = vpop.f32.mrb[36].mxu0 }
 0x3e2   :  { %v6854_v18 = vadd.f32 %v5118_v1, %v6847_v9  ;;  %v2394_v4 = vpop.f32.mrb[37].mxu0 }
 0x3e3   :  { %v6857_v42 = vadd.f32 %v6847_v9, %v2394_v4  ;;  %v5119_v36 = vpop.f32.mrb[38].mxu0 }
 0x3e4   :  { %v2620_v21 = vmul.f32 1.442695, %v6854_v18  ;;  %v6861_v33 = vadd.f32 %v5119_v36, %v6847_v9  ;;  %v2397_v29 = vpop.f32.mrb[39].mxu0  ;;  %vm2582_vm10 = vcmp.gt.f32.partialorder %v6854_v18, 0.0 }
 0x3e5   :  { %v2616_v60 = vmul.f32 1.442695, %v6857_v42  ;;  %v6865_v31 = vadd.f32 %v6847_v9, %v2397_v29  ;;  %vm2580_vm11 = vcmp.gt.f32.partialorder %v6857_v42, 0.0 }
 0x3e6   :  { %5702 = vpow2.f32 %v2620_v21  ;;  %v2622_v5 = vmul.f32 1.442695, %v6861_v33  ;;  %vm2583_vm12 = vcmp.gt.f32.partialorder %v6861_v33, 0.0 }
 0x3e7   :  { %5704 = vpow2.f32 %v2616_v60  ;;  %v2618_v55 = vmul.f32 1.442695, %v6865_v31  ;;  %vm2581_vm14 = vcmp.gt.f32.partialorder %v6865_v31, 0.0 }
 0x3e8   :  { %v5695_v14 = vpop.eup %5694  ;;  %5706 = vpow2.f32 %v2622_v5 }
 0x3e9   :  { %v5697_v58 = vpop.eup %5696  ;;  %v4428_v28 = vadd.f32 -1.0, %v5695_v14  ;;  %5708 = vpow2.f32 %v2618_v55  ;;  %v5122_v26 = vpop.f32.mrb[40].mxu0 }
 0x3ea   :  { %v5699_v22 = vpop.eup %5698  ;;  %v6870_v35 = vadd.f32 %v5122_v26, %v6847_v9  ;;  %v2410_v39 = vpop.f32.mrb[41].mxu0  ;;  %v4426_v12 = vadd.f32 -1.0, %v5697_v58 }
 0x3eb   :  { %v5701_v10 = vpop.eup %5700  ;;  %v4429_v51 = vadd.f32 -1.0, %v5699_v22  ;;  %v6873_v62 = vadd.f32 %v6847_v9, %v2410_v39  ;;  %v5123_v37 = vpop.f32.mrb[42].mxu0  ;;  %v2706_v0 = vsel %vm2578_vm5, %v2546_v7, %v4428_v28 }
 0x3ec   :  { %v4427_v48 = vadd.f32 -1.0, %v5701_v10  ;;  %v2628_v15 = vmul.f32 1.442695, %v6870_v35  ;;  %v6877_v63 = vadd.f32 %v5123_v37, %v6847_v9  ;;  %v2413_v49 = vpop.f32.mrb[43].mxu0  ;;  %v2704_v50 = vsel %vm2576_vm8, %v2544_v54, %v4426_v12 }
 0x3ed   :  { %v2707_v47 = vsel %vm2579_vm6, %v2547_v41, %v4429_v51  ;;  %v2624_v46 = vmul.f32 1.442695, %v6873_v62  ;;  %v6881_v61 = vadd.f32 %v6847_v9, %v2413_v49  ;;  %vm2586_vm15 = vcmp.gt.f32.partialorder %v6870_v35, 0.0 }
 0x3ee   :  { %v6883_v52 = vpack.c.bf16 %v2707_v47, %v2706_v0  ;;  %5710 = vpow2.f32 %v2628_v15  ;;  %v2630_v57 = vmul.f32 1.442695, %v6877_v63  ;;  %v2705_v56 = vsel %vm2577_vm9, %v2545_v38, %v4427_v48 }
 0x3ef   :  { %5712 = vpow2.f32 %v2624_v46  ;;  %v2626_v24 = vmul.f32 1.442695, %v6881_v61  ;;  %v6887_v3 = vpack.c.bf16 %v2705_v56, %v2704_v50  ;;  %vm2584_vm0 = vcmp.gt.f32.partialorder %v6873_v62, 0.0  ;;  %v5543_v46 = vld [vmem:[%s7449_s7 + $0x88] sm:$0xff]  }
 0x3f0   :  { %v5703_v11 = vpop.eup %5702  ;;  %5714 = vpow2.f32 %v2630_v57  ;;  %v2802_v2 = vrot.slane %v6883_v52, 2  ;;  %vm2587_vm1 = vcmp.gt.f32.partialorder %v6877_v63, 0.0  ;;  %v3286_v26 = vrot.slane %v6883_v52, 4 }
 0x3f1   :  { %v5705_v23 = vpop.eup %5704  ;;  %5716 = vpow2.f32 %v2626_v24  ;;  %v5126_v40 = vpop.f32.mrb[44].mxu0  ;;  %v4432_v32 = vadd.f32 -1.0, %v5703_v11  ;;  %5208 = vmatprep.mubr.bf16.mxu0 %v6887_v3  ;;  %v2801_v59 = vrot.slane %v6887_v3, 2  ;;  %vm2585_vm2 = vcmp.gt.f32.partialorder %v6881_v61, 0.0 }
 0x3f2   :  { %v5707_v6 = vpop.eup %5706  ;;  %v6893_v34 = vadd.f32 %v5126_v40, %v6847_v9  ;;  %v2426_v53 = vpop.f32.mrb[45].mxu0  ;;  %v4430_v16 = vadd.f32 -1.0, %v5705_v23  ;;  %5209 = vmatmul.mubr.bf16.vlgmr.msra.gmra.mrb[64].mxu0 %v6883_v52 }
 0x3f3   :  { %v5709_v13 = vpop.eup %5708  ;;  %v6897_v27 = vadd.f32 %v6847_v9, %v2426_v53  ;;  %v5127_v7 = vpop.f32.mrb[46].mxu0  ;;  %v4433_v54 = vadd.f32 -1.0, %v5707_v6  ;;  %v2803_v8 = vsel %vm2246_vm7, %v2801_v59, %v2802_v2  ;;  %v2710_v60 = vsel %vm2582_vm10, %v6854_v18, %v4432_v32 }
 0x3f4   :  { %v4431_v45 = vadd.f32 -1.0, %v5709_v13  ;;  %v2636_v44 = vmul.f32 1.442695, %v6893_v34  ;;  %v6903_v41 = vadd.f32 %v5127_v7, %v6847_v9  ;;  %v2429_v19 = vpop.f32.mrb[47].mxu0  ;;  %5160 = vmatprep.mubr.bf16.mxu1 %v2803_v8  ;;  %v2708_v4 = vsel %vm2580_vm11, %v6857_v42, %v4430_v16 }
 0x3f5   :  { %v2632_v43 = vmul.f32 1.442695, %v6897_v27  ;;  %v6908_v38 = vadd.f32 %v6847_v9, %v2429_v19  ;;  %v2711_v5 = vsel %vm2583_vm12, %v6861_v33, %v4433_v54  ;;  %v3285_v33 = vrot.slane %v6887_v3, 4 }
 0x3f6   :  { %5718 = vpow2.f32 %v2636_v44  ;;  %v2638_v20 = vmul.f32 1.442695, %v6903_v41  ;;  %v2709_v36 = vsel %vm2581_vm14, %v6865_v31, %v4431_v45  ;;  %v6931_v31 = vpack.c.bf16 %v2711_v5, %v2710_v60  ;;  %v5545_v5 = vld [vmem:[%s7449_s7 + $0x98] sm:$0xff]  }
 0x3f7   :  { %5720 = vpow2.f32 %v2632_v43  ;;  %v2634_v1 = vmul.f32 1.442695, %v6908_v38  ;;  %v6921_v29 = vpack.c.bf16 %v2709_v36, %v2708_v4  ;;  %vm2590_vm3 = vcmp.gt.f32.partialorder %v6893_v34, 0.0 }
 0x3f8   :  { %v5711_v21 = vpop.eup %5710  ;;  %5722 = vpow2.f32 %v2638_v20  ;;  %v2806_v12 = vrot.slane %v6931_v31, 2  ;;  %vm2588_vm4 = vcmp.gt.f32.partialorder %v6897_v27, 0.0  ;;  %vm2591_vm5 = vcmp.gt.f32.partialorder %v6903_v41, 0.0 }
 0x3f9   :  { %v5713_v55 = vpop.eup %5712  ;;  %5724 = vpow2.f32 %v2634_v1  ;;  %v5130_v42 = vpop.f32.mrb[48].mxu0  ;;  %v2804_v28 = vrot.slane %v6921_v29, 2  ;;  %5212 = vmatprep.mubr.bf16.mxu0 %v6921_v29  ;;  %v4436_v39 = vadd.f32 -1.0, %v5711_v21  ;;  %v3288_v50 = vrot.slane %v6921_v29, 4 }
 0x3fa   :  { %v5715_v14 = vpop.eup %5714  ;;  %v6934_v58 = vadd.f32 %v5130_v42, %v6847_v9  ;;  %v2442_v18 = vpop.f32.mrb[49].mxu0  ;;  %v4434_v10 = vadd.f32 -1.0, %v5713_v55  ;;  %5213 = vmatmul.mubr.bf16.gmra.mrb[68].mxu0 %v6931_v31  ;;  %vm2589_vm6 = vcmp.gt.f32.partialorder %v6908_v38, 0.0 }
 0x3fb   :  { %v5717_v22 = vpop.eup %5716  ;;  %v6941_v51 = vadd.f32 %v6847_v9, %v2442_v18  ;;  %v5131_v37 = vpop.f32.mrb[50].mxu0  ;;  %v4437_v48 = vadd.f32 -1.0, %v5715_v14  ;;  %v2805_v11 = vsel %vm2246_vm7, %v2802_v2, %v2804_v28  ;;  %v2807_v23 = vsel %vm2246_vm7, %v2804_v28, %v2806_v12 }
 0x3fc   :  { %v4435_v15 = vadd.f32 -1.0, %v5717_v22  ;;  %v2644_v49 = vmul.f32 1.442695, %v6934_v58  ;;  %v6947_v0 = vadd.f32 %v5131_v37, %v6847_v9  ;;  %v2445_v47 = vpop.f32.mrb[51].mxu0  ;;  %5161 = vmatmul.mubr.bf16.vlgmr.msra.gmra.mrb[32].mxu1 %v2805_v11  ;;  %v2712_v52 = vsel %vm2584_vm0, %v6873_v62, %v4434_v10 }
 0x3fd   :  { %v2640_v57 = vmul.f32 1.442695, %v6941_v51  ;;  %v6955_v24 = vadd.f32 %v6847_v9, %v2445_v47  ;;  %5241 = vmatpush3.bf16.msra.mxu1 %v6841_v30  ;;  %5164 = vmatprep.mubr.bf16.mxu1 %v2807_v23  ;;  %v2714_v3 = vsel %vm2586_vm15, %v6870_v35, %v4436_v39  ;;  %v2715_v53 = vsel %vm2587_vm1, %v6877_v63, %v4437_v48  ;;  %v5544_v30 = vld [vmem:[%s7449_s7 + $0x90] sm:$0xff]  }
 0x3fe   :  { %5726 = vpow2.f32 %v2644_v49  ;;  %v2646_v56 = vmul.f32 1.442695, %v6947_v0  ;;  %v2713_v6 = vsel %vm2585_vm2, %v6881_v61, %v4435_v15  ;;  %5242 = vmatprep.subr.bf16.mxu1 %v5543_v46  ;;  %v6984_v62 = vsel %vm3284_vm13, %v3285_v33, %v3286_v26 }
 0x3ff   :  { %5728 = vpow2.f32 %v2640_v57  ;;  %v2642_v40 = vmul.f32 1.442695, %v6955_v24  ;;  %v6987_v32 = vpack.c.bf16 %v2713_v6, %v2712_v52  ;;  %v6989_v61 = vpack.c.bf16 %v2715_v53, %v2714_v3 }
 0x400   :  { %v5719_v2 = vpop.eup %5718  ;;  %5730 = vpow2.f32 %v2646_v56  ;;  %v6998_v54 = vsel %vm3284_vm13, %v3286_v26, %v3288_v50  ;;  %v3290_v33 = vrot.slane %v6931_v31, 4  ;;  %vm2594_vm8 = vcmp.gt.f32.partialorder %v6934_v58, 0.0 }
 0x401   :  { %v5721_v13 = vpop.eup %5720  ;;  %5732 = vpow2.f32 %v2642_v40  ;;  %v5134_v35 = vpop.f32.mrb[52].mxu0  ;;  %v4440_v7 = vadd.f32 -1.0, %v5719_v2  ;;  %5216 = vmatprep.mubr.bf16.mxu0 %v6987_v32  ;;  %v2808_v8 = vrot.slane %v6987_v32, 2  ;;  %5243 = vmatpush3.bf16.msra.mxu1 %v5543_v46  ;;  %v2810_v20 = vrot.slane %v6989_v61, 2 }
 0x402   :  { %v5723_v16 = vpop.eup %5722  ;;  %v6993_v63 = vadd.f32 %v5134_v35, %v6847_v9  ;;  %v2458_v59 = vpop.f32.mrb[53].mxu0  ;;  %v4438_v44 = vadd.f32 -1.0, %v5721_v13  ;;  %5217 = vmatmul.mubr.bf16.gmra.mrb[72].mxu0 %v6989_v61  ;;  %5244 = vmatprep.subr.bf16.mxu1 %v5544_v30  ;;  %vm2592_vm9 = vcmp.gt.f32.partialorder %v6941_v51, 0.0  ;;  %vm2595_vm10 = vcmp.gt.f32.partialorder %v6947_v0, 0.0 }
 0x403   :  { %v5725_v45 = vpop.eup %5724  ;;  %v7002_v19 = vadd.f32 %v6847_v9, %v2458_v59  ;;  %v5135_v43 = vpop.f32.mrb[54].mxu0  ;;  %v4441_v1 = vadd.f32 -1.0, %v5723_v16  ;;  %v2809_v14 = vsel %vm2246_vm7, %v2806_v12, %v2808_v8  ;;  %v2811_v18 = vsel %vm2246_vm7, %v2808_v8, %v2810_v20 }
 0x404   :  { %v4439_v4 = vadd.f32 -1.0, %v5725_v45  ;;  %v2652_v36 = vmul.f32 1.442695, %v6993_v63  ;;  %v7009_v21 = vadd.f32 %v5135_v43, %v6847_v9  ;;  %v2461_v60 = vpop.f32.mrb[55].mxu0  ;;  %5165 = vmatmul.mubr.bf16.gmra.mrb[36].mxu1 %v2809_v14  ;;  %v2716_v22 = vsel %vm2588_vm4, %v6897_v27, %v4438_v44  ;;  %v5546_v27 = vld [vmem:[%s7449_s7 + $0xa0] sm:$0xff]  }
 0x405   :  { %v2648_v55 = vmul.f32 1.442695, %v7002_v19  ;;  %v7017_v42 = vadd.f32 %v6847_v9, %v2461_v60  ;;  %5168 = vmatprep.mubr.bf16.mxu1 %v2811_v18  ;;  %5245 = vmatpush3.bf16.msra.mxu1 %v5544_v30  ;;  %v2718_v37 = vsel %vm2590_vm3, %v6893_v34, %v4440_v7  ;;  %v2719_v12 = vsel %vm2591_vm5, %v6903_v41, %v4441_v1  ;;  %v5547_v30 = vld [vmem:[%s7449_s7 + $0xa8] sm:$0xff]  }
 0x406   :  { %5734 = vpow2.f32 %v2652_v36  ;;  %v2654_v28 = vmul.f32 1.442695, %v7009_v21  ;;  %v2717_v10 = vsel %vm2589_vm6, %v6908_v38, %v4439_v4  ;;  %5246 = vmatprep.subr.bf16.mxu1 %v5545_v5  ;;  %v7047_v38 = vpack.c.bf16 %v2719_v12, %v2718_v37 }
 0x407   :  { %5736 = vpow2.f32 %v2648_v55  ;;  %v2650_v26 = vmul.f32 1.442695, %v7017_v42  ;;  %v7045_v49 = vpack.c.bf16 %v2717_v10, %v2716_v22  ;;  %v7058_v57 = vsel %vm3284_vm13, %v3288_v50, %v3290_v33 }
 0x408   :  { %v5727_v39 = vpop.eup %5726  ;;  %5738 = vpow2.f32 %v2654_v28  ;;  %v2814_v3 = vrot.slane %v7047_v38, 2  ;;  %vm2593_vm11 = vcmp.gt.f32.partialorder %v6955_v24, 0.0  ;;  %vm2596_vm12 = vcmp.gt.f32.partialorder %v7002_v19, 0.0 }
 0x409   :  { %v5729_v48 = vpop.eup %5728  ;;  %5740 = vpow2.f32 %v2650_v26  ;;  %v5138_v15 = vpop.f32.mrb[56].mxu0  ;;  %v4444_v34 = vadd.f32 -1.0, %v5727_v39  ;;  %5220 = vmatprep.mubr.bf16.mxu0 %v7045_v49  ;;  %v2812_v52 = vrot.slane %v7045_v49, 2  ;;  %5247 = vmatpush3.bf16.msra.mxu1 %v5545_v5  ;;  %v3292_v45 = vrot.slane %v6987_v32, 4 }
 0x40a   :  { %v5731_v47 = vpop.eup %5730  ;;  %v7051_v41 = vadd.f32 %v5138_v15, %v6847_v9  ;;  %v2474_v46 = vpop.f32.mrb[57].mxu0  ;;  %v4442_v56 = vadd.f32 -1.0, %v5729_v48  ;;  %5221 = vmatmul.mubr.bf16.gmra.mrb[76].mxu0 %v7047_v38  ;;  %5248 = vmatprep.subr.bf16.mxu1 %v5546_v27  ;;  %vm2598_vm14 = vcmp.gt.f32.partialorder %v6993_v63, 0.0  ;;  %vm2599_vm15 = vcmp.gt.f32.partialorder %v7009_v21, 0.0  ;;  %v5549_v15 = vld [vmem:[%s7449_s7 + $0xb8] sm:$0xff]  }
 0x40b   :  { %v5733_v11 = vpop.eup %5732  ;;  %v7062_v23 = vadd.f32 %v6847_v9, %v2474_v46  ;;  %v5139_v40 = vpop.f32.mrb[58].mxu0  ;;  %v4445_v2 = vadd.f32 -1.0, %v5731_v47  ;;  %v2813_v16 = vsel %vm2246_vm7, %v2810_v20, %v2812_v52  ;;  %v2815_v59 = vsel %vm2246_vm7, %v2812_v52, %v2814_v3 }
 0x40c   :  { %v4443_v6 = vadd.f32 -1.0, %v5733_v11  ;;  %v2660_v29 = vmul.f32 1.442695, %v7051_v41  ;;  %v7069_v50 = vadd.f32 %v5139_v40, %v6847_v9  ;;  %v2477_v53 = vpop.f32.mrb[59].mxu0  ;;  %5169 = vmatmul.mubr.bf16.gmra.mrb[40].mxu1 %v2813_v16  ;;  %v2720_v43 = vsel %vm2592_vm9, %v6941_v51, %v4442_v56  ;;  %v5548_v51 = vld [vmem:[%s7449_s7 + $0xb0] sm:$0xff]  }
 0x40d   :  { %v2656_v13 = vmul.f32 1.442695, %v7062_v23  ;;  %v7077_v35 = vadd.f32 %v6847_v9, %v2477_v53  ;;  %5172 = vmatprep.mubr.bf16.mxu1 %v2815_v59  ;;  %5249 = vmatpush3.bf16.msra.mxu1 %v5546_v27  ;;  %v2722_v1 = vsel %vm2594_vm8, %v6934_v58, %v4444_v34  ;;  %v2723_v4 = vsel %vm2595_vm10, %v6947_v0, %v4445_v2 }
 0x40e   :  { %5742 = vpow2.f32 %v2660_v29  ;;  %v2662_v7 = vmul.f32 1.442695, %v7069_v50  ;;  %v2721_v20 = vsel %vm2593_vm11, %v6955_v24, %v4443_v6  ;;  %5250 = vmatprep.subr.bf16.mxu1 %v5547_v30  ;;  %vm2597_vm0 = vcmp.gt.f32.partialorder %v7017_v42, 0.0 }
 0x40f   :  { %5744 = vpow2.f32 %v2656_v13  ;;  %v2658_v44 = vmul.f32 1.442695, %v7077_v35  ;;  %v7107_v5 = vpack.c.bf16 %v2721_v20, %v2720_v43  ;;  %v7109_v24 = vpack.c.bf16 %v2723_v4, %v2722_v1 }
 0x410   :  { %v5735_v8 = vpop.eup %5734  ;;  %5746 = vpow2.f32 %v2662_v7  ;;  %vm2602_vm1 = vcmp.gt.f32.partialorder %v7051_v41, 0.0  ;;  %v7120_v28 = vsel %vm3284_vm13, %v3290_v33, %v3292_v45  ;;  %vm2600_vm2 = vcmp.gt.f32.partialorder %v7062_v23, 0.0 }
 0x411   :  { %v5737_v36 = vpop.eup %5736  ;;  %5748 = vpow2.f32 %v2658_v44  ;;  %v5142_v60 = vpop.f32.mrb[60].mxu0  ;;  %v4448_v58 = vadd.f32 -1.0, %v5735_v8  ;;  %5224 = vmatprep.mubr.bf16.mxu0 %v7107_v5  ;;  %v2816_v10 = vrot.slane %v7107_v5, 2  ;;  %v2818_v37 = vrot.slane %v7109_v24, 2  ;;  %5251 = vmatpush3.bf16.msra.mxu1 %v5547_v30 }
 0x412   :  { %v5739_v55 = vpop.eup %5738  ;;  %v7113_v0 = vadd.f32 %v5142_v60, %v6847_v9  ;;  %v2490_v14 = vpop.f32.mrb[61].mxu0  ;;  %v4446_v26 = vadd.f32 -1.0, %v5737_v36  ;;  %5225 = vmatmul.mubr.bf16.gmra.mrb[80].mxu0 %v7109_v24  ;;  %5252 = vmatprep.subr.bf16.mxu1 %v5548_v51  ;;  %vm2603_vm3 = vcmp.gt.f32.partialorder %v7069_v50, 0.0  ;;  %v3294_v40 = vrot.slane %v6989_v61, 4 }
 0x413   :  { %v5741_v18 = vpop.eup %5740  ;;  %v7125_v22 = vadd.f32 %v6847_v9, %v2490_v14  ;;  %v5143_v39 = vpop.f32.mrb[62].mxu0  ;;  %v4449_v12 = vadd.f32 -1.0, %v5739_v55  ;;  %v2817_v46 = vsel %vm2246_vm7, %v2814_v3, %v2816_v10  ;;  %v2819_v56 = vsel %vm2246_vm7, %v2816_v10, %v2818_v37 }
 0x414   :  { %v4447_v31 = vadd.f32 -1.0, %v5741_v18  ;;  %v2668_v33 = vmul.f32 1.442695, %v7113_v0  ;;  %v7132_v27 = vadd.f32 %v5143_v39, %v6847_v9  ;;  %v2493_v48 = vpop.f32.mrb[63].mxu0  ;;  %5173 = vmatmul.mubr.bf16.gmra.mrb[44].mxu1 %v2817_v46  ;;  %vm2601_vm4 = vcmp.gt.f32.partialorder %v7077_v35, 0.0 }
 0x415   :  { %v2664_v47 = vmul.f32 1.442695, %v7125_v22  ;;  %v7140_v34 = vadd.f32 %v6847_v9, %v2493_v48  ;;  %5176 = vmatprep.mubr.bf16.mxu1 %v2819_v56  ;;  %v2724_v9 = vsel %vm2596_vm12, %v7002_v19, %v4446_v26  ;;  %5253 = vmatpush3.bf16.msra.mxu1 %v5548_v51  ;;  %v2726_v61 = vsel %vm2598_vm14, %v6993_v63, %v4448_v58 }
 0x416   :  { %5750 = vpow2.f32 %v2668_v33  ;;  %v2670_v11 = vmul.f32 1.442695, %v7132_v27  ;;  %v2725_v2 = vsel %vm2597_vm0, %v7017_v42, %v4447_v31  ;;  %v2727_v6 = vsel %vm2599_vm15, %v7009_v21, %v4449_v12  ;;  %5254 = vmatprep.subr.bf16.mxu1 %v5549_v15 }
 0x417   :  { %5752 = vpow2.f32 %v2664_v47  ;;  %v2666_v52 = vmul.f32 1.442695, %v7140_v34  ;;  %v2746_v19 = vpack.c.bf16 %v2725_v2, %v2724_v9  ;;  %v2747_v30 = vpack.c.bf16 %v2727_v6, %v2726_v61 }
 0x418   :  { %v5743_v3 = vpop.eup %5742  ;;  %5754 = vpow2.f32 %v2670_v11  ;;  %v7165_v42 = vsel %vm3284_vm13, %v3292_v45, %v3294_v40  ;;  %v3296_v7 = vrot.slane %v7045_v49, 4  ;;  %v3298_v63 = vrot.slane %v7047_v38, 4 }
 0x419   :  { %v5745_v29 = vpop.eup %5744  ;;  %v4452_v53 = vadd.f32 -1.0, %v5743_v3  ;;  %5756 = vpow2.f32 %v2666_v52  ;;  %5228 = vmatprep.mubr.bf16.mxu0 %v2746_v19  ;;  %v2820_v21 = vrot.slane %v2746_v19, 2  ;;  %v2822_v43 = vrot.slane %v2747_v30, 2  ;;  %5255 = vmatpush3.bf16.msra.mxu1 %v5549_v15 }
 0x41a   :  { %v5747_v13 = vpop.eup %5746  ;;  %v4450_v16 = vadd.f32 -1.0, %v5745_v29  ;;  %5229 = vmatmul.mubr.bf16.gmra.mrb[84].mxu0 %v2747_v30  ;;  %v7176_v49 = vsel %vm3284_vm13, %v3294_v40, %v3296_v7  ;;  %v7179_v38 = vsel %vm3284_vm13, %v3296_v7, %v3298_v63  ;;  %v3300_v4 = vrot.slane %v7107_v5, 4 }
 0x41b   :  { %v5749_v59 = vpop.eup %5748  ;;  %v4453_v44 = vadd.f32 -1.0, %v5747_v13  ;;  %v2730_v8 = vsel %vm2602_vm1, %v7051_v41, %v4452_v53  ;;  %v2821_v45 = vsel %vm2246_vm7, %v2818_v37, %v2820_v21  ;;  %v2823_v1 = vsel %vm2246_vm7, %v2820_v21, %v2822_v43 }
 0x41c   :  { %v4451_v20 = vadd.f32 -1.0, %v5749_v59  ;;  %v2728_v32 = vsel %vm2600_vm2, %v7062_v23, %v4450_v16  ;;  %5177 = vmatmul.mubr.bf16.gmra.mrb[48].mxu1 %v2821_v45  ;;  %v3302_v36 = vrot.slane %v7109_v24, 4  ;;  %v3304_v60 = vrot.slane %v2746_v19, 4 }
 0x41d   :  { %v2731_v41 = vsel %vm2603_vm3, %v7069_v50, %v4453_v44  ;;  %5180 = vmatprep.mubr.bf16.mxu1 %v2823_v1  ;;  %v3301_v58 = vsel %vm3284_vm13, %v3298_v63, %v3300_v4  ;;  %v3306_v14 = vrot.slane %v2747_v30, 4  ;;  %vm2606_vm5 = vcmp.gt.f32.partialorder %v7113_v0, 0.0 }
 0x41e   :  { %v2729_v23 = vsel %vm2601_vm4, %v7077_v35, %v4451_v20  ;;  %v2749_v51 = vpack.c.bf16 %v2731_v41, %v2730_v8  ;;  %v3303_v50 = vsel %vm3284_vm13, %v3300_v4, %v3302_v36  ;;  %v3305_v5 = vsel %vm3284_vm13, %v3302_v36, %v3304_v60  ;;  %v5550_v36 = vld [vmem:[%s7451_s9] sm:$0xff]  }
 0x41f   :  { %v2748_v55 = vpack.c.bf16 %v2729_v23, %v2728_v32  ;;  %v3307_v12 = vsel %vm3284_vm13, %v3304_v60, %v3306_v14  ;;  %vm2607_vm6 = vcmp.gt.f32.partialorder %v7132_v27, 0.0  ;;  %vm2604_vm8 = vcmp.gt.f32.partialorder %v7125_v22, 0.0 }
 0x420   :  { %v5751_v18 = vpop.eup %5750  ;;  %v2826_v26 = vrot.slane %v2749_v51, 2  ;;  %v3310_v39 = vrot.slane %v2749_v51, 4  ;;  %vm2605_vm9 = vcmp.gt.f32.partialorder %v7140_v34, 0.0  ;;  %vm3990_vm4 = vcmask 1041409  }
 0x421   :  { %v5753_v10 = vpop.eup %5752  ;;  %v4456_v37 = vadd.f32 -1.0, %v5751_v18  ;;  %5232 = vmatprep.mubr.bf16.mxu0 %v2748_v55  ;;  %v2824_v35 = vrot.slane %v2748_v55, 2  ;;  %v3308_v24 = vrot.slane %v2748_v55, 4 }
 0x422   :  { %v5755_v31 = vpop.eup %5754  ;;  %v4454_v33 = vadd.f32 -1.0, %v5753_v10  ;;  %5233 = vmatmul.mubr.bf16.gmra.mrb[88].mxu0 %v2749_v51  ;;  %v5791_v51 = vmov 0.0  }
 0x423   :  { %v5757_v48 = vpop.eup %5756  ;;  %v4457_v15 = vadd.f32 -1.0, %v5755_v31  ;;  %v2825_v47 = vsel %vm2246_vm7, %v2822_v43, %v2824_v35  ;;  %v2827_v46 = vsel %vm2246_vm7, %v2824_v35, %v2826_v26  ;;  %v3309_v56 = vsel %vm3284_vm13, %v3306_v14, %v3308_v24  ;;  %5288 = vmatprep.subr.bf16.mxu0 %v5791_v51  ;;  %5308 = vmatprep.subr.bf16.mxu1 %v5791_v51 }
 0x424   :  { %v4455_v11 = vadd.f32 -1.0, %v5757_v48  ;;  %v3311_v40 = vsel %vm3284_vm13, %v3308_v24, %v3310_v39  ;;  %v2734_v52 = vsel %vm2606_vm5, %v7113_v0, %v4456_v37  ;;  %5181 = vmatmul.mubr.bf16.gmra.mrb[52].mxu1 %v2825_v47  ;;  %v2732_v3 = vsel %vm2604_vm8, %v7125_v22, %v4454_v33  ;;  %5289 = vmatpush3.bf16.msra.mxu0 %v5550_v36 }
 0x425   :  { %v2735_v9 = vsel %vm2607_vm6, %v7132_v27, %v4457_v15  ;;  %5184 = vmatprep.mubr.bf16.mxu1 %v2827_v46  ;;  %5290 = vmatprep.subr.bf16.mxu0 %v5791_v51  ;;  %v5552_v46 = vld [vmem:[%s7451_s9 + $0x10] sm:$0xff]   ;;  %vm3992_vm8 = vcmask 1042434  }
 0x426   :  { %v2733_v2 = vsel %vm2605_vm9, %v7140_v34, %v4455_v11  ;;  %v2751_v61 = vpack.c.bf16 %v2735_v9, %v2734_v52 }
 0x427   :  { %v2750_v6 = vpack.c.bf16 %v2733_v2, %v2732_v3 }
 0x428   :  { %v2830_v29 = vrot.slane %v2751_v61, 2  ;;  %v3314_v53 = vrot.slane %v2751_v61, 4 }
 0x429   :  { %5236 = vmatprep.mubr.bf16.mxu0 %v2750_v6  ;;  %v2828_v19 = vrot.slane %v2750_v6, 2  ;;  %v3312_v30 = vrot.slane %v2750_v6, 4 }
 0x42a   :  { %5237 = vmatmul.mubr.bf16.gmra.mrb[92].mxu0 %v2751_v61  ;;  %v2832_v22 = vsel %vm2246_vm7, %v2830_v29, %v6804_v25  ;;  %v3316_v25 = vrot.slane %v5790_v17, 4 }
 0x42b   :  { %v2829_v13 = vsel %vm2246_vm7, %v2826_v26, %v2828_v19  ;;  %v2831_v16 = vsel %vm2246_vm7, %v2828_v19, %v2830_v29  ;;  %v3313_v0 = vsel %vm3284_vm13, %v3310_v39, %v3312_v30  ;;  %v3315_v27 = vsel %vm3284_vm13, %v3312_v30, %v3314_v53  ;;  %v5551_v39 = vld [vmem:[%s7451_s9 + $0x8] sm:$0xff]  }
 0x42c   :  { %5185 = vmatmul.mubr.bf16.gmra.mrb[56].mxu1 %v2829_v13  ;;  %5291 = vmatpush3.bf16.msra.mxu0 %v5551_v39  ;;  %vm5792_vm7 = vmmov 0  }
 0x42d   :  { %5188 = vmatprep.mubr.bf16.mxu1 %v2831_v16  ;;  %5292 = vmatprep.subr.bf16.mxu0 %v5791_v51  ;;  %v5554_v16 = vld [vmem:[%s7451_s9 + $0x20] sm:$0xff]  }
 0x42e   :  { %5304 = vmatprep.mubr.msk.bf16.mxu0 %vm5792_vm7, %v5791_v51 }
 0x430   :  { %5293 = vmatpush3.bf16.msra.mxu0 %v5552_v46 }
 0x431   :  { %5294 = vmatprep.subr.bf16.mxu0 %v5791_v51 }
 0x434   :  { %5189 = vmatmul.mubr.bf16.gmra.mrb[60].mxu1 %v2832_v22  ;;  %v5555_v22 = vld [vmem:[%s7451_s9 + $0x28] sm:$0xff]  }
 0x435   :  { %5256 = vmatprep.mubr.bf16.mxu1 %v6984_v62  ;;  %v3317_v62 = vsel %vm3284_vm13, %v3314_v53, %v3316_v25  ;;  %v5553_v53 = vld [vmem:[%s7451_s9 + $0x18] sm:$0xff]  }
 0x436   :  { %5295 = vmatpush3.bf16.msra.mxu0 %v5553_v53 }
 0x437   :  { %5296 = vmatprep.subr.bf16.mxu0 %v5791_v51 }
 0x43a   :  { %5297 = vmatpush3.bf16.msra.mxu0 %v5554_v16 }
 0x43b   :  { %5298 = vmatprep.subr.bf16.mxu0 %v5791_v51 }
 0x43c   :  { %5257 = vmatmul.mubr.bf16.vlgmr.msra.gmra.mrb[64].mxu1 %v6998_v54 }
 0x43d   :  { %5260 = vmatprep.mubr.bf16.mxu1 %v7058_v57 }
 0x43e   :  { %5299 = vmatpush3.bf16.msra.mxu0 %v5555_v22 }
 0x43f   :  { %5300 = vmatprep.subr.bf16.mxu0 %v5791_v51 }
 0x444   :  { %5261 = vmatmul.mubr.bf16.gmra.mrb[68].mxu1 %v7120_v28 }
 0x445   :  { %5264 = vmatprep.mubr.bf16.mxu1 %v7165_v42 }
 0x44c   :  { %5265 = vmatmul.mubr.bf16.gmra.mrb[72].mxu1 %v7176_v49 }
 0x44d   :  { %5268 = vmatprep.mubr.bf16.mxu1 %v7179_v38 }
 0x454   :  { %5269 = vmatmul.mubr.bf16.gmra.mrb[76].mxu1 %v3301_v58 }
 0x455   :  { %5272 = vmatprep.mubr.bf16.mxu1 %v3303_v50 }
 0x45c   :  { %5273 = vmatmul.mubr.bf16.gmra.mrb[80].mxu1 %v3305_v5 }
 0x45d   :  { %5276 = vmatprep.mubr.bf16.mxu1 %v3307_v12 }
 0x464   :  { %5277 = vmatmul.mubr.bf16.gmra.mrb[84].mxu1 %v3309_v56 }
 0x465   :  { %5280 = vmatprep.mubr.bf16.mxu1 %v3311_v40 }
 0x46c   :  { %5281 = vmatmul.mubr.bf16.gmra.mrb[88].mxu1 %v3313_v0 }
 0x46d   :  { %5284 = vmatprep.mubr.bf16.mxu1 %v3315_v27 }
 0x474   :  { %5285 = vmatmul.mubr.bf16.gmra.mrb[92].mxu1 %v3317_v62  ;;  %v5558_v62 = vld [vmem:[%s7452_s11] sm:$0xff]  }
 0x475   :  { %5324 = vmatprep.mubr.msk.bf16.mxu1 %vm5792_vm7, %v5791_v51  ;;  %5309 = vmatpush3.bf16.msra.mxu1 %v5558_v62 }
 0x476   :  { %5310 = vmatprep.subr.bf16.mxu1 %v5791_v51 }
 0x4c5   :  { %v5210_v54 = vpop.f32.mrb[64].mxu0 }
 0x4c6   :  { %v3140_v57 = vpop.f32.mrb[65].mxu0 }
 0x4c7   :  { %v5211_v28 = vpop.f32.mrb[66].mxu0 }
 0x4c8   :  { %v3143_v34 = vpop.f32.mrb[67].mxu0 }
 0x4cd   :  { %v5214_v42 = vpop.f32.mrb[68].mxu0 }
 0x4ce   :  { %v3156_v7 = vpop.f32.mrb[69].mxu0  ;;  %v5559_v42 = vld [vmem:[%s7452_s11 + $0x8] sm:$0xff]  }
 0x4cf   :  { %v5162_v63 = vpop.f32.mrb[32].mxu1  ;;  %v5215_v59 = vpop.f32.mrb[70].mxu0  ;;  %5311 = vmatpush3.bf16.msra.mxu1 %v5559_v42 }
 0x4d0   :  { %v2931_v44 = vpop.f32.mrb[33].mxu1  ;;  %v3159_v21 = vpop.f32.mrb[71].mxu0  ;;  %5312 = vmatprep.subr.bf16.mxu1 %v5791_v51 }
 0x4d1   :  { %v7222_v43 = vadd.f32 %v3140_v57, %v2931_v44  ;;  %v5163_v8 = vpop.f32.mrb[34].mxu1  ;;  %v5556_v44 = vld [vmem:[%s7451_s9 + $0x30] sm:$0xff]  }
 0x4d2   :  { %v2934_v20 = vpop.f32.mrb[35].mxu1  ;;  %v5560_v8 = vld [vmem:[%s7452_s11 + $0x10] sm:$0xff]   ;;  %5301 = vmatpush3.bf16.msra.mxu0 %v5556_v44 }
 0x4d3   :  { %v7224_v32 = vadd.f32 %v3143_v34, %v2934_v20  ;;  %5302 = vmatprep.subr.bf16.mxu0 %v5791_v51  ;;  %5313 = vmatpush3.bf16.msra.mxu1 %v5560_v8 }
 0x4d4   :  { %5314 = vmatprep.subr.bf16.mxu1 %v5791_v51 }
 0x4d5   :  { %v5218_v17 = vpop.f32.mrb[72].mxu0 }
 0x4d6   :  { %v3172_v49 = vpop.f32.mrb[73].mxu0 }
 0x4d7   :  { %v5166_v38 = vpop.f32.mrb[36].mxu1  ;;  %v5219_v45 = vpop.f32.mrb[74].mxu0 }
 0x4d8   :  { %v2947_v1 = vpop.f32.mrb[37].mxu1  ;;  %v3175_v41 = vpop.f32.mrb[75].mxu0 }
 0x4d9   :  { %v7226_v4 = vadd.f32 %v3156_v7, %v2947_v1  ;;  %v5167_v23 = vpop.f32.mrb[38].mxu1 }
 0x4da   :  { %v2950_v60 = vpop.f32.mrb[39].mxu1  ;;  %v5561_v23 = vld [vmem:[%s7452_s11 + $0x18] sm:$0xff]  }
 0x4db   :  { %v7233_v55 = vadd.f32 %v3159_v21, %v2950_v60  ;;  %5315 = vmatpush3.bf16.msra.mxu1 %v5561_v23 }
 0x4dc   :  { %5316 = vmatprep.subr.bf16.mxu1 %v5791_v51 }
 0x4dd   :  { %v5222_v58 = vpop.f32.mrb[76].mxu0 }
 0x4de   :  { %v3188_v14 = vpop.f32.mrb[77].mxu0 }
 0x4df   :  { %v5170_v18 = vpop.f32.mrb[40].mxu1  ;;  %v5223_v26 = vpop.f32.mrb[78].mxu0 }
 0x4e0   :  { %v2963_v50 = vpop.f32.mrb[41].mxu1  ;;  %v3191_v5 = vpop.f32.mrb[79].mxu0  ;;  %v5562_v18 = vld [vmem:[%s7452_s11 + $0x20] sm:$0xff]  }
 0x4e1   :  { %v7239_v10 = vadd.f32 %v3172_v49, %v2963_v50  ;;  %v5171_v37 = vpop.f32.mrb[42].mxu1  ;;  %v5557_v49 = vld [vmem:[%s7451_s9 + $0x38] sm:$0xff]   ;;  %5317 = vmatpush3.bf16.msra.mxu1 %v5562_v18 }
 0x4e2   :  { %v2966_v35 = vpop.f32.mrb[43].mxu1  ;;  %5303 = vmatpush3.bf16.msra.mxu0 %v5557_v49  ;;  %5318 = vmatprep.subr.bf16.mxu1 %v5791_v51 }
 0x4e3   :  { %v7241_v12 = vadd.f32 %v3175_v41, %v2966_v35 }
 0x4e5   :  { %v5226_v24 = vpop.f32.mrb[80].mxu0 }
 0x4e6   :  { %v3204_v31 = vpop.f32.mrb[81].mxu0 }
 0x4e7   :  { %v5174_v33 = vpop.f32.mrb[44].mxu1  ;;  %v5227_v48 = vpop.f32.mrb[82].mxu0 }
 0x4e8   :  { %v2979_v15 = vpop.f32.mrb[45].mxu1  ;;  %v3207_v47 = vpop.f32.mrb[83].mxu0 }
 0x4e9   :  { %v7247_v11 = vadd.f32 %v3188_v14, %v2979_v15  ;;  %v5175_v56 = vpop.f32.mrb[46].mxu1  ;;  %v7319_v15 = vld [vmem:[%s7453_s8] ss:$0 sm:$0xff] }
 0x4ea   :  { %v2982_v40 = vpop.f32.mrb[47].mxu1 }
 0x4eb   :  { %v7249_v52 = vadd.f32 %v3191_v5, %v2982_v40  ;;  %v5563_v5 = vld [vmem:[%s7452_s11 + $0x28] sm:$0xff]  }
 0x4ec   :  { %5319 = vmatpush3.bf16.msra.mxu1 %v5563_v5 }
 0x4ed   :  { %v5230_v9 = vpop.f32.mrb[84].mxu0  ;;  %5320 = vmatprep.subr.bf16.mxu1 %v5791_v51 }
 0x4ee   :  { %v3220_v3 = vpop.f32.mrb[85].mxu0 }
 0x4ef   :  { %v5178_v2 = vpop.f32.mrb[48].mxu1  ;;  %v5231_v61 = vpop.f32.mrb[86].mxu0 }
 0x4f0   :  { %v2995_v6 = vpop.f32.mrb[49].mxu1  ;;  %v3223_v29 = vpop.f32.mrb[87].mxu0  ;;  %v3774_v2 = vlaneseq }
 0x4f1   :  { %v7255_v19 = vadd.f32 %v3204_v31, %v2995_v6  ;;  %v5179_v30 = vpop.f32.mrb[50].mxu1  ;;  %v5564_v31 = vld [vmem:[%s7452_s11 + $0x30] sm:$0xff]  }
 0x4f2   :  { %v2998_v13 = vpop.f32.mrb[51].mxu1  ;;  %5321 = vmatpush3.bf16.msra.mxu1 %v5564_v31  ;;  %v3775_v30 = vshrl.u32 %v3774_v2, 7 }
 0x4f3   :  { %v7262_v0 = vadd.f32 %v3207_v47, %v2998_v13  ;;  %v5565_v47 = vld [vmem:[%s7452_s11 + $0x38] sm:$0xff]   ;;  %5322 = vmatprep.subr.bf16.mxu1 %v5791_v51 }
 0x4f5   :  { %v5234_v27 = vpop.f32.mrb[88].mxu0 }
 0x4f6   :  { %v3236_v25 = vpop.f32.mrb[89].mxu0  ;;  %5323 = vmatpush3.bf16.msra.mxu1 %v5565_v47 }
 0x4f7   :  { %v5182_v54 = vpop.f32.mrb[52].mxu1  ;;  %v5235_v57 = vpop.f32.mrb[90].mxu0 }
 0x4f8   :  { %v3011_v28 = vpop.f32.mrb[53].mxu1  ;;  %v3239_v34 = vpop.f32.mrb[91].mxu0 }
 0x4f9   :  { %v7275_v7 = vadd.f32 %v3220_v3, %v3011_v28  ;;  %v5183_v63 = vpop.f32.mrb[54].mxu1  ;;  %v3783_v28 = vand.u32 3, %v3775_v30 }
 0x4fa   :  { %v3014_v59 = vpop.f32.mrb[55].mxu1 }
 0x4fb   :  { %v7281_v21 = vadd.f32 %v3223_v29, %v3014_v59  ;;  %vm7336_vm10 = vcmp.eq.s32.totalorder %v3783_v28, 0 }
 0x4fd   :  { %v5238_v20 = vpop.f32.mrb[92].mxu0 }
 0x4fe   :  { %v3252_v17 = vpop.f32.mrb[93].mxu0 }
 0x4ff   :  { %v5186_v38 = vpop.f32.mrb[56].mxu1  ;;  %v5239_v45 = vpop.f32.mrb[94].mxu0 }
 0x500   :  { %v3027_v1 = vpop.f32.mrb[57].mxu1  ;;  %v3255_v41 = vpop.f32.mrb[95].mxu0 }
 0x501   :  { %v7295_v36 = vadd.f32 %v3236_v25, %v3027_v1  ;;  %v5187_v60 = vpop.f32.mrb[58].mxu1 }
 0x502   :  { %v3030_v58 = vpop.f32.mrb[59].mxu1 }
 0x503   :  { %v7298_v14 = vadd.f32 %v3239_v34, %v3030_v58 }
 0x507   :  { %v5190_v26 = vpop.f32.mrb[60].mxu1 }
 0x508   :  { %v3043_v50 = vpop.f32.mrb[61].mxu1 }
 0x509   :  { %v7307_v39 = vadd.f32 %v3252_v17, %v3043_v50  ;;  %v5191_v37 = vpop.f32.mrb[62].mxu1 }
 0x50a   :  { %v3046_v35 = vpop.f32.mrb[63].mxu1 }
 0x50b   :  { %v7310_v24 = vadd.f32 %v3255_v41, %v3046_v35 }
 0x50f   :  { %v5258_v33 = vpop.f32.mrb[64].mxu1 }
 0x510   :  { %v3416_v48 = vpop.f32.mrb[65].mxu1 }
 0x511   :  { %v3543_v46 = vadd.f32 %v3416_v48, %v7222_v43  ;;  %v5259_v56 = vpop.f32.mrb[66].mxu1 }
 0x512   :  { %v3419_v40 = vpop.f32.mrb[67].mxu1 }
 0x513   :  { %v3582_v9 = vadd.f32 %v7319_v15, %v3543_v46  ;;  %v3544_v3 = vadd.f32 %v3419_v40, %v7224_v32  ;;  %v3776_v32 = vadd.s32 8, %v3775_v30 }
 0x515   :  { %v3646_v61 = vmul.f32 1.442695, %v3582_v9  ;;  %v3583_v6 = vadd.f32 %v7319_v15, %v3544_v3  ;;  %v3790_v34 = vand.u32 3, %v3776_v32  ;;  %vm3614_vm13 = vcmp.gt.f32.partialorder %v3582_v9, 0.0 }
 0x517   :  { %5758 = vpow2.f32 %v3646_v61  ;;  %v3648_v29 = vmul.f32 1.442695, %v3583_v6  ;;  %v5262_v53 = vpop.f32.mrb[68].mxu1  ;;  %vm7340_vm11 = vcmp.eq.s32.totalorder %v3790_v34, 0  ;;  %vm3615_vm12 = vcmp.gt.f32.partialorder %v3583_v6, 0.0 }
 0x518   :  { %v3432_v13 = vpop.f32.mrb[69].mxu1 }
 0x519   :  { %5760 = vpow2.f32 %v3648_v29  ;;  %v3547_v43 = vadd.f32 %v3432_v13, %v7226_v4  ;;  %v5263_v16 = vpop.f32.mrb[70].mxu1 }
 0x51a   :  { %v3435_v51 = vpop.f32.mrb[71].mxu1 }
 0x51b   :  { %v3586_v27 = vadd.f32 %v7319_v15, %v3547_v43  ;;  %v3548_v22 = vadd.f32 %v3435_v51, %v7233_v55 }
 0x51d   :  { %v3654_v25 = vmul.f32 1.442695, %v3586_v27  ;;  %v3587_v62 = vadd.f32 %v7319_v15, %v3548_v22  ;;  %vm3618_vm14 = vcmp.gt.f32.partialorder %v3586_v27, 0.0 }
 0x51f   :  { %5762 = vpow2.f32 %v3654_v25  ;;  %v3656_v54 = vmul.f32 1.442695, %v3587_v62  ;;  %v5266_v57 = vpop.f32.mrb[72].mxu1  ;;  %vm3619_vm15 = vcmp.gt.f32.partialorder %v3587_v62, 0.0 }
 0x520   :  { %v3448_v42 = vpop.f32.mrb[73].mxu1 }
 0x521   :  { %v5759_v63 = vpop.eup %5758  ;;  %5764 = vpow2.f32 %v3656_v54  ;;  %v3551_v4 = vadd.f32 %v3448_v42, %v7239_v10  ;;  %v5267_v59 = vpop.f32.mrb[74].mxu1 }
 0x522   :  { %v4515_v44 = vadd.f32 -1.0, %v5759_v63  ;;  %v3451_v8 = vpop.f32.mrb[75].mxu1 }
 0x523   :  { %v5761_v20 = vpop.eup %5760  ;;  %v3590_v55 = vadd.f32 %v7319_v15, %v3551_v4  ;;  %v3552_v17 = vadd.f32 %v3451_v8, %v7241_v12 }
 0x524   :  { %v3742_v49 = vsel %vm3614_vm13, %v3582_v9, %v4515_v44  ;;  %v4516_v45 = vadd.f32 -1.0, %v5761_v20  ;;  %vm3994_vm13 = vcmask 1043459  }
 0x525   :  { %v3662_v10 = vmul.f32 1.442695, %v3590_v55  ;;  %v3591_v41 = vadd.f32 %v7319_v15, %v3552_v17  ;;  %v3839_v60 = vsel %vm7336_vm10, %v3742_v49, 0.0  ;;  %vm3622_vm0 = vcmp.gt.f32.partialorder %v3590_v55, 0.0 }
 0x526   :  { %v3743_v23 = vsel %vm3615_vm12, %v3583_v6, %v4516_v45 }
 0x527   :  { %v3840_v12 = vsel %vm7340_vm11, %v3743_v23, 0.0  ;;  %5766 = vpow2.f32 %v3662_v10  ;;  %v3664_v58 = vmul.f32 1.442695, %v3591_v41  ;;  %v5270_v18 = vpop.f32.mrb[76].mxu1  ;;  %vm3623_vm1 = vcmp.gt.f32.partialorder %v3591_v41, 0.0 }
 0x528   :  { %v3871_v26 = vadd.f32 %v3840_v12, %v3839_v60  ;;  %v3464_v50 = vpop.f32.mrb[77].mxu1 }
 0x529   :  { %v5763_v5 = vpop.eup %5762  ;;  %5768 = vpow2.f32 %v3664_v58  ;;  %v3555_v37 = vadd.f32 %v3464_v50, %v7247_v11  ;;  %v5271_v35 = vpop.f32.mrb[78].mxu1 }
 0x52a   :  { %v3874_v31 = vrot.slane %v3871_v26, 4  ;;  %v4519_v33 = vadd.f32 -1.0, %v5763_v5  ;;  %v3467_v48 = vpop.f32.mrb[79].mxu1 }
 0x52b   :  { %v5765_v47 = vpop.eup %5764  ;;  %v7351_v46 = vadd.f32 %v7319_v15, %v3555_v37  ;;  %v3556_v56 = vadd.f32 %v3467_v48, %v7249_v52 }
 0x52c   :  { %v3875_v40 = vadd.f32 %v3874_v31, %v3871_v26  ;;  %v3746_v9 = vsel %vm3618_vm14, %v3586_v27, %v4519_v33  ;;  %v4520_v3 = vadd.f32 -1.0, %v5765_v47 }
 0x52d   :  { %v3670_v2 = vmul.f32 1.442695, %v7351_v46  ;;  %v7356_v61 = vadd.f32 %v7319_v15, %v3556_v56  ;;  %v3843_v29 = vsel %vm7336_vm10, %v3746_v9, 0.0  ;;  %vm3626_vm2 = vcmp.gt.f32.partialorder %v7351_v46, 0.0 }
 0x52e   :  { %v3876_v11 = vrot.slane %v3875_v40, 2  ;;  %v3747_v6 = vsel %vm3619_vm15, %v3587_v62, %v4520_v3  ;;  %vm3996_vm15 = vcmask 1044484  }
 0x52f   :  { %v3844_v53 = vsel %vm7340_vm11, %v3747_v6, 0.0  ;;  %5770 = vpow2.f32 %v3670_v2  ;;  %v3672_v52 = vmul.f32 1.442695, %v7356_v61  ;;  %v5274_v30 = vpop.f32.mrb[80].mxu1  ;;  %vm3627_vm3 = vcmp.gt.f32.partialorder %v7356_v61, 0.0 }
 0x530   :  { %v3877_v13 = vadd.f32 %v3876_v11, %v3875_v40  ;;  %v3880_v43 = vadd.f32 %v3844_v53, %v3843_v29  ;;  %v3480_v16 = vpop.f32.mrb[81].mxu1 }
 0x531   :  { %v5767_v51 = vpop.eup %5766  ;;  %5772 = vpow2.f32 %v3672_v52  ;;  %v3559_v27 = vadd.f32 %v3480_v16, %v7255_v19  ;;  %v5275_v22 = vpop.f32.mrb[82].mxu1 }
 0x532   :  { %v3878_v32 = vrot.slane %v3877_v13, 1  ;;  %v3883_v25 = vrot.slane %v3880_v43, 4  ;;  %v4523_v62 = vadd.f32 -1.0, %v5767_v51  ;;  %v3483_v54 = vpop.f32.mrb[83].mxu1 }
 0x533   :  { %v5769_v57 = vpop.eup %5768  ;;  %v7365_v28 = vadd.f32 %v7319_v15, %v3559_v27  ;;  %v3560_v34 = vadd.f32 %v3483_v54, %v7262_v0 }
 0x534   :  { %v3884_v42 = vadd.f32 %v3883_v25, %v3880_v43  ;;  %v3750_v63 = vsel %vm3622_vm0, %v3590_v55, %v4523_v62  ;;  %v4524_v4 = vadd.f32 -1.0, %v5769_v57  ;;  %v3879_v44 = vadd.f32 %v3878_v32, %v3877_v13 }
 0x535   :  { %v3678_v59 = vmul.f32 1.442695, %v7365_v28  ;;  %v7370_v19 = vadd.f32 %v7319_v15, %v3560_v34  ;;  %v3847_v17 = vsel %vm7336_vm10, %v3750_v63, 0.0  ;;  %vm3630_vm5 = vcmp.gt.f32.partialorder %v7365_v28, 0.0 }
 0x536   :  { %v3885_v8 = vrot.slane %v3884_v42, 2  ;;  %v3751_v20 = vsel %vm3623_vm1, %v3591_v41, %v4524_v4  ;;  %v3943_v37 = vpack.c.bf16 %v3879_v44, %v3879_v44 }
 0x537   :  { %v3848_v49 = vsel %vm7340_vm11, %v3751_v20, 0.0  ;;  %5774 = vpow2.f32 %v3678_v59  ;;  %v3680_v0 = vmul.f32 1.442695, %v7370_v19  ;;  %v5278_v55 = vpop.f32.mrb[84].mxu1  ;;  %vm3631_vm6 = vcmp.gt.f32.partialorder %v7370_v19, 0.0 }
 0x538   :  { %v3886_v45 = vadd.f32 %v3885_v8, %v3884_v42  ;;  %v3889_v10 = vadd.f32 %v3848_v49, %v3847_v17  ;;  %v3496_v23 = vpop.f32.mrb[85].mxu1  ;;  %v3982_v29 = vunpack.c.l.b16 %v3943_v37 }
 0x539   :  { %v5771_v60 = vpop.eup %5770  ;;  %5776 = vpow2.f32 %v3680_v0  ;;  %v3563_v12 = vadd.f32 %v3496_v23, %v7275_v7  ;;  %v5279_v58 = vpop.f32.mrb[86].mxu1 }
 0x53a   :  { %v3887_v18 = vrot.slane %v3886_v45, 1  ;;  %v3892_v41 = vrot.slane %v3889_v10, 4  ;;  %v4527_v26 = vadd.f32 -1.0, %v5771_v60  ;;  %v3499_v50 = vpop.f32.mrb[87].mxu1 }
 0x53b   :  { %v5773_v5 = vpop.eup %5772  ;;  %v7380_v35 = vadd.f32 %v7319_v15, %v3563_v12  ;;  %v3564_v31 = vadd.f32 %v3499_v50, %v7281_v21 }
 0x53c   :  { %v3888_v33 = vadd.f32 %v3887_v18, %v3886_v45  ;;  %v3893_v48 = vadd.f32 %v3892_v41, %v3889_v10  ;;  %v3754_v47 = vsel %vm3626_vm2, %v7351_v46, %v4527_v26  ;;  %v4528_v56 = vadd.f32 -1.0, %v5773_v5 }
 0x53d   :  { %v3686_v7 = vmul.f32 1.442695, %v7380_v35  ;;  %v7387_v40 = vadd.f32 %v7319_v15, %v3564_v31  ;;  %v3851_v21 = vsel %vm7336_vm10, %v3754_v47, 0.0  ;;  %vm3634_vm9 = vcmp.gt.f32.partialorder %v7380_v35, 0.0 }
 0x53e   :  { %v3944_v9 = vpack.c.bf16 %v3888_v33, %v3888_v33  ;;  %v3894_v3 = vrot.slane %v3893_v48, 2  ;;  %v3755_v2 = vsel %vm3627_vm3, %v7356_v61, %v4528_v56  ;;  %vm3998_vm2 = vcmask 1045509  }
 0x53f   :  { %v3852_v11 = vsel %vm7340_vm11, %v3755_v2, 0.0  ;;  %5778 = vpow2.f32 %v3686_v7  ;;  %v3688_v46 = vmul.f32 1.442695, %v7387_v40  ;;  %v5282_v6 = vpop.f32.mrb[88].mxu1  ;;  %vm3635_vm7 = vcmp.gt.f32.partialorder %v7387_v40, 0.0 }
 0x540   :  { %v3983_v53 = vunpack.c.l.b16 %v3944_v9  ;;  %v3895_v52 = vadd.f32 %v3894_v3, %v3893_v48  ;;  %v3898_v30 = vadd.f32 %v3852_v11, %v3851_v21  ;;  %v3512_v13 = vpop.f32.mrb[89].mxu1  ;;  %vm4000_vm3 = vcmask 1046534  }
 0x541   :  { %v5775_v43 = vpop.eup %5774  ;;  %5780 = vpow2.f32 %v3688_v46  ;;  %v3567_v16 = vadd.f32 %v3512_v13, %v7295_v36  ;;  %v5283_v61 = vpop.f32.mrb[90].mxu1 }
 0x542   :  { %v3991_v51 = vsel %vm3990_vm4, %v3983_v53, %v3982_v29  ;;  %v3896_v27 = vrot.slane %v3895_v52, 1  ;;  %v3901_v22 = vrot.slane %v3898_v30, 4  ;;  %v4531_v32 = vadd.f32 -1.0, %v5775_v43  ;;  %v3515_v25 = vpop.f32.mrb[91].mxu1 }
 0x543   :  { %v5777_v62 = vpop.eup %5776  ;;  %v7399_v54 = vadd.f32 %v7319_v15, %v3567_v16  ;;  %v3568_v57 = vadd.f32 %v3515_v25, %v7298_v14 }
 0x544   :  { %v3897_v34 = vadd.f32 %v3896_v27, %v3895_v52  ;;  %v3902_v42 = vadd.f32 %v3901_v22, %v3898_v30  ;;  %v3758_v63 = vsel %vm3630_vm5, %v7365_v28, %v4531_v32  ;;  %v4532_v36 = vadd.f32 -1.0, %v5777_v62 }
 0x545   :  { %v3694_v4 = vmul.f32 1.442695, %v7399_v54  ;;  %v3607_v59 = vadd.f32 %v7319_v15, %v3568_v57  ;;  %v3855_v17 = vsel %vm7336_vm10, %v3758_v63, 0.0  ;;  %vm3638_vm12 = vcmp.gt.f32.partialorder %v7399_v54, 0.0 }
 0x546   :  { %v3945_v44 = vpack.c.bf16 %v3897_v34, %v3897_v34  ;;  %v3903_v8 = vrot.slane %v3902_v42, 2  ;;  %v3759_v20 = vsel %vm3631_vm6, %v7370_v19, %v4532_v36 }
 0x547   :  { %v3856_v14 = vsel %vm7340_vm11, %v3759_v20, 0.0  ;;  %5782 = vpow2.f32 %v3694_v4  ;;  %v3696_v28 = vmul.f32 1.442695, %v3607_v59  ;;  %v5286_v49 = vpop.f32.mrb[92].mxu1  ;;  %vm3639_vm14 = vcmp.gt.f32.partialorder %v3607_v59, 0.0 }
 0x548   :  { %v3984_v0 = vunpack.c.l.b16 %v3945_v44  ;;  %v3904_v55 = vadd.f32 %v3903_v8, %v3902_v42  ;;  %v3907_v45 = vadd.f32 %v3856_v14, %v3855_v17  ;;  %v3528_v10 = vpop.f32.mrb[93].mxu1 }
 0x549   :  { %v5779_v23 = vpop.eup %5778  ;;  %5784 = vpow2.f32 %v3696_v28  ;;  %v3571_v60 = vadd.f32 %v3528_v10, %v7307_v39  ;;  %v5287_v12 = vpop.f32.mrb[94].mxu1 }
 0x54a   :  { %v3993_v19 = vsel %vm3992_vm8, %v3984_v0, %v3991_v51  ;;  %v3905_v58 = vrot.slane %v3904_v55, 1  ;;  %v3910_v18 = vrot.slane %v3907_v45, 4  ;;  %v4535_v41 = vadd.f32 -1.0, %v5779_v23  ;;  %v3531_v26 = vpop.f32.mrb[95].mxu1 }
 0x54b   :  { %v5781_v50 = vpop.eup %5780  ;;  %v3610_v5 = vadd.f32 %v7319_v15, %v3571_v60  ;;  %v3572_v37 = vadd.f32 %v3531_v26, %v7310_v24 }
 0x54c   :  { %v3906_v31 = vadd.f32 %v3905_v58, %v3904_v55  ;;  %v3911_v33 = vadd.f32 %v3910_v18, %v3907_v45  ;;  %v3762_v48 = vsel %vm3634_vm9, %v7380_v35, %v4535_v41  ;;  %v4536_v47 = vadd.f32 -1.0, %v5781_v50 }
 0x54d   :  { %v3702_v39 = vmul.f32 1.442695, %v3610_v5  ;;  %v3611_v56 = vadd.f32 %v7319_v15, %v3572_v37  ;;  %v3859_v2 = vsel %vm7336_vm10, %v3762_v48, 0.0  ;;  %vm3642_vm0 = vcmp.gt.f32.partialorder %v3610_v5, 0.0 }
 0x54e   :  { %v3946_v7 = vpack.c.bf16 %v3906_v31, %v3906_v31  ;;  %v3912_v9 = vrot.slane %v3911_v33, 2  ;;  %v3763_v3 = vsel %vm3635_vm7, %v7387_v40, %v4536_v47  ;;  %v4547_v47 = vld [vmem:[%s7454_s10] ss:$0 sm:$0xff] }
 0x54f   :  { %v3860_v24 = vsel %vm7340_vm11, %v3763_v3, 0.0  ;;  %5786 = vpow2.f32 %v3702_v39  ;;  %v3704_v21 = vmul.f32 1.442695, %v3611_v56  ;;  %vm3643_vm1 = vcmp.gt.f32.partialorder %v3611_v56, 0.0 }
 0x550   :  { %v3985_v35 = vunpack.c.l.b16 %v3946_v7  ;;  %v3913_v11 = vadd.f32 %v3912_v9, %v3911_v33  ;;  %v3916_v46 = vadd.f32 %v3860_v24, %v3859_v2 }
 0x551   :  { %v5783_v6 = vpop.eup %5782  ;;  %5788 = vpow2.f32 %v3704_v21  ;;  %v4556_v21 = vld [vmem:[%s7455_s12] ss:$0 sm:$0xff] }
 0x552   :  { %v3995_v29 = vsel %vm3994_vm13, %v3985_v35, %v3993_v19  ;;  %v3914_v15 = vrot.slane %v3913_v11, 1  ;;  %v3919_v53 = vrot.slane %v3916_v46, 4  ;;  %v4539_v52 = vadd.f32 -1.0, %v5783_v6 }
 0x553   :  { %v5785_v30 = vpop.eup %5784 }
 0x554   :  { %v3915_v40 = vadd.f32 %v3914_v15, %v3913_v11  ;;  %v3920_v13 = vadd.f32 %v3919_v53, %v3916_v46  ;;  %v3766_v43 = vsel %vm3638_vm12, %v7399_v54, %v4539_v52  ;;  %v4540_v16 = vadd.f32 -1.0, %v5785_v30 }
 0x555   :  { %v3863_v22 = vsel %vm7336_vm10, %v3766_v43, 0.0 }
 0x556   :  { %v3947_v61 = vpack.c.bf16 %v3915_v40, %v3915_v40  ;;  %v3921_v51 = vrot.slane %v3920_v13, 2  ;;  %v3767_v27 = vsel %vm3639_vm14, %v3607_v59, %v4540_v16 }
 0x557   :  { %v3864_v32 = vsel %vm7340_vm11, %v3767_v27, 0.0 }
 0x558   :  { %v3986_v25 = vunpack.c.l.b16 %v3947_v61  ;;  %v3922_v62 = vadd.f32 %v3921_v51, %v3920_v13  ;;  %v3925_v57 = vadd.f32 %v3864_v32, %v3863_v22 }
 0x559   :  { %v5787_v34 = vpop.eup %5786 }
 0x55a   :  { %v3923_v42 = vrot.slane %v3922_v62, 1  ;;  %v3928_v63 = vrot.slane %v3925_v57, 4  ;;  %v4543_v36 = vadd.f32 -1.0, %v5787_v34  ;;  %v3997_v54 = vsel %vm3996_vm15, %v3986_v25, %v3995_v29 }
 0x55b   :  { %v5789_v4 = vpop.eup %5788 }
 0x55c   :  { %v3924_v44 = vadd.f32 %v3923_v42, %v3922_v62  ;;  %v3929_v8 = vadd.f32 %v3928_v63, %v3925_v57  ;;  %v3770_v59 = vsel %vm3642_vm0, %v3610_v5, %v4543_v36  ;;  %v4544_v20 = vadd.f32 -1.0, %v5789_v4 }
 0x55d   :  { %v3867_v49 = vsel %vm7336_vm10, %v3770_v59, 0.0  ;;  %vm4002_vm10 = vcmask 1047559  }
 0x55e   :  { %v3948_v17 = vpack.c.bf16 %v3924_v44, %v3924_v44  ;;  %v3930_v14 = vrot.slane %v3929_v8, 2  ;;  %v3771_v28 = vsel %vm3643_vm1, %v3611_v56, %v4544_v20 }
 0x55f   :  { %v3868_v0 = vsel %vm7340_vm11, %v3771_v28, 0.0 }
 0x560   :  { %v3987_v55 = vunpack.c.l.b16 %v3948_v17  ;;  %v3931_v45 = vadd.f32 %v3930_v14, %v3929_v8  ;;  %v3934_v10 = vadd.f32 %v3868_v0, %v3867_v49 }
 0x562   :  { %v3932_v23 = vrot.slane %v3931_v45, 1  ;;  %v3937_v60 = vrot.slane %v3934_v10, 4  ;;  %v3999_v12 = vsel %vm3998_vm2, %v3987_v55, %v3997_v54 }
 0x564   :  { %v3933_v19 = vadd.f32 %v3932_v23, %v3931_v45  ;;  %v3938_v58 = vadd.f32 %v3937_v60, %v3934_v10 }
 0x566   :  { %v3949_v18 = vpack.c.bf16 %v3933_v19, %v3933_v19  ;;  %v3939_v41 = vrot.slane %v3938_v58, 2 }
 0x568   :  { %v3988_v26 = vunpack.c.l.b16 %v3949_v18  ;;  %v3940_v50 = vadd.f32 %v3939_v41, %v3938_v58 }
 0x56a   :  { %v3941_v5 = vrot.slane %v3940_v50, 1  ;;  %v4001_v38 = vsel %vm4000_vm3, %v3988_v26, %v3999_v12 }
 0x56c   :  { %v3942_v37 = vadd.f32 %v3941_v5, %v3940_v50 }
 0x56e   :  { %v3950_v31 = vpack.c.bf16 %v3942_v37, %v3942_v37 }
 0x570   :  { %v3989_v1 = vunpack.c.l.b16 %v3950_v31 }
 0x572   :  { %v4003_v33 = vsel %vm4002_vm10, %v3989_v1, %v4001_v38 }
 0x573   :  { %v4004_v48 = vpack.c.b16 %v4003_v33, %v4003_v33 }
 0x575   :  { %5305 = vmatmul.mubr.bf16.vlgmr.msra.gmra.mrb[96].mxu0 %v4004_v48 }
 0x648   :  { %v4088_v39 = vpop.f32.mrb[96].mxu0 }
 0x649   :  { %v4089_v56 = vadd.f32 %v4547_v47, %v4088_v39  ;;  %v5306_v7 = vpop.f32.mrb[97].mxu0 }
 0x64a   :  { %v4091_v9 = vpop.f32.mrb[98].mxu0 }
 0x64b   :  { %v4094_v3 = vmax.f32 %v4089_v56, 0.0  ;;  %v5307_v2 = vpop.f32.mrb[99].mxu0 }
 0x64d   :  { %v4095_v24 = vpack.c.bf16 %v4094_v3, %v4094_v3 }
 0x64f   :  { %5325 = vmatmul.mubr.bf16.vlgmr.msra.gmra.mrb[96].mxu1 %v4095_v24 }
 0x722   :  { %v4201_v35 = vpop.f32.mrb[96].mxu1 }
 0x723   :  { %v4202_v11 = vadd.f32 %v4556_v21, %v4201_v35  ;;  %v5326_v46 = vpop.f32.mrb[97].mxu1 }
 0x724   :  { %v4204_v6 = vpop.f32.mrb[98].mxu1 }
 0x725   :  { %4207 = vst [vmem:[%s7456_s13] sm:$0xff] %v4202_v11  ;;  %v5327_v29 = vpop.f32.mrb[99].mxu1 }

</bundles_post_ra>
